<compile_context>
chip_gen: v7x
topology: tpu7x:2x2x1
jax: 0.10.0
libtpu: 0.0.40
codegen_flags: <defaults>
</compile_context>

<pallas_src>
import jax
import jax.numpy as jnp
from jax.experimental import pallas as pl
from jax.experimental.pallas import tpu as pltpu


def fold_bn(gamma, beta, mean, var, eps=1e-5):
    scale = gamma / jnp.sqrt(var + eps)
    shift = beta - mean * scale
    return scale, shift


def _pick_row_tile(H, Wp, target=256, cap=512):
    """Pick TH dividing H so the per-band matmul has ~`target` rows (M = TH*Wp),
    preferring M a multiple of 8 (dense sublanes), capped to bound the f32
    accumulator live range."""
    cands = [t for t in range(1, H + 1) if H % t == 0 and t * Wp <= cap]
    if not cands:
        return 1
    return min(cands, key=lambda t: ((t * Wp) % 8 != 0, abs(t * Wp - target)))


def _vmem_limit_bytes():
    # ~3/4 of physical VMEM, capped: ~96 MiB on v5e/v6e (128 MiB physical),
    # ~48 MiB on v7x (64 MiB/TC). Fallback is safe on every generation.
    try:
        cap = int(pltpu.get_tpu_info().vmem_capacity_bytes)
    except Exception:
        cap = 64 * 1024 * 1024
    return int(min(max(cap * 3 // 4, 32 * 1024 * 1024), 96 * 1024 * 1024))


def _make_kernel(H, W, Cin, Cout, TH, has_downsample):
    """Kernel body for fixed static shapes. Refs per grid step (batch squeezed):
      x_ref    : ((H+4)*(W+2), Cin)   bf16 zero-padded, flattened input slab
      w1_ref   : (9, Cin, Cout)       bf16 conv1 taps, bn1 scale folded in
      w2_ref   : (9, Cout, Cout)      bf16 conv2 taps, bn2 scale folded in
      wd_ref   : (Cin, Cout)          bf16 1x1 shortcut (downsample only)
      mask_ref : (TH*(W+2), 1)        f32 0/1 mask of the 2 pad columns per row
      b1/b2/bd : (1, Cout)            f32 folded BN shifts
      out_ref  : (H*(W+2), Cout)      bf16 output slab (pad cols sliced off outside)
      mid_ref  : ((H+4)*(W+2), Cout)  bf16 VMEM scratch, padded conv1 output
    """
    Wp = W + 2                # padded width
    M = TH * Wp               # matmul rows per band (incl. 2 discarded pad cols/row)
    n_tiles = H // TH

    def kernel(*refs):
        if has_downsample:
            (x_ref, w1_ref, w2_ref, wd_ref, mask_ref, b1_ref, b2_ref, bd_ref,
             out_ref, mid_ref) = refs
        else:
            (x_ref, w1_ref, w2_ref, mask_ref, b1_ref, b2_ref,
             out_ref, mid_ref) = refs
            wd_ref = bd_ref = None

        # Zero the top/bottom halo rows of the intermediate scratch; the pad
        # columns inside each written band are zeroed via pad_mask, so conv2
        # sees a correctly zero-padded conv1 output. Redone every grid step so
        # it stays correct under "parallel" batch sharding.
        zero_halo = jnp.zeros((2 * Wp, Cout), mid_ref.dtype)
        mid_ref[0:2 * Wp, :] = zero_halo
        mid_ref[(H + 2) * Wp:(H + 4) * Wp, :] = zero_halo

        # Hoisted loop invariants (review: don't rematerialize per iteration).
        pad_mask = mask_ref[...]          # (M, 1) f32
        b1 = b1_ref[...]                  # (1, Cout) f32
        b2 = b2_ref[...]
        bd = bd_ref[...] if has_downsample else None

        def conv3x3_band(src_ref, w_ref, c0):
            # 3x3 conv over one TH-row band: 9 accumulating MXU matmuls on
            # sublane-offset views of the flattened padded slab. Rows that
            # land on pad columns produce garbage and are masked / discarded.
            acc = jnp.zeros((M, Cout), jnp.float32)
            for ky in range(3):
                for kx in range(3):
                    start = c0 + (ky - 1) * Wp + (kx - 1)
                    acc = acc + jnp.dot(src_ref[pl.ds(start, M), :],
                                        w_ref[ky * 3 + kx],
                                        preferred_element_type=jnp.float32)
            return acc

        def conv1_band(t, carry):
            c0 = (t * TH + 2) * Wp        # flat row of this band's first center
            h = jnp.maximum(conv3x3_band(x_ref, w1_ref, c0) + b1, 0.0)
            mid_ref[pl.ds(c0, M), :] = (h * pad_mask).astype(mid_ref.dtype)
            return carry

        def conv2_band(t, carry):
            c0 = (t * TH + 2) * Wp
            acc = conv3x3_band(mid_ref, w2_ref, c0) + b2
            xin = x_ref[pl.ds(c0, M), :]  # bf16 (M, Cin) shortcut input
            if has_downsample:
                res = jnp.dot(xin, wd_ref[...],
                              preferred_element_type=jnp.float32) + bd
            else:
                res = xin.astype(jnp.float32)        # identity shortcut
            out = jnp.maximum(acc + res, 0.0)
            o_start = t * M
            if not isinstance(t, int) and M % 8 == 0:
                o_start = pl.multiple_of(o_start, 8)
            out_ref[pl.ds(o_start, M), :] = out.astype(out_ref.dtype)
            return carry

        if n_tiles == 1:
            # Whole image in one band: fully static offsets.
            conv1_band(0, 0)
            conv2_band(0, 0)
        else:
            # Partial unroll keeps LLO scheduling visibility without the code
            # bloat / vreg pressure of a full unroll.
            jax.lax.fori_loop(0, n_tiles, conv1_band, 0, unroll=2)
            jax.lax.fori_loop(0, n_tiles, conv2_band, 0, unroll=2)

    return kernel


def residual_block_forward(x_nchw, w1, w2, wd, bn1, bn2, bnd, eps=1e-5):
    """x_nchw: (N, Cin, H, W) f32. w1: (3,3,Cin,Cout), w2: (3,3,Cout,Cout) (HWIO).
    wd: (Cin, Cout) 1x1 shortcut conv weights, or None for the identity shortcut
    (PyTorch's empty nn.Sequential(); requires Cin == Cout).
    Inference-mode BatchNorm (running stats folded into the conv weights).
    Returns (N, Cout, H, W) f32 (values bf16-rounded)."""
    N, Cin, H, W = x_nchw.shape
    Cout = w1.shape[-1]
    has_downsample = wd is not None
    if not has_downsample:
        assert Cin == Cout, "identity shortcut requires in_channels == out_channels"

    # Fold BN scales into the conv weights; the kernel only adds the shift.
    s1, b1 = fold_bn(*bn1, eps)
    s2, b2 = fold_bn(*bn2, eps)
    w1f = (w1 * s1).reshape(9, Cin, Cout).astype(jnp.bfloat16)
    w2f = (w2 * s2).reshape(9, Cout, Cout).astype(jnp.bfloat16)
    to2d = lambda v: v.reshape(1, Cout).astype(jnp.float32)

    Wp = W + 2
    TH = _pick_row_tile(H, Wp)
    M = TH * Wp

    # NCHW -> NHWC bf16, zero-pad H by 2 / W by 1 per side (the extra H rows
    # keep every sublane-offset tap view of every band in bounds), flatten the
    # spatial dims into one sublane axis (layout-preserving reshape).
    x = jnp.transpose(x_nchw, (0, 2, 3, 1)).astype(jnp.bfloat16)
    xflat = jnp.pad(x, ((0, 0), (2, 2), (1, 1), (0, 0))).reshape(
        N, (H + 4) * Wp, Cin)

    # Precomputed 0/1 mask that zeroes the 2 pad columns of each band row.
    col = jnp.arange(M, dtype=jnp.int32) % Wp
    pad_mask = ((col >= 1) & (col <= W)).astype(jnp.float32).reshape(M, 1)

    kernel = _make_kernel(H, W, Cin, Cout, TH, has_downsample)

    x_spec = pl.BlockSpec((None, (H + 4) * Wp, Cin), lambda n: (n, 0, 0))
    w1_spec = pl.BlockSpec((9, Cin, Cout), lambda n: (0, 0, 0))
    w2_spec = pl.BlockSpec((9, Cout, Cout), lambda n: (0, 0, 0))
    m_spec = pl.BlockSpec((M, 1), lambda n: (0, 0))
    b_spec = pl.BlockSpec((1, Cout), lambda n: (0, 0))

    if has_downsample:
        sd, bd_shift = fold_bn(*bnd, eps)
        wdf = (wd * sd).astype(jnp.bfloat16)
        inputs = [xflat, w1f, w2f, wdf, pad_mask,
                  to2d(b1), to2d(b2), to2d(bd_shift)]
        in_specs = [x_spec, w1_spec, w2_spec,
                    pl.BlockSpec((Cin, Cout), lambda n: (0, 0)),
                    m_spec, b_spec, b_spec, b_spec]
    else:
        inputs = [xflat, w1f, w2f, pad_mask, to2d(b1), to2d(b2)]
        in_specs = [x_spec, w1_spec, w2_spec, m_spec, b_spec, b_spec]

    out_flat = pl.pallas_call(
        kernel,
        out_shape=jax.ShapeDtypeStruct((N, H * Wp, Cout), jnp.bfloat16),
        grid_spec=pltpu.PrefetchScalarGridSpec(
            num_scalar_prefetch=0,
            grid=(N,),
            in_specs=in_specs,
            out_specs=pl.BlockSpec((None, H * Wp, Cout), lambda n: (n, 0, 0)),
            scratch_shapes=[pltpu.VMEM(((H + 4) * Wp, Cout), jnp.bfloat16)]),
        compiler_params=pltpu.CompilerParams(
            dimension_semantics=("parallel",),        # shard batch over TCs
            vmem_limit_bytes=_vmem_limit_bytes()),
    )(*inputs)

    # Drop the 2 pad columns per row, NHWC -> NCHW, back to f32 (XLA fuses the
    # slice with the transpose).
    out = out_flat.reshape(N, H, Wp, Cout)[:, :, 1:1 + W, :]
    return jnp.transpose(out, (0, 3, 1, 2)).astype(jnp.float32)


def reference_forward(x_nchw, w1, w2, wd, bn1, bn2, bnd, eps=1e-5):
    """Plain-JAX reference mirroring the kernel's precision (bf16 matmul inputs,
    f32 accumulation, bf16 intermediate) for the correctness check."""
    s1, b1 = fold_bn(*bn1, eps)
    s2, b2 = fold_bn(*bn2, eps)
    x = jnp.transpose(x_nchw, (0, 2, 3, 1)).astype(jnp.bfloat16)

    def conv3(v, w):
        return jax.lax.conv_general_dilated(
            v, w.astype(jnp.bfloat16), window_strides=(1, 1),
            padding=((1, 1), (1, 1)),
            dimension_numbers=('NHWC', 'HWIO', 'NHWC'),
            preferred_element_type=jnp.float32)

    h = jnp.maximum(conv3(x, w1 * s1) + b1, 0.0).astype(jnp.bfloat16)
    h2 = conv3(h, w2 * s2) + b2
    if wd is None:
        res = x.astype(jnp.float32)
    else:
        sd, bd = fold_bn(*bnd, eps)
        res = jax.lax.conv_general_dilated(
            x, (wd * sd)[None, None, :, :].astype(jnp.bfloat16),
            window_strides=(1, 1), padding='VALID',
            dimension_numbers=('NHWC', 'HWIO', 'NHWC'),
            preferred_element_type=jnp.float32) + bd
    out = jnp.maximum(h2 + res, 0.0)
    return jnp.transpose(out, (0, 3, 1, 2))


if __name__ == "__main__":
    key = jax.random.PRNGKey(0)

    def make_bn(k, c):
        kg, kb, km, kv = jax.random.split(k, 4)
        gamma = jax.random.uniform(kg, (c,), jnp.float32, 0.5, 1.5)
        beta = jax.random.normal(kb, (c,), jnp.float32) * 0.1
        mean = jax.random.normal(km, (c,), jnp.float32) * 0.1
        var = jax.random.uniform(kv, (c,), jnp.float32, 0.5, 1.5)
        return gamma, beta, mean, var

    def to_bf16_f32(a):
        return a.astype(jnp.bfloat16).astype(jnp.float32)

    # --- case 1: in_channels != out_channels -> 1x1-conv + BN shortcut -------
    N, Cin, Cout, H, W = 2, 4, 8, 16, 16
    k1, k2, k3, kx, kb1, kb2, kb3, key = jax.random.split(key, 8)
    w1 = jax.random.normal(k1, (3, 3, Cin, Cout), jnp.float32) * 0.1
    w2 = jax.random.normal(k2, (3, 3, Cout, Cout), jnp.float32) * 0.1
    wd = jax.random.normal(k3, (Cin, Cout), jnp.float32) * 0.1
    x = jax.random.normal(kx, (N, Cin, H, W), jnp.float32)
    bn1, bn2, bnd = make_bn(kb1, Cout), make_bn(kb2, Cout), make_bn(kb3, Cout)

    out = jax.block_until_ready(
        residual_block_forward(x, w1, w2, wd, bn1, bn2, bnd))
    ref = to_bf16_f32(reference_forward(x, w1, w2, wd, bn1, bn2, bnd))
    assert out.shape == (N, Cout, H, W)
    assert jnp.allclose(out, ref, rtol=1e-2, atol=1e-2), "downsample case mismatch"

    # --- case 2: in_channels == out_channels -> identity shortcut ------------
    C = 8
    k1, k2, kx, kb1, kb2, key = jax.random.split(key, 6)
    w1i = jax.random.normal(k1, (3, 3, C, C), jnp.float32) * 0.1
    w2i = jax.random.normal(k2, (3, 3, C, C), jnp.float32) * 0.1
    xi = jax.random.normal(kx, (N, C, H, W), jnp.float32)
    bn1i, bn2i = make_bn(kb1, C), make_bn(kb2, C)

    outi = jax.block_until_ready(
        residual_block_forward(xi, w1i, w2i, None, bn1i, bn2i, None))
    refi = to_bf16_f32(reference_forward(xi, w1i, w2i, None, bn1i, bn2i, None))
    assert outi.shape == (N, C, H, W)
    assert jnp.allclose(outi, refi, rtol=1e-2, atol=1e-2), "identity case mismatch"

    print("KERNEL_OK")
</pallas_src>

<mosaic_0001>
module attributes {stable_mosaic.version = 11 : i64} {
  func.func @kernel(%arg0: i32, %arg1: memref<1x360x4xbf16, #tpu.memory_space<vmem>>, %arg2: memref<9x4x8xbf16, #tpu.memory_space<vmem>>, %arg3: memref<9x8x8xbf16, #tpu.memory_space<vmem>>, %arg4: memref<4x8xbf16, #tpu.memory_space<vmem>>, %arg5: memref<288x1xf32, #tpu.memory_space<vmem>>, %arg6: memref<1x8xf32, #tpu.memory_space<vmem>>, %arg7: memref<1x8xf32, #tpu.memory_space<vmem>>, %arg8: memref<1x8xf32, #tpu.memory_space<vmem>>, %arg9: memref<1x288x8xbf16, #tpu.memory_space<vmem>>, %arg10: memref<360x8xbf16, #tpu.memory_space<vmem>>) attributes {dimension_semantics = [#tpu.dimension_semantics<parallel>], iteration_bounds = array<i64: 2>, scalar_prefetch = 0 : i64, scratch_operands = 1 : i64, tpu.core_type = #tpu.core_type<tc>, window_params = [{transform_indices = @transform_0, window_bounds = array<i64: 1, 360, 4>}, {pipeline_mode = #tpu.pipeline_mode<synchronous>, transform_indices = @transform_1, window_bounds = array<i64: 9, 4, 8>}, {pipeline_mode = #tpu.pipeline_mode<synchronous>, transform_indices = @transform_2, window_bounds = array<i64: 9, 8, 8>}, {pipeline_mode = #tpu.pipeline_mode<synchronous>, transform_indices = @transform_3, window_bounds = array<i64: 4, 8>}, {pipeline_mode = #tpu.pipeline_mode<synchronous>, transform_indices = @transform_4, window_bounds = array<i64: 288, 1>}, {pipeline_mode = #tpu.pipeline_mode<synchronous>, transform_indices = @transform_5, window_bounds = array<i64: 1, 8>}, {pipeline_mode = #tpu.pipeline_mode<synchronous>, transform_indices = @transform_6, window_bounds = array<i64: 1, 8>}, {pipeline_mode = #tpu.pipeline_mode<synchronous>, transform_indices = @transform_7, window_bounds = array<i64: 1, 8>}, {transform_indices = @transform_8, window_bounds = array<i64: 1, 288, 8>}]} {
    %cst = arith.constant 0.000000e+00 : bf16
    %0 = vector.broadcast %cst : bf16 to vector<36x8xbf16>
    %c0 = arith.constant 0 : index
    %c0_0 = arith.constant 0 : index
    %1 = vector.load %arg10[%c0, %c0_0] : memref<360x8xbf16, #tpu.memory_space<vmem>>, vector<36x8xbf16>
    tpu.vector_store %arg10[%c0, %c0_0], %0 {strides = array<i32>} : memref<360x8xbf16, #tpu.memory_space<vmem>>, vector<36x8xbf16>,
    %c324 = arith.constant 324 : index
    %c0_1 = arith.constant 0 : index
    %2 = vector.load %arg10[%c324, %c0_1] : memref<360x8xbf16, #tpu.memory_space<vmem>>, vector<36x8xbf16>
    tpu.vector_store %arg10[%c324, %c0_1], %0 {strides = array<i32>} : memref<360x8xbf16, #tpu.memory_space<vmem>>, vector<36x8xbf16>,
    %c0_2 = arith.constant 0 : index
    %c0_3 = arith.constant 0 : index
    %3 = vector.load %arg5[%c0_2, %c0_3] : memref<288x1xf32, #tpu.memory_space<vmem>>, vector<288x1xf32>
    %c0_4 = arith.constant 0 : index
    %c0_5 = arith.constant 0 : index
    %4 = vector.load %arg6[%c0_4, %c0_5] : memref<1x8xf32, #tpu.memory_space<vmem>>, vector<1x8xf32>
    %c0_6 = arith.constant 0 : index
    %c0_7 = arith.constant 0 : index
    %5 = vector.load %arg7[%c0_6, %c0_7] : memref<1x8xf32, #tpu.memory_space<vmem>>, vector<1x8xf32>
    %c0_8 = arith.constant 0 : index
    %c0_9 = arith.constant 0 : index
    %6 = vector.load %arg8[%c0_8, %c0_9] : memref<1x8xf32, #tpu.memory_space<vmem>>, vector<1x8xf32>
    %cst_10 = arith.constant 0.000000e+00 : f32
    %7 = vector.broadcast %cst_10 : f32 to vector<288x8xf32>
    %c0_11 = arith.constant 0 : index
    %c17 = arith.constant 17 : index
    %c0_12 = arith.constant 0 : index
    %8 = vector.load %arg1[%c0_11, %c17, %c0_12] : memref<1x360x4xbf16, #tpu.memory_space<vmem>>, vector<1x288x4xbf16>
    %9 = vector.shape_cast %8 : vector<1x288x4xbf16> to vector<288x4xbf16>
    %c0_13 = arith.constant 0 : index
    %c0_14 = arith.constant 0 : index
    %c0_15 = arith.constant 0 : index
    %10 = vector.load %arg2[%c0_13, %c0_14, %c0_15] : memref<9x4x8xbf16, #tpu.memory_space<vmem>>, vector<1x4x8xbf16>
    %11 = vector.shape_cast %10 : vector<1x4x8xbf16> to vector<4x8xbf16>
    %cst_16 = arith.constant dense<0.000000e+00> : vector<288x8xf32>
    %12 = tpu.matmul %9, %11, %cst_16 {dimension_numbers = #tpu.dot_dimension_numbers<[1], [0], [0], [1], [0, 0, 1, 1], [], []>} : vector<288x4xbf16>, vector<4x8xbf16>, vector<288x8xf32> -> vector<288x8xf32>
    %13 = arith.addf %7, %12 : vector<288x8xf32>
    %c0_17 = arith.constant 0 : index
    %c18 = arith.constant 18 : index
    %c0_18 = arith.constant 0 : index
    %14 = vector.load %arg1[%c0_17, %c18, %c0_18] : memref<1x360x4xbf16, #tpu.memory_space<vmem>>, vector<1x288x4xbf16>
    %15 = vector.shape_cast %14 : vector<1x288x4xbf16> to vector<288x4xbf16>
    %c1 = arith.constant 1 : index
    %c0_19 = arith.constant 0 : index
    %c0_20 = arith.constant 0 : index
    %16 = vector.load %arg2[%c1, %c0_19, %c0_20] : memref<9x4x8xbf16, #tpu.memory_space<vmem>>, vector<1x4x8xbf16>
    %17 = vector.shape_cast %16 : vector<1x4x8xbf16> to vector<4x8xbf16>
    %cst_21 = arith.constant dense<0.000000e+00> : vector<288x8xf32>
    %18 = tpu.matmul %15, %17, %cst_21 {dimension_numbers = #tpu.dot_dimension_numbers<[1], [0], [0], [1], [0, 0, 1, 1], [], []>} : vector<288x4xbf16>, vector<4x8xbf16>, vector<288x8xf32> -> vector<288x8xf32>
    %19 = arith.addf %13, %18 : vector<288x8xf32>
    %c0_22 = arith.constant 0 : index
    %c19 = arith.constant 19 : index
    %c0_23 = arith.constant 0 : index
    %20 = vector.load %arg1[%c0_22, %c19, %c0_23] : memref<1x360x4xbf16, #tpu.memory_space<vmem>>, vector<1x288x4xbf16>
    %21 = vector.shape_cast %20 : vector<1x288x4xbf16> to vector<288x4xbf16>
    %c2 = arith.constant 2 : index
    %c0_24 = arith.constant 0 : index
    %c0_25 = arith.constant 0 : index
    %22 = vector.load %arg2[%c2, %c0_24, %c0_25] : memref<9x4x8xbf16, #tpu.memory_space<vmem>>, vector<1x4x8xbf16>
    %23 = vector.shape_cast %22 : vector<1x4x8xbf16> to vector<4x8xbf16>
    %cst_26 = arith.constant dense<0.000000e+00> : vector<288x8xf32>
    %24 = tpu.matmul %21, %23, %cst_26 {dimension_numbers = #tpu.dot_dimension_numbers<[1], [0], [0], [1], [0, 0, 1, 1], [], []>} : vector<288x4xbf16>, vector<4x8xbf16>, vector<288x8xf32> -> vector<288x8xf32>
    %25 = arith.addf %19, %24 : vector<288x8xf32>
    %c0_27 = arith.constant 0 : index
    %c35 = arith.constant 35 : index
    %c0_28 = arith.constant 0 : index
    %26 = vector.load %arg1[%c0_27, %c35, %c0_28] : memref<1x360x4xbf16, #tpu.memory_space<vmem>>, vector<1x288x4xbf16>
    %27 = vector.shape_cast %26 : vector<1x288x4xbf16> to vector<288x4xbf16>
    %c3 = arith.constant 3 : index
    %c0_29 = arith.constant 0 : index
    %c0_30 = arith.constant 0 : index
    %28 = vector.load %arg2[%c3, %c0_29, %c0_30] : memref<9x4x8xbf16, #tpu.memory_space<vmem>>, vector<1x4x8xbf16>
    %29 = vector.shape_cast %28 : vector<1x4x8xbf16> to vector<4x8xbf16>
    %cst_31 = arith.constant dense<0.000000e+00> : vector<288x8xf32>
    %30 = tpu.matmul %27, %29, %cst_31 {dimension_numbers = #tpu.dot_dimension_numbers<[1], [0], [0], [1], [0, 0, 1, 1], [], []>} : vector<288x4xbf16>, vector<4x8xbf16>, vector<288x8xf32> -> vector<288x8xf32>
    %31 = arith.addf %25, %30 : vector<288x8xf32>
    %c0_32 = arith.constant 0 : index
    %c36 = arith.constant 36 : index
    %c0_33 = arith.constant 0 : index
    %32 = vector.load %arg1[%c0_32, %c36, %c0_33] : memref<1x360x4xbf16, #tpu.memory_space<vmem>>, vector<1x288x4xbf16>
    %33 = vector.shape_cast %32 : vector<1x288x4xbf16> to vector<288x4xbf16>
    %c4 = arith.constant 4 : index
    %c0_34 = arith.constant 0 : index
    %c0_35 = arith.constant 0 : index
    %34 = vector.load %arg2[%c4, %c0_34, %c0_35] : memref<9x4x8xbf16, #tpu.memory_space<vmem>>, vector<1x4x8xbf16>
    %35 = vector.shape_cast %34 : vector<1x4x8xbf16> to vector<4x8xbf16>
    %cst_36 = arith.constant dense<0.000000e+00> : vector<288x8xf32>
    %36 = tpu.matmul %33, %35, %cst_36 {dimension_numbers = #tpu.dot_dimension_numbers<[1], [0], [0], [1], [0, 0, 1, 1], [], []>} : vector<288x4xbf16>, vector<4x8xbf16>, vector<288x8xf32> -> vector<288x8xf32>
    %37 = arith.addf %31, %36 : vector<288x8xf32>
    %c0_37 = arith.constant 0 : index
    %c37 = arith.constant 37 : index
    %c0_38 = arith.constant 0 : index
    %38 = vector.load %arg1[%c0_37, %c37, %c0_38] : memref<1x360x4xbf16, #tpu.memory_space<vmem>>, vector<1x288x4xbf16>
    %39 = vector.shape_cast %38 : vector<1x288x4xbf16> to vector<288x4xbf16>
    %c5 = arith.constant 5 : index
    %c0_39 = arith.constant 0 : index
    %c0_40 = arith.constant 0 : index
    %40 = vector.load %arg2[%c5, %c0_39, %c0_40] : memref<9x4x8xbf16, #tpu.memory_space<vmem>>, vector<1x4x8xbf16>
    %41 = vector.shape_cast %40 : vector<1x4x8xbf16> to vector<4x8xbf16>
    %cst_41 = arith.constant dense<0.000000e+00> : vector<288x8xf32>
    %42 = tpu.matmul %39, %41, %cst_41 {dimension_numbers = #tpu.dot_dimension_numbers<[1], [0], [0], [1], [0, 0, 1, 1], [], []>} : vector<288x4xbf16>, vector<4x8xbf16>, vector<288x8xf32> -> vector<288x8xf32>
    %43 = arith.addf %37, %42 : vector<288x8xf32>
    %c0_42 = arith.constant 0 : index
    %c53 = arith.constant 53 : index
    %c0_43 = arith.constant 0 : index
    %44 = vector.load %arg1[%c0_42, %c53, %c0_43] : memref<1x360x4xbf16, #tpu.memory_space<vmem>>, vector<1x288x4xbf16>
    %45 = vector.shape_cast %44 : vector<1x288x4xbf16> to vector<288x4xbf16>
    %c6 = arith.constant 6 : index
    %c0_44 = arith.constant 0 : index
    %c0_45 = arith.constant 0 : index
    %46 = vector.load %arg2[%c6, %c0_44, %c0_45] : memref<9x4x8xbf16, #tpu.memory_space<vmem>>, vector<1x4x8xbf16>
    %47 = vector.shape_cast %46 : vector<1x4x8xbf16> to vector<4x8xbf16>
    %cst_46 = arith.constant dense<0.000000e+00> : vector<288x8xf32>
    %48 = tpu.matmul %45, %47, %cst_46 {dimension_numbers = #tpu.dot_dimension_numbers<[1], [0], [0], [1], [0, 0, 1, 1], [], []>} : vector<288x4xbf16>, vector<4x8xbf16>, vector<288x8xf32> -> vector<288x8xf32>
    %49 = arith.addf %43, %48 : vector<288x8xf32>
    %c0_47 = arith.constant 0 : index
    %c54 = arith.constant 54 : index
    %c0_48 = arith.constant 0 : index
    %50 = vector.load %arg1[%c0_47, %c54, %c0_48] : memref<1x360x4xbf16, #tpu.memory_space<vmem>>, vector<1x288x4xbf16>
    %51 = vector.shape_cast %50 : vector<1x288x4xbf16> to vector<288x4xbf16>
    %c7 = arith.constant 7 : index
    %c0_49 = arith.constant 0 : index
    %c0_50 = arith.constant 0 : index
    %52 = vector.load %arg2[%c7, %c0_49, %c0_50] : memref<9x4x8xbf16, #tpu.memory_space<vmem>>, vector<1x4x8xbf16>
    %53 = vector.shape_cast %52 : vector<1x4x8xbf16> to vector<4x8xbf16>
    %cst_51 = arith.constant dense<0.000000e+00> : vector<288x8xf32>
    %54 = tpu.matmul %51, %53, %cst_51 {dimension_numbers = #tpu.dot_dimension_numbers<[1], [0], [0], [1], [0, 0, 1, 1], [], []>} : vector<288x4xbf16>, vector<4x8xbf16>, vector<288x8xf32> -> vector<288x8xf32>
    %55 = arith.addf %49, %54 : vector<288x8xf32>
    %c0_52 = arith.constant 0 : index
    %c55 = arith.constant 55 : index
    %c0_53 = arith.constant 0 : index
    %56 = vector.load %arg1[%c0_52, %c55, %c0_53] : memref<1x360x4xbf16, #tpu.memory_space<vmem>>, vector<1x288x4xbf16>
    %57 = vector.shape_cast %56 : vector<1x288x4xbf16> to vector<288x4xbf16>
    %c8 = arith.constant 8 : index
    %c0_54 = arith.constant 0 : index
    %c0_55 = arith.constant 0 : index
    %58 = vector.load %arg2[%c8, %c0_54, %c0_55] : memref<9x4x8xbf16, #tpu.memory_space<vmem>>, vector<1x4x8xbf16>
    %59 = vector.shape_cast %58 : vector<1x4x8xbf16> to vector<4x8xbf16>
    %cst_56 = arith.constant dense<0.000000e+00> : vector<288x8xf32>
    %60 = tpu.matmul %57, %59, %cst_56 {dimension_numbers = #tpu.dot_dimension_numbers<[1], [0], [0], [1], [0, 0, 1, 1], [], []>} : vector<288x4xbf16>, vector<4x8xbf16>, vector<288x8xf32> -> vector<288x8xf32>
    %61 = arith.addf %55, %60 : vector<288x8xf32>
    %62 = vector.broadcast %4 : vector<1x8xf32> to vector<288x8xf32>
    %63 = arith.addf %61, %62 : vector<288x8xf32>
    %cst_57 = arith.constant 0.000000e+00 : f32
    %64 = vector.broadcast %cst_57 : f32 to vector<288x8xf32>
    %65 = arith.maximumf %63, %64 : vector<288x8xf32>
    %66 = vector.broadcast %3 : vector<288x1xf32> to vector<288x8xf32>
    %67 = arith.mulf %65, %66 : vector<288x8xf32>
    %68 = arith.truncf %67 : vector<288x8xf32> to vector<288x8xbf16>
    %c36_58 = arith.constant 36 : index
    %c0_59 = arith.constant 0 : index
    %69 = vector.load %arg10[%c36_58, %c0_59] : memref<360x8xbf16, #tpu.memory_space<vmem>>, vector<288x8xbf16>
    tpu.vector_store %arg10[%c36_58, %c0_59], %68 {strides = array<i32>} : memref<360x8xbf16, #tpu.memory_space<vmem>>, vector<288x8xbf16>,
    %cst_60 = arith.constant 0.000000e+00 : f32
    %70 = vector.broadcast %cst_60 : f32 to vector<288x8xf32>
    %c17_61 = arith.constant 17 : index
    %c0_62 = arith.constant 0 : index
    %71 = vector.load %arg10[%c17_61, %c0_62] : memref<360x8xbf16, #tpu.memory_space<vmem>>, vector<288x8xbf16>
    %c0_63 = arith.constant 0 : index
    %c0_64 = arith.constant 0 : index
    %c0_65 = arith.constant 0 : index
    %72 = vector.load %arg3[%c0_63, %c0_64, %c0_65] : memref<9x8x8xbf16, #tpu.memory_space<vmem>>, vector<1x8x8xbf16>
    %73 = vector.shape_cast %72 : vector<1x8x8xbf16> to vector<8x8xbf16>
    %cst_66 = arith.constant dense<0.000000e+00> : vector<288x8xf32>
    %74 = tpu.matmul %71, %73, %cst_66 {dimension_numbers = #tpu.dot_dimension_numbers<[1], [0], [0], [1], [0, 0, 1, 1], [], []>} : vector<288x8xbf16>, vector<8x8xbf16>, vector<288x8xf32> -> vector<288x8xf32>
    %75 = arith.addf %70, %74 : vector<288x8xf32>
    %c18_67 = arith.constant 18 : index
    %c0_68 = arith.constant 0 : index
    %76 = vector.load %arg10[%c18_67, %c0_68] : memref<360x8xbf16, #tpu.memory_space<vmem>>, vector<288x8xbf16>
    %c1_69 = arith.constant 1 : index
    %c0_70 = arith.constant 0 : index
    %c0_71 = arith.constant 0 : index
    %77 = vector.load %arg3[%c1_69, %c0_70, %c0_71] : memref<9x8x8xbf16, #tpu.memory_space<vmem>>, vector<1x8x8xbf16>
    %78 = vector.shape_cast %77 : vector<1x8x8xbf16> to vector<8x8xbf16>
    %cst_72 = arith.constant dense<0.000000e+00> : vector<288x8xf32>
    %79 = tpu.matmul %76, %78, %cst_72 {dimension_numbers = #tpu.dot_dimension_numbers<[1], [0], [0], [1], [0, 0, 1, 1], [], []>} : vector<288x8xbf16>, vector<8x8xbf16>, vector<288x8xf32> -> vector<288x8xf32>
    %80 = arith.addf %75, %79 : vector<288x8xf32>
    %c19_73 = arith.constant 19 : index
    %c0_74 = arith.constant 0 : index
    %81 = vector.load %arg10[%c19_73, %c0_74] : memref<360x8xbf16, #tpu.memory_space<vmem>>, vector<288x8xbf16>
    %c2_75 = arith.constant 2 : index
    %c0_76 = arith.constant 0 : index
    %c0_77 = arith.constant 0 : index
    %82 = vector.load %arg3[%c2_75, %c0_76, %c0_77] : memref<9x8x8xbf16, #tpu.memory_space<vmem>>, vector<1x8x8xbf16>
    %83 = vector.shape_cast %82 : vector<1x8x8xbf16> to vector<8x8xbf16>
    %cst_78 = arith.constant dense<0.000000e+00> : vector<288x8xf32>
    %84 = tpu.matmul %81, %83, %cst_78 {dimension_numbers = #tpu.dot_dimension_numbers<[1], [0], [0], [1], [0, 0, 1, 1], [], []>} : vector<288x8xbf16>, vector<8x8xbf16>, vector<288x8xf32> -> vector<288x8xf32>
    %85 = arith.addf %80, %84 : vector<288x8xf32>
    %c35_79 = arith.constant 35 : index
    %c0_80 = arith.constant 0 : index
    %86 = vector.load %arg10[%c35_79, %c0_80] : memref<360x8xbf16, #tpu.memory_space<vmem>>, vector<288x8xbf16>
    %c3_81 = arith.constant 3 : index
    %c0_82 = arith.constant 0 : index
    %c0_83 = arith.constant 0 : index
    %87 = vector.load %arg3[%c3_81, %c0_82, %c0_83] : memref<9x8x8xbf16, #tpu.memory_space<vmem>>, vector<1x8x8xbf16>
    %88 = vector.shape_cast %87 : vector<1x8x8xbf16> to vector<8x8xbf16>
    %cst_84 = arith.constant dense<0.000000e+00> : vector<288x8xf32>
    %89 = tpu.matmul %86, %88, %cst_84 {dimension_numbers = #tpu.dot_dimension_numbers<[1], [0], [0], [1], [0, 0, 1, 1], [], []>} : vector<288x8xbf16>, vector<8x8xbf16>, vector<288x8xf32> -> vector<288x8xf32>
    %90 = arith.addf %85, %89 : vector<288x8xf32>
    %c36_85 = arith.constant 36 : index
    %c0_86 = arith.constant 0 : index
    %91 = vector.load %arg10[%c36_85, %c0_86] : memref<360x8xbf16, #tpu.memory_space<vmem>>, vector<288x8xbf16>
    %c4_87 = arith.constant 4 : index
    %c0_88 = arith.constant 0 : index
    %c0_89 = arith.constant 0 : index
    %92 = vector.load %arg3[%c4_87, %c0_88, %c0_89] : memref<9x8x8xbf16, #tpu.memory_space<vmem>>, vector<1x8x8xbf16>
    %93 = vector.shape_cast %92 : vector<1x8x8xbf16> to vector<8x8xbf16>
    %cst_90 = arith.constant dense<0.000000e+00> : vector<288x8xf32>
    %94 = tpu.matmul %91, %93, %cst_90 {dimension_numbers = #tpu.dot_dimension_numbers<[1], [0], [0], [1], [0, 0, 1, 1], [], []>} : vector<288x8xbf16>, vector<8x8xbf16>, vector<288x8xf32> -> vector<288x8xf32>
    %95 = arith.addf %90, %94 : vector<288x8xf32>
    %c37_91 = arith.constant 37 : index
    %c0_92 = arith.constant 0 : index
    %96 = vector.load %arg10[%c37_91, %c0_92] : memref<360x8xbf16, #tpu.memory_space<vmem>>, vector<288x8xbf16>
    %c5_93 = arith.constant 5 : index
    %c0_94 = arith.constant 0 : index
    %c0_95 = arith.constant 0 : index
    %97 = vector.load %arg3[%c5_93, %c0_94, %c0_95] : memref<9x8x8xbf16, #tpu.memory_space<vmem>>, vector<1x8x8xbf16>
    %98 = vector.shape_cast %97 : vector<1x8x8xbf16> to vector<8x8xbf16>
    %cst_96 = arith.constant dense<0.000000e+00> : vector<288x8xf32>
    %99 = tpu.matmul %96, %98, %cst_96 {dimension_numbers = #tpu.dot_dimension_numbers<[1], [0], [0], [1], [0, 0, 1, 1], [], []>} : vector<288x8xbf16>, vector<8x8xbf16>, vector<288x8xf32> -> vector<288x8xf32>
    %100 = arith.addf %95, %99 : vector<288x8xf32>
    %c53_97 = arith.constant 53 : index
    %c0_98 = arith.constant 0 : index
    %101 = vector.load %arg10[%c53_97, %c0_98] : memref<360x8xbf16, #tpu.memory_space<vmem>>, vector<288x8xbf16>
    %c6_99 = arith.constant 6 : index
    %c0_100 = arith.constant 0 : index
    %c0_101 = arith.constant 0 : index
    %102 = vector.load %arg3[%c6_99, %c0_100, %c0_101] : memref<9x8x8xbf16, #tpu.memory_space<vmem>>, vector<1x8x8xbf16>
    %103 = vector.shape_cast %102 : vector<1x8x8xbf16> to vector<8x8xbf16>
    %cst_102 = arith.constant dense<0.000000e+00> : vector<288x8xf32>
    %104 = tpu.matmul %101, %103, %cst_102 {dimension_numbers = #tpu.dot_dimension_numbers<[1], [0], [0], [1], [0, 0, 1, 1], [], []>} : vector<288x8xbf16>, vector<8x8xbf16>, vector<288x8xf32> -> vector<288x8xf32>
    %105 = arith.addf %100, %104 : vector<288x8xf32>
    %c54_103 = arith.constant 54 : index
    %c0_104 = arith.constant 0 : index
    %106 = vector.load %arg10[%c54_103, %c0_104] : memref<360x8xbf16, #tpu.memory_space<vmem>>, vector<288x8xbf16>
    %c7_105 = arith.constant 7 : index
    %c0_106 = arith.constant 0 : index
    %c0_107 = arith.constant 0 : index
    %107 = vector.load %arg3[%c7_105, %c0_106, %c0_107] : memref<9x8x8xbf16, #tpu.memory_space<vmem>>, vector<1x8x8xbf16>
    %108 = vector.shape_cast %107 : vector<1x8x8xbf16> to vector<8x8xbf16>
    %cst_108 = arith.constant dense<0.000000e+00> : vector<288x8xf32>
    %109 = tpu.matmul %106, %108, %cst_108 {dimension_numbers = #tpu.dot_dimension_numbers<[1], [0], [0], [1], [0, 0, 1, 1], [], []>} : vector<288x8xbf16>, vector<8x8xbf16>, vector<288x8xf32> -> vector<288x8xf32>
    %110 = arith.addf %105, %109 : vector<288x8xf32>
    %c55_109 = arith.constant 55 : index
    %c0_110 = arith.constant 0 : index
    %111 = vector.load %arg10[%c55_109, %c0_110] : memref<360x8xbf16, #tpu.memory_space<vmem>>, vector<288x8xbf16>
    %c8_111 = arith.constant 8 : index
    %c0_112 = arith.constant 0 : index
    %c0_113 = arith.constant 0 : index
    %112 = vector.load %arg3[%c8_111, %c0_112, %c0_113] : memref<9x8x8xbf16, #tpu.memory_space<vmem>>, vector<1x8x8xbf16>
    %113 = vector.shape_cast %112 : vector<1x8x8xbf16> to vector<8x8xbf16>
    %cst_114 = arith.constant dense<0.000000e+00> : vector<288x8xf32>
    %114 = tpu.matmul %111, %113, %cst_114 {dimension_numbers = #tpu.dot_dimension_numbers<[1], [0], [0], [1], [0, 0, 1, 1], [], []>} : vector<288x8xbf16>, vector<8x8xbf16>, vector<288x8xf32> -> vector<288x8xf32>
    %115 = arith.addf %110, %114 : vector<288x8xf32>
    %116 = vector.broadcast %5 : vector<1x8xf32> to vector<288x8xf32>
    %117 = arith.addf %115, %116 : vector<288x8xf32>
    %c0_115 = arith.constant 0 : index
    %c36_116 = arith.constant 36 : index
    %c0_117 = arith.constant 0 : index
    %118 = vector.load %arg1[%c0_115, %c36_116, %c0_117] : memref<1x360x4xbf16, #tpu.memory_space<vmem>>, vector<1x288x4xbf16>
    %119 = vector.shape_cast %118 : vector<1x288x4xbf16> to vector<288x4xbf16>
    %c0_118 = arith.constant 0 : index
    %c0_119 = arith.constant 0 : index
    %120 = vector.load %arg4[%c0_118, %c0_119] : memref<4x8xbf16, #tpu.memory_space<vmem>>, vector<4x8xbf16>
    %cst_120 = arith.constant dense<0.000000e+00> : vector<288x8xf32>
    %121 = tpu.matmul %119, %120, %cst_120 {dimension_numbers = #tpu.dot_dimension_numbers<[1], [0], [0], [1], [0, 0, 1, 1], [], []>} : vector<288x4xbf16>, vector<4x8xbf16>, vector<288x8xf32> -> vector<288x8xf32>
    %122 = vector.broadcast %6 : vector<1x8xf32> to vector<288x8xf32>
    %123 = arith.addf %121, %122 : vector<288x8xf32>
    %124 = arith.addf %117, %123 : vector<288x8xf32>
    %cst_121 = arith.constant 0.000000e+00 : f32
    %125 = vector.broadcast %cst_121 : f32 to vector<288x8xf32>
    %126 = arith.maximumf %124, %125 : vector<288x8xf32>
    %127 = arith.truncf %126 : vector<288x8xf32> to vector<288x8xbf16>
    %c0_122 = arith.constant 0 : index
    %c0_123 = arith.constant 0 : index
    %c0_124 = arith.constant 0 : index
    %128 = vector.load %arg9[%c0_122, %c0_123, %c0_124] : memref<1x288x8xbf16, #tpu.memory_space<vmem>>, vector<1x288x8xbf16>
    %129 = vector.shape_cast %128 : vector<1x288x8xbf16> to vector<288x8xbf16>
    %130 = vector.shape_cast %127 : vector<288x8xbf16> to vector<1x288x8xbf16>
    tpu.vector_store %arg9[%c0_122, %c0_123, %c0_124], %130 {strides = array<i32>} : memref<1x288x8xbf16, #tpu.memory_space<vmem>>, vector<1x288x8xbf16>,
    return
  }
  func.func @transform_0(%arg0: i32) -> (i32, i32, i32) {
    %c0_i32 = arith.constant 0 : i32
    %c0_i32_0 = arith.constant 0 : i32
    %c0_i32_1 = arith.constant 0 : i32
    return %arg0, %c0_i32, %c0_i32_0 : i32, i32, i32
  }
  func.func @transform_1(%arg0: i32) -> (i32, i32, i32) {
    %c0_i32 = arith.constant 0 : i32
    %c0_i32_0 = arith.constant 0 : i32
    %c0_i32_1 = arith.constant 0 : i32
    %c0_i32_2 = arith.constant 0 : i32
    return %c0_i32, %c0_i32_0, %c0_i32_1 : i32, i32, i32
  }
  func.func @transform_2(%arg0: i32) -> (i32, i32, i32) {
    %c0_i32 = arith.constant 0 : i32
    %c0_i32_0 = arith.constant 0 : i32
    %c0_i32_1 = arith.constant 0 : i32
    %c0_i32_2 = arith.constant 0 : i32
    return %c0_i32, %c0_i32_0, %c0_i32_1 : i32, i32, i32
  }
  func.func @transform_3(%arg0: i32) -> (i32, i32) {
    %c0_i32 = arith.constant 0 : i32
    %c0_i32_0 = arith.constant 0 : i32
    %c0_i32_1 = arith.constant 0 : i32
    return %c0_i32, %c0_i32_0 : i32, i32
  }
  func.func @transform_4(%arg0: i32) -> (i32, i32) {
    %c0_i32 = arith.constant 0 : i32
    %c0_i32_0 = arith.constant 0 : i32
    %c0_i32_1 = arith.constant 0 : i32
    return %c0_i32, %c0_i32_0 : i32, i32
  }
  func.func @transform_5(%arg0: i32) -> (i32, i32) {
    %c0_i32 = arith.constant 0 : i32
    %c0_i32_0 = arith.constant 0 : i32
    %c0_i32_1 = arith.constant 0 : i32
    return %c0_i32, %c0_i32_0 : i32, i32
  }
  func.func @transform_6(%arg0: i32) -> (i32, i32) {
    %c0_i32 = arith.constant 0 : i32
    %c0_i32_0 = arith.constant 0 : i32
    %c0_i32_1 = arith.constant 0 : i32
    return %c0_i32, %c0_i32_0 : i32, i32
  }
  func.func @transform_7(%arg0: i32) -> (i32, i32) {
    %c0_i32 = arith.constant 0 : i32
    %c0_i32_0 = arith.constant 0 : i32
    %c0_i32_1 = arith.constant 0 : i32
    return %c0_i32, %c0_i32_0 : i32, i32
  }
  func.func @transform_8(%arg0: i32) -> (i32, i32, i32) {
    %c0_i32 = arith.constant 0 : i32
    %c0_i32_0 = arith.constant 0 : i32
    %c0_i32_1 = arith.constant 0 : i32
    return %arg0, %c0_i32, %c0_i32_0 : i32, i32, i32
  }
}

</mosaic_0001>

<bundles_post_ra>
// kernel: tpu_custom_call.1
= control target key start
LH: loop header
LB: loop body
LE: loop exit
PB: predicated region body
PF: predicated region fallthrough
CT: control target
= control target key end

     0   :  { %s11658_s27 = smov 0   ;;  %s15032_s0 = inlined_call_operand.vmem [shape: bf16[2,360,4], index: 0, kind: input, shape index: {}]   ;;  %s15033_s1 = inlined_call_operand.vmem [shape: bf16[9,4,8], index: 1, kind: input, shape index: {}]   ;;  %s15034_s2 = inlined_call_operand.vmem [shape: bf16[9,8,8], index: 2, kind: input, shape index: {}]   ;;  %s15035_s3 = inlined_call_operand.vmem [shape: bf16[4,8], index: 3, kind: input, shape index: {}]   ;;  %s15036_s4 = inlined_call_operand.vmem [shape: f32[288,1], index: 4, kind: input, shape index: {}]   ;;  %s15037_s5 = inlined_call_operand.vmem [shape: f32[1,8], index: 5, kind: input, shape index: {}]   ;;  %s15038_s6 = inlined_call_operand.vmem [shape: f32[1,8], index: 6, kind: input, shape index: {}]   ;;  %s15039_s7 = inlined_call_operand.vmem [shape: f32[1,8], index: 7, kind: input, shape index: {}]   ;;  %s15040_s8 = inlined_call_operand.vmem [shape: bf16[2,288,8], index: 8, kind: output, shape index: {}]  }
   0x1 LB: > { %s8999_s28 = sadd.s32 4294967295, %s11610_s27   ;;  %p9003_p0 = scmp.ge.s32.totalorder %s11610_s27, 1  ;;  %s11610_s27 = sphi %s11658_s27, %s18_s27  }
   0x2   : > { %p262_p1 = scmp.lt.s32.totalorder %s11610_s27, 3 }
   0x4   : > { %p263_p2 = pnand %p9003_p0, %p262_p1 }
   0x6   : > { %266 = sbr.rel (%p263_p2) target bundleno = 1783 (0x6f7), region = 52 }
   0xd   : > { %v9006_v0 = vld [vmem:[%s15033_s1 + $0x2] sm:$0x3]  ;;  %vm586_vm0 = vcmask 1041408   ;;  %p296_p3 = scmp.lt.s32.totalorder %s8999_s28, 1  ;;  %v396_v2 = vld [vmem:[%s15033_s1] sm:$0x3] }
   0xe   : > { %11427 = vmatprep.subr.msk.bf16.mxu0 %vm586_vm0, %v9006_v0  ;;  %v588_v1 = vsel %vm586_vm0, %v9006_v0, 0  ;;  %vm493_vm1 = vcmask 1046528   ;;  %vm531_vm2 = vcmask 31744   ;;  %v11706_v14 = vld [vmem:[%s15033_s1 + $0x4] sm:$0x3]  ;;  %v974_v17 = vsel %vm586_vm0, %v396_v2, 0 }
   0xf   : > { %10020 = vmatpush3.bf16.msra.mxu0 %v588_v1  ;;  %s15450_s28 = smov (!%p296_p3, %s8999_s28), 1  ;;  %vm770_vm3 = vsmask.f32 7424  ;;  %vm1159_vm4 = vsmask.f32 6400  ;;  %vm2093_vm5 = vcmask 1045504  }
  0x10   : > { %11428 = vmatprep.subr.msk.bf16.mxu0 %vm586_vm0, %v396_v2  ;;  %s11447_s11 = smul.u32 180, %s15450_s28  ;;  %vm2407_vm6 = vsmask.f32 5376  ;;  %vm307_vm7 = vcmask 60416   ;;  %vm3341_vm8 = vcmask 1044480   ;;  %vm314_vm10 = vcmask 60418  }
  0x11   : > { %vm3655_vm9 = vsmask.f32 4352  ;;  %vm312_vm11 = vcmask 58368   ;;  %vm4823_vm12 = vcmask 1043456   ;;  %vm4414_vm13 = vcmask 1045508  }
  0x12   : > { %s11681_s14 = scalar_lea.vmem %s15032_s0, %s11447_s11  ;;  %vm13167_vm14 = vmor %vm586_vm0, %vm4414_vm13  ;;  %vm4768_vm15 = vcmask 64512   ;;  %s11448_s11 = smul.u32 144, %s15450_s28 }
  0x13   : > { %v360_v3 = vld [vmem:[%s11681_s14 + $0xc] sm:$0xf]  ;;  %v397_v4 = vld [vmem:[%s11681_s14 + $0x8] sm:$0xe]  ;;  %v11686_v5 = vld [vmem:[%s11681_s14 + $0x10] sm:$0xff]  }
  0x14   : > { %v11688_v6 = vcombine.low %v397_v4, %v360_v3  ;;  %v11691_v7 = vld [vmem:[%s11681_s14 + $0x18] sm:$0xff]   ;;  %v495_v8 = vrot.slane %v11686_v5, 1  ;;  %v11695_v9 = vld [vmem:[%s11681_s14 + $0x20] sm:$0xff]   ;;  %v11701_v13 = vld [vmem:[%s11681_s14 + $0x28] sm:$0xff]   ;;  %v779_v49 = vshll.u32 %v11686_v5, 16  ;;  %v783_v52 = vshrl.u32 %v11686_v5, 16  ;;  %s14903_s13 = scalar_lea.vmem %s15040_s8, %s11448_s11 }
  0x15   : > { %v497_v11 = vrot.slane %v11691_v7, 1  ;;  %v499_v12 = vrot.slane %v11695_v9, 1  ;;  %v11712_v18 = vld [vmem:[%s11681_s14 + $0x30] sm:$0xff]   ;;  %v11717_v20 = vld [vmem:[%s11681_s14 + $0x38] sm:$0xff]   ;;  %v11721_v21 = vld [vmem:[%s11681_s14 + $0x40] sm:$0xff]   ;;  %v501_v22 = vrot.slane %v11701_v13, 1 }
  0x16   : > { %v494_v10 = vrot.slane %v11688_v6, 1  ;;  %v11726_v23 = vld [vmem:[%s11681_s14 + $0x48] sm:$0xff]   ;;  %v503_v25 = vrot.slane %v11712_v18, 1  ;;  %v11731_v26 = vld [vmem:[%s11681_s14 + $0x50] sm:$0xff]   ;;  %v505_v27 = vrot.slane %v11717_v20, 1  ;;  %v11737_v28 = vld [vmem:[%s11681_s14 + $0x58] sm:$0xff]  }
  0x17   : > { %v498_v16 = vsel %vm493_vm1, %v495_v8, %v497_v11  ;;  %v500_v19 = vsel %vm493_vm1, %v497_v11, %v499_v12  ;;  %v359_v24 = vld [vmem:[%s11681_s14 + $0x8] sm:$0xf]  ;;  %v507_v29 = vrot.slane %v11721_v21, 1  ;;  %v11741_v30 = vld [vmem:[%s11681_s14 + $0x60] sm:$0xff]   ;;  %v502_v31 = vsel %vm493_vm1, %v499_v12, %v501_v22  ;;  %v11751_v36 = vld [vmem:[%s11681_s14 + $0x70] sm:$0xff]  }
  0x18   : > { %v496_v15 = vsel %vm493_vm1, %v494_v10, %v495_v8  ;;  %v509_v32 = vrot.slane %v11726_v23, 1  ;;  %v11746_v33 = vld [vmem:[%s11681_s14 + $0x68] sm:$0xff]   ;;  %v504_v34 = vsel %vm493_vm1, %v501_v22, %v503_v25  ;;  %v511_v35 = vrot.slane %v11731_v26, 1  ;;  %v11756_v38 = vld [vmem:[%s11681_s14 + $0x78] sm:$0xff]   ;;  %v11761_v40 = vld [vmem:[%s11681_s14 + $0x80] sm:$0xff]  }
  0x19   : > { %10021 = vmatprep.mubr.msk.bf16.mxu0 %vm531_vm2, %v496_v15  ;;  %v11753_v37 = vcombine.low %v359_v24, %v360_v3  ;;  %v513_v39 = vrot.slane %v11737_v28, 1  ;;  %v506_v41 = vsel %vm493_vm1, %v503_v25, %v505_v27  ;;  %v508_v42 = vsel %vm493_vm1, %v505_v27, %v507_v29  ;;  %v11767_v43 = vld [vmem:[%s11681_s14 + $0x88] sm:$0xff]   ;;  %v11776_v48 = vld [vmem:[%s11681_s14 + $0x90] sm:$0xff]  }
  0x1a   : > { %10022 = vmatmul.mubr.msk.bf16.vlgmr.msra.gmra.mrb[0].mxu0 %vm531_vm2, %v498_v16  ;;  %v510_v45 = vsel %vm493_vm1, %v507_v29, %v509_v32  ;;  %v11772_v46 = vsel %vm493_vm1, %v509_v32, %v511_v35  ;;  %v515_v47 = vrot.slane %v11741_v30, 1  ;;  %v517_v50 = vrot.slane %v11746_v33, 1 }
  0x1b   : > { %10058 = vmatpush3.bf16.msra.mxu0 %v974_v17  ;;  %10025 = vmatprep.mubr.msk.bf16.mxu0 %vm531_vm2, %v500_v19  ;;  %v774_v51 = vshll.u32 %v11753_v37, 16  ;;  %v787_v53 = vshll.u32 %v11691_v7, 16  ;;  %v11784_v54 = vsel %vm493_vm1, %v511_v35, %v513_v39  ;;  %v15041_v55 = vrot.slane %v11751_v36, 1 }
  0x1c   : > { %11429 = vmatprep.subr.msk.bf16.mxu0 %vm586_vm0, %v11706_v14  ;;  %v11790_v57 = vrot.slane %v779_v49, 1  ;;  %v791_v61 = vshrl.u32 %v11691_v7, 16  ;;  %v11798_v62 = vsel %vm493_vm1, %v513_v39, %v515_v47  ;;  %v795_v1 = vshll.u32 %v11695_v9, 16 }
  0x1d   : > { %v789_v60 = vrot.slane %v787_v53, 1  ;;  %v11806_v2 = vsel %vm493_vm1, %v515_v47, %v517_v50  ;;  %v11808_v3 = vrot.slane %v774_v51, 1  ;;  %v799_v8 = vshrl.u32 %v11695_v9, 16 }
  0x1e   : > { %v785_v0 = vor.u32 %v783_v52, %v11790_v57  ;;  %v11817_v10 = vsel %vm493_vm1, %v517_v50, %v15041_v55  ;;  %v797_v12 = vrot.slane %v795_v1, 1  ;;  %v803_v15 = vshll.u32 %v11701_v13, 16 }
  0x1f   : > { %v793_v4 = vor.u32 %v791_v61, %v789_v60  ;;  %v807_v16 = vshrl.u32 %v11701_v13, 16  ;;  %v15062_v17 = vshll.u32 %v11712_v18, 16  ;;  %v815_v19 = vshrl.u32 %v11712_v18, 16 }
  0x20   : > { %v11820_v11 = vsel %vm770_vm3, %v785_v0, %v789_v60  ;;  %v15053_v22 = vshll.u32 %v11717_v20, 16  ;;  %v801_v25 = vor.u32 %v799_v8, %v797_v12  ;;  %v805_v27 = vrot.slane %v803_v15, 1 }
  0x21   : > { %v11831_v24 = vsel %vm770_vm3, %v793_v4, %v797_v12  ;;  %v15056_v29 = vshrl.u32 %v11717_v20, 16  ;;  %v15052_v35 = vshrl.u32 %v11721_v21, 16  ;;  %v15049_v47 = vshrl.u32 %v11726_v23, 16 }
  0x22   : > { %10026 = vmatmul.mubr.msk.bf16.gmra.mrb[4].mxu0 %vm531_vm2, %v502_v31  ;;  %v813_v31 = vrot.slane %v15062_v17, 1  ;;  %v821_v32 = vrot.slane %v15053_v22, 1  ;;  %v11845_v39 = vsel %vm770_vm3, %v801_v25, %v805_v27  ;;  %v15043_v0 = vshll.u32 %v11731_v26, 16 }
  0x23   : > { %10029 = vmatprep.mubr.msk.bf16.mxu0 %vm531_vm2, %v504_v34  ;;  %v15050_v34 = vshll.u32 %v11721_v21, 16  ;;  %v15044_v25 = vshrl.u32 %v11731_v26, 16  ;;  %v15048_v55 = vshll.u32 %v11746_v33, 16  ;;  %v1180_v5 = vrot.slane %v807_v16, 1 }
  0x24   : > { %v817_v50 = vor.u32 %v815_v19, %v813_v31  ;;  %v825_v51 = vor.u32 %v15056_v29, %v821_v32  ;;  %v15063_v29 = vshll.u32 %v11776_v48, 16  ;;  %v1181_v7 = vrot.slane %v803_v15, 2 }
  0x25   : > { %v829_v60 = vrot.slane %v15050_v34, 1  ;;  %v895_v34 = vshrl.u32 %v11761_v40, 16 }
  0x26   : > { %v11866_v44 = vsel %vm770_vm3, %v817_v50, %v821_v32  ;;  %v15047_v32 = vshrl.u32 %v11737_v28, 16  ;;  %v15046_v50 = vshll.u32 %v11741_v30, 16 }
  0x27   : > { %v11869_v63 = vsel %vm770_vm3, %v825_v51, %v829_v60  ;;  %v833_v59 = vor.u32 %v15052_v35, %v829_v60  ;;  %v15051_v60 = vshrl.u32 %v11741_v30, 16  ;;  %v15064_v35 = vshrl.u32 %v11767_v43, 16 }
  0x2a   : > { %10030 = vmatmul.mubr.msk.bf16.gmra.mrb[8].mxu0 %vm531_vm2, %v506_v41  ;;  %v809_v41 = vor.u32 %v807_v16, %v805_v27  ;;  %v15042_v27 = vshll.u32 %v11737_v28, 16 }
  0x2b   : > { %10033 = vmatprep.mubr.msk.bf16.mxu0 %vm531_vm2, %v508_v42  ;;  %v15045_v42 = vshll.u32 %v11726_v23, 16 }
  0x2c   : > { %v11859_v4 = vsel %vm770_vm3, %v809_v41, %v813_v31  ;;  %v845_v31 = vrot.slane %v15043_v0, 1  ;;  %v853_v58 = vrot.slane %v15042_v27, 1  ;;  %v861_v0 = vrot.slane %v15046_v50, 1 }
  0x2d   : > { %v837_v12 = vrot.slane %v15045_v42, 1  ;;  %v15061_v42 = vshrl.u32 %v11751_v36, 16 }
  0x2e   : > { %v857_v56 = vor.u32 %v15047_v32, %v853_v58  ;;  %v865_v50 = vor.u32 %v15051_v60, %v861_v0  ;;  %v15057_v32 = vshll.u32 %v11756_v38, 16  ;;  %v15060_v60 = vshll.u32 %v11767_v43, 16 }
  0x2f   : > { %v841_v41 = vor.u32 %v15049_v47, %v837_v12  ;;  %v11885_v51 = vsel %vm770_vm3, %v833_v59, %v837_v12  ;;  %v869_v12 = vrot.slane %v15048_v55, 1  ;;  %v15058_v47 = vshll.u32 %v11761_v40, 16 }
  0x31   : > { %v11892_v27 = vsel %vm770_vm3, %v841_v41, %v845_v31  ;;  %v11910_v41 = vsel %vm770_vm3, %v857_v56, %v861_v0  ;;  %v11923_v56 = vsel %vm770_vm3, %v865_v50, %v869_v12  ;;  %v885_v0 = vrot.slane %v15057_v32, 1 }
  0x32   : > { %10034 = vmatmul.mubr.msk.bf16.gmra.mrb[12].mxu0 %vm531_vm2, %v510_v45  ;;  %v849_v45 = vor.u32 %v15044_v25, %v845_v31  ;;  %v15054_v25 = vshll.u32 %v11751_v36, 16  ;;  %v11907_v31 = vld [vmem:[%s11681_s14 + $0x98] ss:$0 sps:$4 sm:$0x11]  }
  0x33   : > { %10037 = vmatprep.mubr.msk.bf16.mxu0 %vm531_vm2, %v11772_v46  ;;  %v15055_v46 = vshrl.u32 %v11746_v33, 16  ;;  %v915_v32 = vshll.u32 %v11907_v31, 16 }
  0x34   : > { %v11900_v59 = vsel %vm770_vm3, %v849_v45, %v853_v58  ;;  %v15059_v58 = vshrl.u32 %v11756_v38, 16  ;;  %v877_v55 = vrot.slane %v15054_v25, 1 }
  0x35   : > { %v873_v45 = vor.u32 %v15055_v46, %v869_v12  ;;  %v893_v46 = vrot.slane %v15058_v47, 1  ;;  %v901_v12 = vrot.slane %v15060_v60, 1  ;;  %v917_v17 = vrot.slane %v915_v32, 1 }
  0x36   : > { %v881_v25 = vor.u32 %v15061_v42, %v877_v55  ;;  %v889_v50 = vor.u32 %v15059_v58, %v885_v0  ;;  %v909_v58 = vrot.slane %v15063_v29, 1  ;;  %v1168_v29 = vrot.slane %v783_v52, 1 }
  0x37   : > { %v11930_v22 = vsel %vm770_vm3, %v873_v45, %v877_v55  ;;  %v15065_v45 = vshrl.u32 %v11776_v48, 16  ;;  %v1172_v55 = vrot.slane %v791_v61, 1  ;;  %v905_v42 = vor.u32 %v15064_v35, %v901_v12 }
  0x38   : > { %v11950_v47 = vsel %vm770_vm3, %v881_v25, %v885_v0  ;;  %v11957_v60 = vsel %vm770_vm3, %v889_v50, %v893_v46  ;;  %v1164_v0 = vshll.u32 %v11688_v6, 16  ;;  %v1169_v32 = vrot.slane %v779_v49, 2 }
  0x39   : > { %v913_v25 = vor.u32 %v15065_v45, %v909_v58  ;;  %v1173_v35 = vrot.slane %v787_v53, 2  ;;  %v1184_v53 = vrot.slane %v815_v19, 1 }
  0x3a   : > { %10038 = vmatmul.mubr.msk.bf16.gmra.mrb[16].mxu0 %vm531_vm2, %v11784_v54  ;;  %v897_v54 = vor.u32 %v895_v34, %v893_v46  ;;  %v11971_v46 = vsel %vm770_vm3, %v905_v42, %v909_v58  ;;  %v1170_v45 = vor.u32 %v1169_v32, %v1168_v29  ;;  %v1177_v42 = vrot.slane %v795_v1, 2 }
  0x3b   : > { %10041 = vmatprep.mubr.msk.bf16.mxu0 %vm531_vm2, %v11798_v62  ;;  %v1161_v62 = vshrl.u32 %v11688_v6, 16  ;;  %v1176_v6 = vrot.slane %v799_v8, 1  ;;  %v1174_v52 = vor.u32 %v1173_v35, %v1172_v55  ;;  %v15106_v1 = vshrl.u32 %v11717_v20, 16 }
  0x3c   : > { %v11963_v61 = vsel %vm770_vm3, %v897_v54, %v901_v12  ;;  %v11978_v12 = vsel %vm770_vm3, %v913_v25, %v917_v17  ;;  %v1166_v54 = vrot.slane %v1164_v0, 2  ;;  %v15105_v17 = vshll.u32 %v11712_v18, 16 }
  0x3d   : > { %v1163_v50 = vrot.slane %v1161_v62, 1  ;;  %v11995_v8 = vsel %vm1159_vm4, %v1170_v45, %v1174_v52  ;;  %v1178_v9 = vor.u32 %v1177_v42, %v1176_v6  ;;  %v1188_v16 = vrot.slane %v15106_v1, 1 }
  0x3e   : > { %v1185_v58 = vrot.slane %v15105_v17, 2  ;;  %v15107_v29 = vshll.u32 %v11717_v20, 16  ;;  %v1182_v18 = vor.u32 %v1181_v7, %v1180_v5  ;;  %v15109_v25 = vshll.u32 %v11721_v21, 16 }
  0x3f   : > { %v1167_v49 = vor.u32 %v1166_v54, %v1163_v50  ;;  %v12009_v55 = vsel %vm1159_vm4, %v1174_v52, %v1178_v9  ;;  %v15110_v20 = vshrl.u32 %v11726_v23, 16  ;;  %v15111_v32 = vshll.u32 %v11726_v23, 16 }
  0x40   : > { %v1189_v13 = vrot.slane %v15107_v29, 2  ;;  %v1186_v19 = vor.u32 %v1185_v58, %v1184_v53  ;;  %v1193_v0 = vrot.slane %v15109_v25, 2  ;;  %v15112_v6 = vshrl.u32 %v11731_v26, 16 }
  0x41   : > { %v12004_v15 = vsel %vm1159_vm4, %v1167_v49, %v1170_v45  ;;  %v1196_v50 = vrot.slane %v15110_v20, 1  ;;  %v1197_v54 = vrot.slane %v15111_v32, 2  ;;  %v15113_v5 = vshll.u32 %v11731_v26, 16 }
  0x42   : > { %10042 = vmatmul.mubr.msk.bf16.gmra.mrb[20].mxu0 %vm531_vm2, %v11806_v2  ;;  %v15108_v2 = vshrl.u32 %v11721_v21, 16  ;;  %v1190_v62 = vor.u32 %v1189_v13, %v1188_v16  ;;  %v12019_v45 = vsel %vm1159_vm4, %v1182_v18, %v1186_v19  ;;  %v1200_v52 = vrot.slane %v15112_v6, 1 }
  0x43   : > { %10045 = vmatprep.mubr.msk.bf16.mxu0 %vm531_vm2, %v11817_v10  ;;  %v12016_v10 = vsel %vm1159_vm4, %v1178_v9, %v1182_v18  ;;  %v1201_v49 = vrot.slane %v15113_v5, 2  ;;  %v15114_v7 = vshrl.u32 %v11737_v28, 16  ;;  %v15115_v17 = vrot.slane %v11756_v38, 1 }
  0x44   : > { %v1192_v35 = vrot.slane %v15108_v2, 1  ;;  %v12026_v42 = vsel %vm1159_vm4, %v1186_v19, %v1190_v62  ;;  %v15116_v58 = vrot.slane %v11751_v36, 1  ;;  %v529_v9 = vrot.slane %v11907_v31, 1 }
  0x45   : > { %v1204_v53 = vrot.slane %v15114_v7, 1  ;;  %v1198_v1 = vor.u32 %v1197_v54, %v1196_v50  ;;  %v15117_v16 = vshll.u32 %v11737_v28, 16  ;;  %v15118_v13 = vrot.slane %v11761_v40, 1 }
  0x46   : > { %v1194_v21 = vor.u32 %v1193_v0, %v1192_v35  ;;  %v522_v23 = vsel %vm493_vm1, %v15116_v58, %v15115_v17  ;;  %v15119_v26 = vmov %v15115_v17  ;;  %v1202_v2 = vor.u32 %v1201_v49, %v1200_v52 }
  0x47   : > { %v1205_v29 = vrot.slane %v15117_v16, 2  ;;  %v524_v18 = vsel %vm493_vm1, %v15119_v26, %v15118_v13  ;;  %v15120_v28 = vshrl.u32 %v11741_v30, 16  ;;  %v15121_v20 = vshll.u32 %v11741_v30, 16 }
  0x48   : > { %v12046_v19 = vsel %vm1159_vm4, %v1190_v62, %v1194_v21  ;;  %v12049_v35 = vsel %vm1159_vm4, %v1194_v21, %v1198_v1  ;;  %v12053_v31 = vsel %vm1159_vm4, %v1198_v1, %v1202_v2  ;;  %v15122_v32 = vshrl.u32 %v11746_v33, 16 }
  0x49   : > { %v1206_v25 = vor.u32 %v1205_v29, %v1204_v53  ;;  %v1208_v0 = vrot.slane %v15120_v28, 1  ;;  %v1209_v50 = vrot.slane %v15121_v20, 2  ;;  %v15123_v6 = vshll.u32 %v11746_v33, 16 }
  0x4a   : > { %10046 = vmatmul.mubr.msk.bf16.gmra.mrb[24].mxu0 %vm531_vm2, %v522_v23  ;;  %v1212_v54 = vrot.slane %v15122_v32, 1  ;;  %v15124_v7 = vrot.slane %v11767_v43, 1  ;;  %v15125_v30 = vmov %v15118_v13  ;;  %v15126_v58 = vrot.slane %v11776_v48, 1 }
  0x4b   : > { %10049 = vmatprep.mubr.msk.bf16.mxu0 %vm531_vm2, %v524_v18  ;;  %v12061_v62 = vsel %vm1159_vm4, %v1202_v2, %v1206_v25  ;;  %v1213_v52 = vrot.slane %v15123_v6, 2  ;;  %v1210_v21 = vor.u32 %v1209_v50, %v1208_v0  ;;  %v15128_v1 = vshrl.u32 %v11751_v36, 16 }
  0x4c   : > { %v526_v53 = vsel %vm493_vm1, %v15125_v30, %v15124_v7  ;;  %v15127_v23 = vmov %v15124_v7  ;;  %v15129_v29 = vshll.u32 %v11751_v36, 16  ;;  %v15130_v26 = vshrl.u32 %v11756_v38, 16 }
  0x4d   : > { %v1214_v5 = vor.u32 %v1213_v52, %v1212_v54  ;;  %v12068_v49 = vsel %vm1159_vm4, %v1206_v25, %v1210_v21  ;;  %v528_v33 = vsel %vm493_vm1, %v15127_v23, %v15126_v58  ;;  %v1216_v16 = vrot.slane %v15128_v1, 1 }
  0x4e   : > { %v1217_v13 = vrot.slane %v15129_v29, 2  ;;  %v1220_v18 = vrot.slane %v15130_v26, 1  ;;  %v15131_v2 = vshll.u32 %v11756_v38, 16  ;;  %v15132_v28 = vshrl.u32 %v11753_v37, 16 }
  0x4f   : > { %v12076_v17 = vsel %vm1159_vm4, %v1210_v21, %v1214_v5  ;;  %v15133_v54 = vmov %v15126_v58  ;;  %v1224_v37 = vrot.slane %v895_v34, 1  ;;  %v15134_v38 = vshll.u32 %v11761_v40, 16  ;;  %v9083_v40 = vld [vmem:[%s15033_s1 + $0x6] sm:$0x3] }
  0x50   : > { %v1221_v25 = vrot.slane %v15131_v2, 2  ;;  %v777_v0 = vor.u32 %v11808_v3, %v15132_v28  ;;  %v1218_v20 = vor.u32 %v1217_v13, %v1216_v16  ;;  %v530_v36 = vsel %vm493_vm1, %v15133_v54, %v529_v9  ;;  %v12235_v13 = vld [vmem:[%s11681_s14 + $0x30] sm:$0xff]  }
  0x51   : > { %v1225_v3 = vrot.slane %v15134_v38, 2  ;;  %v15135_v21 = vshrl.u32 %v11767_v43, 16  ;;  %v15136_v9 = vshll.u32 %v11767_v43, 16  ;;  %v1300_v34 = vsel %vm586_vm0, %v11706_v14, 0 }
  0x52   : > { %10050 = vmatmul.mubr.msk.bf16.gmra.mrb[28].mxu0 %vm531_vm2, %v526_v53  ;;  %v1222_v50 = vor.u32 %v1221_v25, %v1220_v18  ;;  %v1219_v32 = vsel %vm1159_vm4, %v1214_v5, %v1218_v20  ;;  %v782_v52 = vsel %vm770_vm3, %v777_v0, %v11790_v57  ;;  %v15137_v43 = vshrl.u32 %v11776_v48, 16  ;;  %v12243_v25 = vld [vmem:[%s11681_s14 + $0x38] sm:$0xff]  }
  0x53   : > { %10053 = vmatprep.mubr.msk.bf16.mxu0 %vm531_vm2, %v528_v33  ;;  %v1228_v5 = vrot.slane %v15135_v21, 1  ;;  %v1229_v7 = vrot.slane %v15136_v9, 2  ;;  %v1226_v30 = vor.u32 %v1225_v3, %v1224_v37  ;;  %v15138_v33 = vshll.u32 %v11776_v48, 16  ;;  %v12171_v48 = vld [vmem:[%s15033_s1 + $0x8] sm:$0x3]  ;;  %v12257_v37 = vld [vmem:[%s11681_s14 + $0x40] sm:$0xff]  }
  0x54   : > { %v1223_v6 = vsel %vm1159_vm4, %v1218_v20, %v1222_v50  ;;  %v1232_v23 = vrot.slane %v15137_v43, 1  ;;  %v1683_v0 = vshrl.u32 %v12235_v13, 16  ;;  %v1686_v20 = vshll.u32 %v12235_v13, 16  ;;  %v12267_v9 = vld [vmem:[%s11681_s14 + $0x48] sm:$0xff]  }
  0x55   : > { %v1230_v53 = vor.u32 %v1229_v7, %v1228_v5  ;;  %v1227_v57 = vsel %vm1159_vm4, %v1222_v50, %v1226_v30  ;;  %v1233_v1 = vrot.slane %v15138_v33, 2  ;;  %v1695_v54 = vshll.u32 %v12243_v25, 16  ;;  %v12272_v7 = vld [vmem:[%s15033_s1 + $0xa] sm:$0x3] }
  0x56   : > { %v2186_v38 = vsel %vm586_vm0, %v12171_v48, 0 }
  0x57   : > { %v12115_v58 = vsel %vm1159_vm4, %v1226_v30, %v1230_v53  ;;  %v12131_v14 = vor.u32 %v1233_v1, %v1232_v23  ;;  %v1697_v5 = vrot.slane %v1695_v54, 2  ;;  %v12288_v1 = vld [vmem:[%s11681_s14 + $0x50] sm:$0xff]  }
  0x59   : > { %v1235_v16 = vsel %vm1159_vm4, %v1230_v53, %v12131_v14  ;;  %v1701_v53 = vshrl.u32 %v12257_v37, 16 }
  0x5a   : > { %10054 = vmatmul.mubr.msk.bf16.gmra.mrb[32].mxu0 %vm531_vm2, %v530_v36 }
  0x5b   : > { %10059 = vmatprep.mubr.msk.bf16.mxu0 %vm531_vm2, %v782_v52  ;;  %v1688_v52 = vrot.slane %v1686_v20, 2  ;;  %v1703_v23 = vrot.slane %v1701_v53, 1 }
  0x62   : > { %10060 = vmatmul.mubr.msk.bf16.vlgmr.msra.gmra.mrb[0].mxu0 %vm531_vm2, %v11820_v11  ;;  %v12200_v11 = vld [vmem:[%s11681_s14 + $0x14] sm:$0xf] }
  0x63   : > { %10096 = vmatpush3.bf16.msra.mxu0 %v1300_v34  ;;  %10063 = vmatprep.mubr.msk.bf16.mxu0 %vm531_vm2, %v11831_v24  ;;  %v1710_v34 = vshrl.u32 %v12267_v9, 16 }
  0x64   : > { %11430 = vmatprep.subr.msk.bf16.mxu0 %vm586_vm0, %v9083_v40 }
  0x6a   : > { %10064 = vmatmul.mubr.msk.bf16.gmra.mrb[4].mxu0 %vm531_vm2, %v11845_v39  ;;  %v12205_v39 = vld [vmem:[%s11681_s14 + $0x18] sm:$0xff]  }
  0x6b   : > { %10067 = vmatprep.mubr.msk.bf16.mxu0 %vm531_vm2, %v11859_v4 }
  0x72   : > { %10068 = vmatmul.mubr.msk.bf16.gmra.mrb[8].mxu0 %vm531_vm2, %v11866_v44  ;;  %v1872_v44 = vsel %vm586_vm0, %v9083_v40, 0  ;;  %v1713_v40 = vshll.u32 %v12267_v9, 16 }
  0x73   : > { %10071 = vmatprep.mubr.msk.bf16.mxu0 %vm531_vm2, %v11869_v63  ;;  %v1515_v63 = vld [vmem:[%s11681_s14 + $0x10] sm:$0xe] }
  0x74   : > { %v9084_v24 = vcombine.low %v1515_v63, %v12200_v11 }
  0x7a   : > { %10072 = vmatmul.mubr.msk.bf16.gmra.mrb[12].mxu0 %vm531_vm2, %v11885_v51  ;;  %v1651_v51 = vshll.u32 %v9084_v24, 16 }
  0x7b   : > { %10075 = vmatprep.mubr.msk.bf16.mxu0 %vm531_vm2, %v11892_v27  ;;  %v1648_v27 = vshrl.u32 %v9084_v24, 16  ;;  %v1722_v24 = vshll.u32 %v12288_v1, 16 }
  0x82   : > { %10076 = vmatmul.mubr.msk.bf16.gmra.mrb[16].mxu0 %vm531_vm2, %v11900_v59  ;;  %v1659_v59 = vshll.u32 %v12205_v39, 16 }
  0x83   : > { %10079 = vmatprep.mubr.msk.bf16.mxu0 %vm531_vm2, %v11910_v41 }
  0x8a   : > { %10080 = vmatmul.mubr.msk.bf16.gmra.mrb[20].mxu0 %vm531_vm2, %v11923_v56 }
  0x8b   : > { %10083 = vmatprep.mubr.msk.bf16.mxu0 %vm531_vm2, %v11930_v22  ;;  %v11480_v22 = vld [vmem:[%s11681_s14 + $0x98] ss:$0 sps:$4 sm:$0x33]  }
  0x8c   : > { %v1240_v4 = vshll.u32 %v11480_v22, 16 }
  0x8e   : > { %v1242_v56 = vrot.slane %v1240_v4, 2 }
  0x92   : > { %10084 = vmatmul.mubr.msk.bf16.gmra.mrb[24].mxu0 %vm531_vm2, %v11950_v47  ;;  %v1237_v47 = vshrl.u32 %v11480_v22, 16  ;;  %v1719_v22 = vshrl.u32 %v12288_v1, 16 }
  0x93   : > { %10087 = vmatprep.mubr.msk.bf16.mxu0 %vm531_vm2, %v11957_v60  ;;  %v1656_v60 = vshrl.u32 %v12205_v39, 16 }
  0x94   : > { %v1239_v41 = vrot.slane %v1237_v47, 1 }
  0x9a   : > { %10088 = vmatmul.mubr.msk.bf16.gmra.mrb[28].mxu0 %vm531_vm2, %v11963_v61  ;;  %v12212_v61 = vld [vmem:[%s11681_s14 + $0x20] sm:$0xff]  }
  0x9b   : > { %10091 = vmatprep.mubr.msk.bf16.mxu0 %vm531_vm2, %v11971_v46  ;;  %v1650_v46 = vrot.slane %v1648_v27, 1 }
  0xa2   : > { %10092 = vmatmul.mubr.msk.bf16.gmra.mrb[32].mxu0 %vm531_vm2, %v11978_v12  ;;  %v1653_v12 = vrot.slane %v1651_v51, 2 }
  0xa3   : > { %10097 = vmatprep.mubr.msk.bf16.mxu0 %vm531_vm2, %v12004_v15  ;;  %v1661_v15 = vrot.slane %v1659_v59, 2 }
  0xaa   : > { %10098 = vmatmul.mubr.msk.bf16.vlgmr.msra.gmra.mrb[0].mxu0 %vm531_vm2, %v11995_v8  ;;  %v1658_v8 = vrot.slane %v1656_v60, 1 }
  0xab   : > { %10134 = vmatpush3.bf16.msra.mxu0 %v1872_v44  ;;  %10101 = vmatprep.mubr.msk.bf16.mxu0 %vm531_vm2, %v12009_v55  ;;  %v12219_v55 = vld [vmem:[%s11681_s14 + $0x28] sm:$0xff]   ;;  %v1715_v44 = vrot.slane %v1713_v40, 2 }
  0xac   : > { %11431 = vmatprep.subr.msk.bf16.mxu0 %vm586_vm0, %v12171_v48  ;;  %v12296_v48 = vld [vmem:[%s11681_s14 + $0x58] sm:$0xff]  }
  0xad   : > { %v1728_v4 = vshrl.u32 %v12296_v48, 16  ;;  %v1731_v27 = vshll.u32 %v12296_v48, 16 }
  0xb2   : > { %10102 = vmatmul.mubr.msk.bf16.gmra.mrb[4].mxu0 %vm531_vm2, %v12016_v10  ;;  %v1243_v10 = vor.u32 %v1242_v56, %v1239_v41  ;;  %v1721_v41 = vrot.slane %v1719_v22, 1  ;;  %v1724_v56 = vrot.slane %v1722_v24, 2 }
  0xb3   : > { %10105 = vmatprep.mubr.msk.bf16.mxu0 %vm531_vm2, %v12019_v45  ;;  %v1665_v45 = vshrl.u32 %v12212_v61, 16 }
  0xba   : > { %10106 = vmatmul.mubr.msk.bf16.gmra.mrb[8].mxu0 %vm531_vm2, %v12026_v42  ;;  %v1668_v42 = vshll.u32 %v12212_v61, 16 }
  0xbb   : > { %10109 = vmatprep.mubr.msk.bf16.mxu0 %vm531_vm2, %v12046_v19  ;;  %v1654_v19 = vor.u32 %v1653_v12, %v1650_v46  ;;  %v12310_v46 = vld [vmem:[%s11681_s14 + $0x60] sm:$0xff]  }
  0xbc   : > { %v1670_v29 = vrot.slane %v1668_v42, 2 }
  0xc2   : > { %10110 = vmatmul.mubr.msk.bf16.gmra.mrb[12].mxu0 %vm531_vm2, %v12049_v35  ;;  %v1662_v35 = vor.u32 %v1661_v15, %v1658_v8  ;;  %v1730_v8 = vrot.slane %v1728_v4, 1  ;;  %v1733_v15 = vrot.slane %v1731_v27, 2 }
  0xc3   : > { %10113 = vmatprep.mubr.msk.bf16.mxu0 %vm531_vm2, %v12053_v31  ;;  %v1674_v31 = vshrl.u32 %v12219_v55, 16 }
  0xc4   : > { %v1663_v26 = vsel %vm1159_vm4, %v1654_v19, %v1662_v35  ;;  %v1725_v19 = vor.u32 %v1724_v56, %v1721_v41 }
  0xc5   : > { %v1676_v18 = vrot.slane %v1674_v31, 1 }
  0xca   : > { %10114 = vmatmul.mubr.msk.bf16.gmra.mrb[16].mxu0 %vm531_vm2, %v12061_v62  ;;  %v1677_v62 = vshll.u32 %v12219_v55, 16 }
  0xcb   : > { %10117 = vmatprep.mubr.msk.bf16.mxu0 %vm531_vm2, %v12068_v49  ;;  %v1244_v49 = vsel %vm1159_vm4, %v12131_v14, %v1243_v10  ;;  %v12318_v10 = vld [vmem:[%s11681_s14 + $0x68] sm:$0xff]  }
  0xcc   : > { %v1679_v2 = vrot.slane %v1677_v62, 2 }
  0xce   : > { %v1680_v50 = vor.u32 %v1679_v2, %v1676_v18 }
  0xd2   : > { %10118 = vmatmul.mubr.msk.bf16.gmra.mrb[20].mxu0 %vm531_vm2, %v12076_v17  ;;  %v1667_v17 = vrot.slane %v1665_v45, 1 }
  0xd3   : > { %10121 = vmatprep.mubr.msk.bf16.mxu0 %vm531_vm2, %v1219_v32  ;;  %v1692_v32 = vshrl.u32 %v12243_v25, 16 }
  0xd4   : > { %v1671_v28 = vor.u32 %v1670_v29, %v1667_v17  ;;  %v1734_v17 = vor.u32 %v1733_v15, %v1730_v8  ;;  %v1746_v29 = vshrl.u32 %v12318_v10, 16 }
  0xd5   : > { %v1694_v21 = vrot.slane %v1692_v32, 1 }
  0xd6   : > { %v1672_v36 = vsel %vm1159_vm4, %v1662_v35, %v1671_v28  ;;  %v1681_v3 = vsel %vm1159_vm4, %v1671_v28, %v1680_v50  ;;  %v1737_v35 = vshrl.u32 %v12310_v46, 16 }
  0xd8   : > { %v1739_v2 = vrot.slane %v1737_v35, 1 }
  0xda   : > { %10122 = vmatmul.mubr.msk.bf16.gmra.mrb[24].mxu0 %vm531_vm2, %v1223_v6  ;;  %v1685_v6 = vrot.slane %v1683_v0, 1 }
  0xdb   : > { %10125 = vmatprep.mubr.msk.bf16.mxu0 %vm531_vm2, %v1227_v57  ;;  %v1704_v57 = vshll.u32 %v12257_v37, 16 }
  0xdc   : > { %v1689_v30 = vor.u32 %v1688_v52, %v1685_v6  ;;  %v1748_v6 = vrot.slane %v1746_v29, 1 }
  0xdd   : > { %v1706_v33 = vrot.slane %v1704_v57, 2 }
  0xde   : > { %v1690_v43 = vsel %vm1159_vm4, %v1680_v50, %v1689_v30  ;;  %v12332_v50 = vld [vmem:[%s11681_s14 + $0x70] sm:$0xff]  }
  0xdf   : > { %v1707_v63 = vor.u32 %v1706_v33, %v1703_v23 }
  0xe2   : > { %10126 = vmatmul.mubr.msk.bf16.gmra.mrb[28].mxu0 %vm531_vm2, %v12115_v58  ;;  %v1698_v58 = vor.u32 %v1697_v5, %v1694_v21  ;;  %v1755_v21 = vshrl.u32 %v12332_v50, 16  ;;  %v1758_v5 = vshll.u32 %v12332_v50, 16 }
  0xe3   : > { %10129 = vmatprep.mubr.msk.bf16.mxu0 %vm531_vm2, %v1235_v16  ;;  %v1712_v16 = vrot.slane %v1710_v34, 1 }
  0xe4   : > { %v1699_v14 = vsel %vm1159_vm4, %v1689_v30, %v1698_v58  ;;  %v1708_v51 = vsel %vm1159_vm4, %v1698_v58, %v1707_v63  ;;  %v1757_v33 = vrot.slane %v1755_v21, 1 }
  0xe5   : > { %v1716_v47 = vor.u32 %v1715_v44, %v1712_v16  ;;  %v12354_v16 = vld [vmem:[%s11681_s14 + $0x80] sm:$0xff]  }
  0xe6   : > { %v15072_v56 = vshrl.u32 %v12354_v16, 16 }
  0xe7   : > { %v1717_v12 = vsel %vm1159_vm4, %v1707_v63, %v1716_v47  ;;  %v1726_v18 = vsel %vm1159_vm4, %v1716_v47, %v1725_v19 }
  0xea   : > { %10130 = vmatmul.mubr.msk.bf16.gmra.mrb[32].mxu0 %vm531_vm2, %v1244_v49  ;;  %v1740_v49 = vshll.u32 %v12310_v46, 16 }
  0xeb   : > { %10135 = vmatprep.mubr.msk.bf16.mxu0 %vm531_vm2, %v1663_v26  ;;  %v1749_v26 = vshll.u32 %v12318_v10, 16 }
  0xec   : > { %v1742_v28 = vrot.slane %v1740_v49, 2 }
  0xed   : > { %v1751_v52 = vrot.slane %v1749_v26, 2 }
  0xef   : > { %v1752_v30 = vor.u32 %v1751_v52, %v1748_v6 }
  0xf2   : > { %10136 = vmatmul.mubr.msk.bf16.vlgmr.msra.gmra.mrb[0].mxu0 %vm531_vm2, %v1672_v36  ;;  %v1735_v36 = vsel %vm1159_vm4, %v1725_v19, %v1734_v17 }
  0xf3   : > { %10172 = vmatpush3.bf16.msra.mxu0 %v2186_v38  ;;  %10139 = vmatprep.mubr.msk.bf16.mxu0 %vm531_vm2, %v1681_v3  ;;  %v12340_v38 = vld [vmem:[%s11681_s14 + $0x78] sm:$0xff]   ;;  %v1743_v3 = vor.u32 %v1742_v28, %v1739_v2  ;;  %v12376_v28 = vld [vmem:[%s11681_s14 + $0x90] sm:$0xff]  }
  0xf4   : > { %11432 = vmatprep.subr.msk.bf16.mxu0 %vm586_vm0, %v12272_v7  ;;  %v1764_v58 = vshrl.u32 %v12340_v38, 16 }
  0xf5   : > { %v1744_v23 = vsel %vm1159_vm4, %v1734_v17, %v1743_v3  ;;  %v1753_v44 = vsel %vm1159_vm4, %v1743_v3, %v1752_v30  ;;  %v12384_v3 = vld [vmem:[%s11681_s14 + $0x98] sm:$0xff]  }
  0xf6   : > { %v1766_v63 = vrot.slane %v1764_v58, 1 }
  0xfa   : > { %10140 = vmatmul.mubr.msk.bf16.gmra.mrb[4].mxu0 %vm531_vm2, %v1690_v43  ;;  %v1767_v43 = vshll.u32 %v12340_v38, 16 }
  0xfb   : > { %10143 = vmatprep.mubr.msk.bf16.mxu0 %vm531_vm2, %v1699_v14  ;;  %v1760_v14 = vrot.slane %v1758_v5, 2 }
  0xfc   : > { %v1769_v47 = vrot.slane %v1767_v43, 2 }
  0xfd   : > { %v1761_v41 = vor.u32 %v1760_v14, %v1757_v33  ;;  %v15067_v33 = vshll.u32 %v12376_v28, 16 }
  0xfe   : > { %v1770_v8 = vor.u32 %v1769_v47, %v1766_v63  ;;  %v1803_v63 = vshll.u32 %v12384_v3, 16 }
  0xff   : > { %v1762_v17 = vsel %vm1159_vm4, %v1752_v30, %v1761_v41 }
 0x102   : > { %10144 = vmatmul.mubr.msk.bf16.gmra.mrb[8].mxu0 %vm531_vm2, %v1708_v51  ;;  %v12362_v51 = vld [vmem:[%s11681_s14 + $0x88] sm:$0xff]  }
 0x103   : > { %10147 = vmatprep.mubr.msk.bf16.mxu0 %vm531_vm2, %v1717_v12  ;;  %v15070_v12 = vshll.u32 %v12354_v16, 16  ;;  %v15069_v15 = vshrl.u32 %v12362_v51, 16  ;;  %v15068_v19 = vshll.u32 %v12362_v51, 16 }
 0x105   : > { %v1778_v2 = vrot.slane %v15070_v12, 2  ;;  %v1784_v6 = vrot.slane %v15069_v15, 1  ;;  %v1787_v52 = vrot.slane %v15068_v19, 2  ;;  %v2087_v19 = vld [vmem:[%s11681_s14 + $0x10] sm:$0xc] }
 0x107   : > { %v1788_v14 = vor.u32 %v1787_v52, %v1784_v6  ;;  %v1805_v6 = vrot.slane %v1803_v63, 2 }
 0x10a   : > { %10148 = vmatmul.mubr.msk.bf16.gmra.mrb[12].mxu0 %vm531_vm2, %v1726_v18  ;;  %v1775_v18 = vrot.slane %v15072_v56, 1  ;;  %v12413_v56 = vcombine.low %v2087_v19, %v12200_v11  ;;  %v2097_v11 = vrot.slane %v12212_v61, 2  ;;  %v2428_v61 = vrot.slane %v1683_v0, 2 }
 0x10b   : > { %10151 = vmatprep.mubr.msk.bf16.mxu0 %vm531_vm2, %v1735_v36  ;;  %v1771_v36 = vsel %vm1159_vm4, %v1761_v41, %v1770_v8 }
 0x10c   : > { %v1779_v30 = vor.u32 %v1778_v2, %v1775_v18 }
 0x10e   : > { %v1780_v47 = vsel %vm1159_vm4, %v1770_v8, %v1779_v30  ;;  %v1789_v18 = vsel %vm1159_vm4, %v1779_v30, %v1788_v14 }
 0x112   : > { %10152 = vmatmul.mubr.msk.bf16.gmra.mrb[16].mxu0 %vm531_vm2, %v1744_v23  ;;  %v15066_v23 = vshrl.u32 %v12376_v28, 16 }
 0x113   : > { %10155 = vmatprep.mubr.msk.bf16.mxu0 %vm531_vm2, %v1753_v44  ;;  %v15071_v44 = vshrl.u32 %v12384_v3, 16 }
 0x114   : > { %v1793_v41 = vrot.slane %v15066_v23, 1 }
 0x115   : > { %v1802_v2 = vrot.slane %v15071_v44, 1 }
 0x11a   : > { %10156 = vmatmul.mubr.msk.bf16.gmra.mrb[20].mxu0 %vm531_vm2, %v1762_v17  ;;  %v1796_v17 = vrot.slane %v15067_v33, 2  ;;  %v1806_v33 = vor.u32 %v1805_v6, %v1802_v2  ;;  %v2103_v2 = vrot.slane %v12243_v25, 2  ;;  %v2436_v25 = vrot.slane %v1701_v53, 2 }
 0x11b   : > { %10159 = vmatprep.mubr.msk.bf16.mxu0 %vm531_vm2, %v1771_v36  ;;  %v12398_v36 = vld [vmem:[%s11681_s14 + $0xa0] ss:$0 sps:$4 sm:$0x33]   ;;  %v2445_v53 = vrot.slane %v1722_v24, 3 }
 0x11c   : > { %v1797_v8 = vor.u32 %v1796_v17, %v1793_v41  ;;  %v1809_v52 = vshrl.u32 %v12398_v36, 16  ;;  %v1812_v23 = vshll.u32 %v12398_v36, 16  ;;  %v2094_v41 = vrot.slane %v12413_v56, 2 }
 0x11d   : > { %v2095_v17 = vrot.slane %v12205_v39, 2 }
 0x11e   : > { %v1798_v15 = vsel %vm1159_vm4, %v1788_v14, %v1797_v8  ;;  %v1811_v30 = vrot.slane %v1809_v52, 1  ;;  %v1814_v12 = vrot.slane %v1812_v23, 2  ;;  %v1807_v44 = vsel %vm1159_vm4, %v1797_v8, %v1806_v33 }
 0x11f   : > { %v2096_v14 = vsel %vm2093_vm5, %v2094_v41, %v2095_v17  ;;  %v2098_v19 = vsel %vm2093_vm5, %v2095_v17, %v2097_v11  ;;  %v2105_v8 = vrot.slane %v12257_v37, 2  ;;  %v2107_v52 = vrot.slane %v12267_v9, 2 }
 0x120   : > { %v2109_v41 = vrot.slane %v12288_v1, 2  ;;  %v2111_v17 = vrot.slane %v12296_v48, 2  ;;  %v2444_v37 = vrot.slane %v1719_v22, 2  ;;  %v2448_v9 = vrot.slane %v1728_v4, 2 }
 0x121   : > { %v2452_v1 = vrot.slane %v1737_v35, 2  ;;  %v2453_v22 = vrot.slane %v1740_v49, 3  ;;  %v2456_v48 = vrot.slane %v1746_v29, 2  ;;  %v2457_v4 = vrot.slane %v1749_v26, 3 }
 0x122   : > { %10160 = vmatmul.mubr.msk.bf16.gmra.mrb[24].mxu0 %vm531_vm2, %v1780_v47  ;;  %v1815_v47 = vor.u32 %v1814_v12, %v1811_v30  ;;  %v2548_v12 = vsel %vm586_vm0, %v12272_v7, 0  ;;  %v2106_v30 = vsel %vm2093_vm5, %v2103_v2, %v2105_v8  ;;  %v2461_v35 = vrot.slane %v1758_v5, 3 }
 0x123   : > { %10163 = vmatprep.mubr.msk.bf16.mxu0 %vm531_vm2, %v1789_v18  ;;  %v2465_v29 = vrot.slane %v1767_v43, 3  ;;  %v15141_v43 = vshrl.u32 %v12362_v51, 16 }
 0x124   : > { %v1816_v18 = vsel %vm1159_vm4, %v1806_v33, %v1815_v47  ;;  %v12432_v33 = vld [vmem:[%s15033_s1 + $0xc] sm:$0x3]  ;;  %v2108_v47 = vsel %vm2093_vm5, %v2105_v8, %v2107_v52  ;;  %v2123_v8 = vrot.slane %v12362_v51, 2 }
 0x12a   : > { %10164 = vmatmul.mubr.msk.bf16.gmra.mrb[28].mxu0 %vm531_vm2, %v1798_v15  ;;  %v2099_v15 = vrot.slane %v12219_v55, 2 }
 0x12b   : > { %10167 = vmatprep.mubr.msk.bf16.mxu0 %vm531_vm2, %v1807_v44  ;;  %v2101_v44 = vrot.slane %v12235_v13, 2 }
 0x12c   : > { %v2100_v23 = vsel %vm2093_vm5, %v2097_v11, %v2099_v15  ;;  %v2113_v11 = vrot.slane %v12310_v46, 2  ;;  %v2460_v46 = vrot.slane %v1755_v21, 2 }
 0x12d   : > { %v2102_v7 = vsel %vm2093_vm5, %v2099_v15, %v2101_v44  ;;  %v2104_v6 = vsel %vm2093_vm5, %v2101_v44, %v2103_v2  ;;  %v2115_v15 = vrot.slane %v12318_v10, 2  ;;  %v2119_v44 = vrot.slane %v12340_v38, 2 }
 0x12e   : > { %v2464_v10 = vrot.slane %v1764_v58, 2  ;;  %v2462_v26 = vor.u32 %v2461_v35, %v2460_v46 }
 0x132   : > { %10168 = vmatmul.mubr.msk.bf16.gmra.mrb[32].mxu0 %vm531_vm2, %v1816_v18  ;;  %v2110_v18 = vsel %vm2093_vm5, %v2107_v52, %v2109_v41 }
 0x133   : > { %10173 = vmatprep.mubr.msk.bf16.mxu0 %vm531_vm2, %v2096_v14  ;;  %v2112_v14 = vsel %vm2093_vm5, %v2109_v41, %v2111_v17  ;;  %v2127_v41 = vrot.slane %v12384_v3, 2 }
 0x13a   : > { %10174 = vmatmul.mubr.msk.bf16.vlgmr.msra.gmra.mrb[0].mxu0 %vm531_vm2, %v2098_v19  ;;  %v2114_v19 = vsel %vm2093_vm5, %v2111_v17, %v2113_v11  ;;  %v2409_v17 = vshrl.u32 %v12413_v56, 16 }
 0x13b   : > { %10210 = vmatpush3.bf16.msra.mxu0 %v2548_v12  ;;  %10177 = vmatprep.mubr.msk.bf16.mxu0 %vm531_vm2, %v2100_v23  ;;  %v2116_v12 = vsel %vm2093_vm5, %v2113_v11, %v2115_v15  ;;  %v2117_v23 = vrot.slane %v12332_v50, 2  ;;  %v15139_v50 = vshrl.u32 %v12354_v16, 16 }
 0x13c   : > { %11433 = vmatprep.subr.msk.bf16.mxu0 %vm586_vm0, %v12432_v33 }
 0x13d   : > { %v2118_v2 = vsel %vm2093_vm5, %v2115_v15, %v2117_v23  ;;  %v2411_v15 = vrot.slane %v2409_v17, 2  ;;  %v2468_v5 = vrot.slane %v15139_v50, 2 }
 0x142   : > { %10178 = vmatmul.mubr.msk.bf16.gmra.mrb[4].mxu0 %vm531_vm2, %v2102_v7  ;;  %v2120_v7 = vsel %vm2093_vm5, %v2117_v23, %v2119_v44  ;;  %v2417_v23 = vrot.slane %v1659_v59, 3  ;;  %v2424_v59 = vrot.slane %v1674_v31, 2  ;;  %v2432_v31 = vrot.slane %v1692_v32, 2 }
 0x143   : > { %10181 = vmatprep.mubr.msk.bf16.mxu0 %vm531_vm2, %v2104_v6  ;;  %v2121_v6 = vrot.slane %v12354_v16, 2  ;;  %v2437_v32 = vrot.slane %v1704_v57, 3 }
 0x145   : > { %v2122_v52 = vsel %vm2093_vm5, %v2119_v44, %v2121_v6  ;;  %v2129_v44 = vrot.slane %v12398_v36, 2  ;;  %v2438_v17 = vor.u32 %v2437_v32, %v2436_v25 }
 0x14a   : > { %10182 = vmatmul.mubr.msk.bf16.gmra.mrb[8].mxu0 %vm531_vm2, %v2106_v30  ;;  %v2124_v30 = vsel %vm2093_vm5, %v2121_v6, %v2123_v8  ;;  %v2420_v6 = vrot.slane %v1665_v45, 2  ;;  %v2429_v45 = vrot.slane %v1686_v20, 3 }
 0x14b   : > { %10185 = vmatprep.mubr.msk.bf16.mxu0 %vm531_vm2, %v2108_v47  ;;  %v2125_v47 = vrot.slane %v12376_v28, 2 }
 0x14c   : > { %v2430_v13 = vor.u32 %v2429_v45, %v2428_v61  ;;  %v2481_v45 = vrot.slane %v1803_v63, 3 }
 0x14d   : > { %v2128_v11 = vsel %vm2093_vm5, %v2125_v47, %v2127_v41 }
 0x152   : > { %10186 = vmatmul.mubr.msk.bf16.gmra.mrb[12].mxu0 %vm531_vm2, %v2110_v18  ;;  %v2412_v18 = vshll.u32 %v12413_v56, 16 }
 0x153   : > { %10189 = vmatprep.mubr.msk.bf16.mxu0 %vm531_vm2, %v2112_v14  ;;  %v2126_v14 = vsel %vm2093_vm5, %v2123_v8, %v2125_v47  ;;  %v2425_v8 = vrot.slane %v1677_v62, 3  ;;  %v2433_v62 = vrot.slane %v1695_v54, 3  ;;  %v12514_v47 = vld [vmem:[%s15033_s1 + $0xe] sm:$0x3] }
 0x155   : > { %v2434_v0 = vor.u32 %v2433_v62, %v2432_v31  ;;  %v12597_v62 = vld [vmem:[%s11681_s14 + $0x20] sm:$0xff]  }
 0x156   : > { %v2904_v63 = vshrl.u32 %v12597_v62, 16  ;;  %v2907_v32 = vshll.u32 %v12597_v62, 16 }
 0x157   : > { %v2435_v54 = vsel %vm2407_vm6, %v2430_v13, %v2434_v0 }
 0x15a   : > { %10190 = vmatmul.mubr.msk.bf16.gmra.mrb[16].mxu0 %vm531_vm2, %v2114_v19  ;;  %v2414_v19 = vrot.slane %v2412_v18, 3 }
 0x15b   : > { %10193 = vmatprep.mubr.msk.bf16.mxu0 %vm531_vm2, %v2116_v12  ;;  %v2416_v12 = vrot.slane %v1656_v60, 2  ;;  %v2421_v60 = vrot.slane %v1668_v42, 3  ;;  %v3120_v42 = vsel %vm586_vm0, %v12432_v33, 0  ;;  %v2440_v33 = vrot.slane %v1710_v34, 2 }
 0x15c   : > { %v2449_v34 = vrot.slane %v1731_v27, 3  ;;  %v2454_v27 = vor.u32 %v2453_v22, %v2452_v1 }
 0x15d   : > { %v2418_v56 = vor.u32 %v2417_v23, %v2416_v12  ;;  %v2422_v36 = vor.u32 %v2421_v60, %v2420_v6  ;;  %v2466_v23 = vor.u32 %v2465_v29, %v2464_v10 }
 0x15f   : > { %v2467_v38 = vsel %vm2407_vm6, %v2462_v26, %v2466_v23 }
 0x162   : > { %10194 = vmatmul.mubr.msk.bf16.gmra.mrb[20].mxu0 %vm531_vm2, %v2118_v2  ;;  %v2415_v2 = vor.u32 %v2414_v19, %v2411_v15  ;;  %v2458_v19 = vor.u32 %v2457_v4, %v2456_v48 }
 0x163   : > { %10197 = vmatprep.mubr.msk.bf16.mxu0 %vm531_vm2, %v2120_v7  ;;  %v2130_v7 = vsel %vm2093_vm5, %v2127_v41, %v2129_v44  ;;  %v2441_v41 = vrot.slane %v1713_v40, 3  ;;  %v2446_v40 = vor.u32 %v2445_v53, %v2444_v37  ;;  %v15140_v44 = vshll.u32 %v12354_v16, 16 }
 0x164   : > { %v2419_v39 = vsel %vm2407_vm6, %v2415_v2, %v2418_v56  ;;  %v2459_v49 = vsel %vm2407_vm6, %v2454_v27, %v2458_v19  ;;  %v2463_v21 = vsel %vm2407_vm6, %v2458_v19, %v2462_v26  ;;  %v2472_v2 = vrot.slane %v15141_v43, 2  ;;  %v12627_v19 = vld [vmem:[%s11681_s14 + $0x38] sm:$0xff]  }
 0x165   : > { %v2442_v18 = vor.u32 %v2441_v41, %v2440_v33  ;;  %v2469_v58 = vrot.slane %v15140_v44, 3  ;;  %v15143_v16 = vshrl.u32 %v12376_v28, 16  ;;  %v2906_v53 = vrot.slane %v2904_v63, 2 }
 0x166   : > { %v2931_v29 = vshrl.u32 %v12627_v19, 16  ;;  %v2934_v26 = vshll.u32 %v12627_v19, 16  ;;  %v3434_v43 = vsel %vm586_vm0, %v12514_v47, 0 }
 0x167   : > { %v2443_v57 = vsel %vm2407_vm6, %v2438_v17, %v2442_v18  ;;  %v2447_v15 = vsel %vm2407_vm6, %v2442_v18, %v2446_v40  ;;  %v2470_v6 = vor.u32 %v2469_v58, %v2468_v5  ;;  %v12606_v18 = vld [vmem:[%s11681_s14 + $0x28] sm:$0xff]  }
 0x168   : > { %v2933_v44 = vrot.slane %v2931_v29, 2  ;;  %v2936_v58 = vrot.slane %v2934_v26, 3 }
 0x16a   : > { %10198 = vmatmul.mubr.msk.bf16.gmra.mrb[24].mxu0 %vm531_vm2, %v2122_v52  ;;  %v2426_v52 = vor.u32 %v2425_v8, %v2424_v59  ;;  %v12582_v59 = vld [vmem:[%s11681_s14 + $0x1c] sm:$0xf]  ;;  %v2476_v8 = vrot.slane %v15143_v16, 2 }
 0x16b   : > { %10201 = vmatprep.mubr.msk.bf16.mxu0 %vm531_vm2, %v2124_v30  ;;  %v2423_v30 = vsel %vm2407_vm6, %v2418_v56, %v2422_v36  ;;  %v15142_v56 = vshll.u32 %v12362_v51, 16  ;;  %v15145_v51 = vshrl.u32 %v12384_v3, 16 }
 0x16c   : > { %v2427_v55 = vsel %vm2407_vm6, %v2422_v36, %v2426_v52  ;;  %v2431_v20 = vsel %vm2407_vm6, %v2426_v52, %v2430_v13  ;;  %v2471_v36 = vsel %vm2407_vm6, %v2466_v23, %v2470_v6  ;;  %v15144_v52 = vshll.u32 %v12376_v28, 16 }
 0x16d   : > { %v2480_v61 = vrot.slane %v15145_v51, 2 }
 0x16f   : > { %v2482_v13 = vor.u32 %v2481_v45, %v2480_v61  ;;  %v12680_v45 = vld [vmem:[%s11681_s14 + $0x58] sm:$0xff]  }
 0x172   : > { %10202 = vmatmul.mubr.msk.bf16.gmra.mrb[28].mxu0 %vm531_vm2, %v2126_v14  ;;  %v2439_v14 = vsel %vm2407_vm6, %v2434_v0, %v2438_v17 }
 0x173   : > { %10205 = vmatprep.mubr.msk.bf16.mxu0 %vm531_vm2, %v2128_v11  ;;  %v2450_v11 = vor.u32 %v2449_v34, %v2448_v9  ;;  %v12613_v9 = vld [vmem:[%s11681_s14 + $0x30] sm:$0xff]  }
 0x174   : > { %v2922_v22 = vshrl.u32 %v12613_v9, 16 }
 0x175   : > { %v2451_v24 = vsel %vm2407_vm6, %v2446_v40, %v2450_v11  ;;  %v2455_v12 = vsel %vm2407_vm6, %v2450_v11, %v2454_v27  ;;  %v2913_v40 = vshrl.u32 %v12606_v18, 16  ;;  %v2916_v11 = vshll.u32 %v12606_v18, 16 }
 0x176   : > { %v2924_v46 = vrot.slane %v2922_v22, 2 }
 0x177   : > { %v2915_v4 = vrot.slane %v2913_v40, 2  ;;  %v2918_v27 = vrot.slane %v2916_v11, 3 }
 0x179   : > { %v2919_v10 = vor.u32 %v2918_v27, %v2915_v4 }
 0x17a   : > { %10206 = vmatmul.mubr.msk.bf16.gmra.mrb[32].mxu0 %vm531_vm2, %v2130_v7  ;;  %v2473_v7 = vrot.slane %v15142_v56, 3 }
 0x17b   : > { %10211 = vmatprep.mubr.msk.bf16.mxu0 %vm531_vm2, %v2419_v39  ;;  %v2763_v39 = vld [vmem:[%s11681_s14 + $0x18] sm:$0xc] }
 0x17c   : > { %v2474_v60 = vor.u32 %v2473_v7, %v2472_v2  ;;  %v9162_v31 = vcombine.low %v2763_v39, %v12582_v59 }
 0x17e   : > { %v2896_v25 = vshrl.u32 %v9162_v31, 16  ;;  %v2899_v3 = vshll.u32 %v9162_v31, 16 }
 0x180   : > { %v2901_v37 = vrot.slane %v2899_v3, 3 }
 0x182   : > { %10212 = vmatmul.mubr.msk.bf16.vlgmr.msra.gmra.mrb[0].mxu0 %vm531_vm2, %v2423_v30  ;;  %v2477_v30 = vrot.slane %v15144_v52, 3 }
 0x183   : > { %10248 = vmatpush3.bf16.msra.mxu0 %v3120_v42  ;;  %10215 = vmatprep.mubr.msk.bf16.mxu0 %vm531_vm2, %v2427_v55  ;;  %v11501_v42 = vld [vmem:[%s11681_s14 + $0xa0] ss:$0 sps:$4 sm:$0x77]   ;;  %v2475_v55 = vsel %vm2407_vm6, %v2470_v6, %v2474_v60  ;;  %v12659_v6 = vld [vmem:[%s11681_s14 + $0x50] sm:$0xff]  }
 0x184   : > { %11434 = vmatprep.subr.msk.bf16.mxu0 %vm586_vm0, %v12514_v47  ;;  %v2478_v28 = vor.u32 %v2477_v30, %v2476_v8  ;;  %v2485_v0 = vshrl.u32 %v11501_v42, 16  ;;  %v2937_v47 = vor.u32 %v2936_v58, %v2933_v44  ;;  %v2961_v52 = vshll.u32 %v12659_v6, 16 }
 0x186   : > { %v2483_v33 = vsel %vm2407_vm6, %v2478_v28, %v2482_v13  ;;  %v2487_v41 = vrot.slane %v2485_v0, 2  ;;  %v2963_v31 = vrot.slane %v2961_v52, 3  ;;  %v2967_v0 = vshrl.u32 %v12680_v45, 16 }
 0x18a   : > { %10216 = vmatmul.mubr.msk.bf16.gmra.mrb[4].mxu0 %vm531_vm2, %v2431_v20  ;;  %v2488_v20 = vshll.u32 %v11501_v42, 16 }
 0x18b   : > { %10219 = vmatprep.mubr.msk.bf16.mxu0 %vm531_vm2, %v2435_v54  ;;  %v2479_v54 = vsel %vm2407_vm6, %v2474_v60, %v2478_v28  ;;  %v12664_v60 = vld [vmem:[%s15033_s1 + $0x10] sm:$0x3]  ;;  %v12688_v28 = vld [vmem:[%s11681_s14 + $0x60] sm:$0xff]  }
 0x18c   : > { %v2490_v17 = vrot.slane %v2488_v20, 3  ;;  %v2970_v20 = vshll.u32 %v12680_v45, 16  ;;  %v2976_v3 = vshrl.u32 %v12688_v28, 16 }
 0x18e   : > { %v2491_v34 = vor.u32 %v2490_v17, %v2487_v41  ;;  %v2969_v41 = vrot.slane %v2967_v0, 2  ;;  %v2972_v17 = vrot.slane %v2970_v20, 3 }
 0x190   : > { %v2492_v48 = vsel %vm2407_vm6, %v2482_v13, %v2491_v34  ;;  %v12710_v34 = vld [vmem:[%s11681_s14 + $0x70] sm:$0xff]  }
 0x191   : > { %v2994_v27 = vshrl.u32 %v12710_v34, 16 }
 0x192   : > { %10220 = vmatmul.mubr.msk.bf16.gmra.mrb[8].mxu0 %vm531_vm2, %v2439_v14  ;;  %v2898_v14 = vrot.slane %v2896_v25, 2 }
 0x193   : > { %10223 = vmatprep.mubr.msk.bf16.mxu0 %vm531_vm2, %v2443_v57  ;;  %v2909_v57 = vrot.slane %v2907_v32, 3  ;;  %v2996_v44 = vrot.slane %v2994_v27, 2 }
 0x195   : > { %v2910_v1 = vor.u32 %v2909_v57, %v2906_v53  ;;  %v2978_v53 = vrot.slane %v2976_v3, 2 }
 0x197   : > { %v2920_v5 = vsel %vm2407_vm6, %v2910_v1, %v2919_v10 }
 0x19a   : > { %10224 = vmatmul.mubr.msk.bf16.gmra.mrb[12].mxu0 %vm531_vm2, %v2447_v15  ;;  %v2902_v15 = vor.u32 %v2901_v37, %v2898_v14  ;;  %v12702_v14 = vld [vmem:[%s11681_s14 + $0x68] sm:$0xff]  }
 0x19b   : > { %10227 = vmatprep.mubr.msk.bf16.mxu0 %vm531_vm2, %v2451_v24  ;;  %v2925_v24 = vshll.u32 %v12613_v9, 16 }
 0x19d   : > { %v2927_v35 = vrot.slane %v2925_v24, 3 }
 0x19f   : > { %v2928_v23 = vor.u32 %v2927_v35, %v2924_v46 }
 0x1a1   : > { %v2929_v2 = vsel %vm2407_vm6, %v2919_v10, %v2928_v23  ;;  %v2938_v30 = vsel %vm2407_vm6, %v2928_v23, %v2937_v47  ;;  %v12724_v23 = vld [vmem:[%s11681_s14 + $0x78] sm:$0xff]  }
 0x1a2   : > { %10228 = vmatmul.mubr.msk.bf16.gmra.mrb[16].mxu0 %vm531_vm2, %v2455_v12  ;;  %v2911_v12 = vsel %vm2407_vm6, %v2902_v15, %v2910_v1  ;;  %v2973_v15 = vor.u32 %v2972_v17, %v2969_v41  ;;  %v2985_v1 = vshrl.u32 %v12702_v14, 16 }
 0x1a3   : > { %10231 = vmatprep.mubr.msk.bf16.mxu0 %vm531_vm2, %v2459_v49  ;;  %v12635_v49 = vld [vmem:[%s11681_s14 + $0x40] sm:$0xff]  }
 0x1a4   : > { %v2943_v50 = vshll.u32 %v12635_v49, 16  ;;  %v2987_v35 = vrot.slane %v2985_v1, 2 }
 0x1a6   : > { %v2945_v7 = vrot.slane %v2943_v50, 3 }
 0x1aa   : > { %10232 = vmatmul.mubr.msk.bf16.gmra.mrb[20].mxu0 %vm531_vm2, %v2463_v21  ;;  %v2940_v21 = vshrl.u32 %v12635_v49, 16 }
 0x1ab   : > { %10235 = vmatprep.mubr.msk.bf16.mxu0 %vm531_vm2, %v2467_v38  ;;  %v12649_v38 = vld [vmem:[%s11681_s14 + $0x48] sm:$0xff]  }
 0x1ac   : > { %v2942_v56 = vrot.slane %v2940_v21, 2  ;;  %v2949_v39 = vshrl.u32 %v12649_v38, 16  ;;  %v2952_v16 = vshll.u32 %v12649_v38, 16 }
 0x1ae   : > { %v2946_v8 = vor.u32 %v2945_v7, %v2942_v56  ;;  %v2951_v51 = vrot.slane %v2949_v39, 2  ;;  %v2954_v61 = vrot.slane %v2952_v16, 3  ;;  %v3003_v56 = vshrl.u32 %v12724_v23, 16 }
 0x1af   : > { %v3006_v7 = vshll.u32 %v12724_v23, 16 }
 0x1b0   : > { %v2947_v42 = vsel %vm2407_vm6, %v2937_v47, %v2946_v8  ;;  %v2955_v13 = vor.u32 %v2954_v61, %v2951_v51  ;;  %v3005_v61 = vrot.slane %v3003_v56, 2 }
 0x1b2   : > { %10236 = vmatmul.mubr.msk.bf16.gmra.mrb[24].mxu0 %vm531_vm2, %v2471_v36  ;;  %v2958_v36 = vshrl.u32 %v12659_v6, 16 }
 0x1b3   : > { %10239 = vmatprep.mubr.msk.bf16.mxu0 %vm531_vm2, %v2475_v55 }
 0x1b4   : > { %v2960_v55 = vrot.slane %v2958_v36, 2 }
 0x1b6   : > { %v2964_v25 = vor.u32 %v2963_v31, %v2960_v55  ;;  %v12746_v55 = vld [vmem:[%s11681_s14 + $0x88] sm:$0xff]  }
 0x1b7   : > { %v3021_v17 = vshrl.u32 %v12746_v55, 16 }
 0x1b8   : > { %v2965_v37 = vsel %vm2407_vm6, %v2955_v13, %v2964_v25  ;;  %v2974_v46 = vsel %vm2407_vm6, %v2964_v25, %v2973_v15 }
 0x1ba   : > { %10240 = vmatmul.mubr.msk.bf16.gmra.mrb[28].mxu0 %vm531_vm2, %v2479_v54  ;;  %v2979_v54 = vshll.u32 %v12688_v28, 16 }
 0x1bb   : > { %10243 = vmatprep.mubr.msk.bf16.mxu0 %vm531_vm2, %v2483_v33  ;;  %v2956_v33 = vsel %vm2407_vm6, %v2946_v8, %v2955_v13 }
 0x1bc   : > { %v2981_v57 = vrot.slane %v2979_v54, 3 }
 0x1be   : > { %v2982_v4 = vor.u32 %v2981_v57, %v2978_v53 }
 0x1c2   : > { %10244 = vmatmul.mubr.msk.bf16.gmra.mrb[32].mxu0 %vm531_vm2, %v2492_v48  ;;  %v2988_v48 = vshll.u32 %v12702_v14, 16 }
 0x1c3   : > { %10249 = vmatprep.mubr.msk.bf16.mxu0 %vm531_vm2, %v2911_v12  ;;  %v2997_v12 = vshll.u32 %v12710_v34, 16 }
 0x1c4   : > { %v2990_v10 = vrot.slane %v2988_v48, 3 }
 0x1c5   : > { %v2999_v58 = vrot.slane %v2997_v12, 3 }
 0x1c7   : > { %v3000_v47 = vor.u32 %v2999_v58, %v2996_v44 }
 0x1ca   : > { %10250 = vmatmul.mubr.msk.bf16.vlgmr.msra.gmra.mrb[0].mxu0 %vm531_vm2, %v2920_v5  ;;  %v2983_v5 = vsel %vm2407_vm6, %v2973_v15, %v2982_v4 }
 0x1cb   : > { %10286 = vmatpush3.bf16.msra.mxu0 %v3434_v43  ;;  %10253 = vmatprep.mubr.msk.bf16.mxu0 %vm531_vm2, %v2929_v2  ;;  %v12732_v43 = vld [vmem:[%s11681_s14 + $0x80] sm:$0xff]   ;;  %v2991_v2 = vor.u32 %v2990_v10, %v2987_v35  ;;  %v12768_v10 = vld [vmem:[%s11681_s14 + $0x98] sm:$0xff]  }
 0x1cc   : > { %11435 = vmatprep.subr.msk.bf16.mxu0 %vm586_vm0, %v12664_v60  ;;  %v3012_v8 = vshrl.u32 %v12732_v43, 16 }
 0x1cd   : > { %v2992_v51 = vsel %vm2407_vm6, %v2982_v4, %v2991_v2  ;;  %v3001_v31 = vsel %vm2407_vm6, %v2991_v2, %v3000_v47  ;;  %v12776_v2 = vld [vmem:[%s11681_s14 + $0xa0] sm:$0xff]  }
 0x1ce   : > { %v3014_v13 = vrot.slane %v3012_v8, 2 }
 0x1d2   : > { %10254 = vmatmul.mubr.msk.bf16.gmra.mrb[4].mxu0 %vm531_vm2, %v2938_v30  ;;  %v3015_v30 = vshll.u32 %v12732_v43, 16 }
 0x1d3   : > { %10257 = vmatprep.mubr.msk.bf16.mxu0 %vm531_vm2, %v2947_v42  ;;  %v3008_v42 = vrot.slane %v3006_v7, 3 }
 0x1d4   : > { %v3017_v25 = vrot.slane %v3015_v30, 3 }
 0x1d5   : > { %v3009_v41 = vor.u32 %v3008_v42, %v3005_v61  ;;  %v15074_v61 = vshll.u32 %v12768_v10, 16 }
 0x1d6   : > { %v3018_v53 = vor.u32 %v3017_v25, %v3014_v13  ;;  %v15075_v13 = vshll.u32 %v12776_v2, 16 }
 0x1d7   : > { %v3010_v4 = vsel %vm2407_vm6, %v3000_v47, %v3009_v41 }
 0x1da   : > { %10258 = vmatmul.mubr.msk.bf16.gmra.mrb[8].mxu0 %vm531_vm2, %v2956_v33  ;;  %v12754_v33 = vld [vmem:[%s11681_s14 + $0x90] sm:$0xff]  }
 0x1db   : > { %10261 = vmatprep.mubr.msk.bf16.mxu0 %vm531_vm2, %v2965_v37  ;;  %v3024_v37 = vshll.u32 %v12746_v55, 16  ;;  %v15078_v57 = vshrl.u32 %v12754_v33, 16  ;;  %v15073_v15 = vshll.u32 %v12754_v33, 16 }
 0x1dd   : > { %v3026_v35 = vrot.slane %v3024_v37, 3  ;;  %v3032_v44 = vrot.slane %v15078_v57, 2  ;;  %v3035_v58 = vrot.slane %v15073_v15, 3  ;;  %v12790_v15 = vld [vmem:[%s11681_s14 + $0xa8] ss:$0 sps:$4 sm:$0x77]  }
 0x1de   : > { %v335_v57 = vld [vmem:[%s15036_s4 + $0x78] sm:$0xff] }
 0x1df   : > { %v3036_v42 = vor.u32 %v3035_v58, %v3032_v44  ;;  %v3057_v44 = vshrl.u32 %v12790_v15, 16  ;;  %v3060_v58 = vshll.u32 %v12790_v15, 16 }
 0x1e2   : > { %10262 = vmatmul.mubr.msk.bf16.gmra.mrb[12].mxu0 %vm531_vm2, %v2974_v46  ;;  %v3023_v46 = vrot.slane %v3021_v17, 2 }
 0x1e3   : > { %10265 = vmatprep.mubr.msk.bf16.mxu0 %vm531_vm2, %v2983_v5  ;;  %v3019_v5 = vsel %vm2407_vm6, %v3009_v41, %v3018_v53 }
 0x1e4   : > { %v3027_v47 = vor.u32 %v3026_v35, %v3023_v46 }
 0x1e6   : > { %v3028_v25 = vsel %vm2407_vm6, %v3018_v53, %v3027_v47  ;;  %v3037_v46 = vsel %vm2407_vm6, %v3027_v47, %v3036_v42  ;;  %v333_v47 = vld [vmem:[%s15036_s4 + $0x68] sm:$0xff] }
 0x1ea   : > { %10266 = vmatmul.mubr.msk.bf16.gmra.mrb[16].mxu0 %vm531_vm2, %v2992_v51  ;;  %v15077_v51 = vshrl.u32 %v12768_v10, 16 }
 0x1eb   : > { %10269 = vmatprep.mubr.msk.bf16.mxu0 %vm531_vm2, %v3001_v31  ;;  %v15076_v31 = vshrl.u32 %v12776_v2, 16 }
 0x1ec   : > { %v3041_v41 = vrot.slane %v15077_v51, 2 }
 0x1ed   : > { %v3050_v35 = vrot.slane %v15076_v31, 2 }
 0x1f2   : > { %10270 = vmatmul.mubr.msk.bf16.gmra.mrb[20].mxu0 %vm531_vm2, %v3010_v4  ;;  %v3044_v4 = vrot.slane %v15074_v61, 3  ;;  %v11612_v61 = vmov 0  }
 0x1f3   : > { %10273 = vmatprep.mubr.msk.bf16.mxu0 %vm531_vm2, %v3019_v5  ;;  %v3053_v5 = vrot.slane %v15075_v13, 3  ;;  %11458 = vset.pattern.permute.xlu0 %v11612_v61  ;;  %310 = vst.msk [vmem:[#allocation2 + $0x8] sm:$0xf] %vm307_vm7, %v11612_v61  ;;  %311 = vst.msk [vmem:[#allocation2 + $0xc] sm:$0xf] %vm307_vm7, %v11612_v61  ;;  %v3062_v13 = vrot.slane %v3060_v58, 3 }
 0x1f4   : > { %v3045_v53 = vor.u32 %v3044_v4, %v3041_v41  ;;  %316 = vst.msk [vmem:[#allocation2 + $0xa4] sm:$0xf] %vm307_vm7, %v11612_v61  ;;  %317 = vst.msk [vmem:[#allocation2 + $0xa8] sm:$0xf] %vm307_vm7, %v11612_v61  ;;  %4156 = vperm.xlu0 %11458, %v333_v47   ;;  %11459 = vset.pattern.permute.xlu1 %v11612_v61  ;;  %v3335_v41 = vld [vmem:[%s11681_s14 + $0x18] sm:$0x8] }
 0x1f5   : > { %v12818_v51 = vcombine.low %v3335_v41, %v12582_v59  ;;  %4166 = vperm.xlu1 %11459, %v335_v57   ;;  %v336_v59 = vld [vmem:[%s15036_s4 + $0x80] sm:$0xff]  ;;  %v338_v57 = vld [vmem:[%s15036_s4 + $0x90] sm:$0xff]  ;;  %v3345_v47 = vrot.slane %v12606_v18, 3  ;;  %v3676_v18 = vrot.slane %v2931_v29, 3  ;;  %v3685_v29 = vrot.slane %v2952_v16, 4 }
 0x1f6   : > { %v3046_v4 = vsel %vm2407_vm6, %v3036_v42, %v3045_v53  ;;  %v340_v41 = vld [vmem:[%s15036_s4 + $0xa0] sm:$0xff]  ;;  %315 = vst.msk [vmem:[#allocation2 + $0xa0] sm:$0xc] %vm314_vm10, %v11612_v61 }
 0x1f7   : > { %313 = vst.msk [vmem:[#allocation2 + $0x10] sm:$0x3] %vm312_vm11, %v11612_v61 }
 0x1f9   : > { %4171 = vperm.xlu1 %11459, %v336_v59   ;;  %v343_v59 = vld [vmem:[%s15036_s4 + $0xb8] sm:$0xff] }
 0x1fa   : > { %10274 = vmatmul.mubr.msk.bf16.gmra.mrb[24].mxu0 %vm531_vm2, %v3028_v25  ;;  %v3054_v25 = vor.u32 %v3053_v5, %v3050_v35  ;;  %v334_v35 = vld [vmem:[%s15036_s4 + $0x70] sm:$0xff]  ;;  %v3343_v5 = vrot.slane %v12597_v62, 3 }
 0x1fb   : > { %10277 = vmatprep.mubr.msk.bf16.mxu0 %vm531_vm2, %v3037_v46  ;;  %v3059_v46 = vrot.slane %v3057_v44, 2  ;;  %4161 = vperm.xlu0 %11458, %v334_v35   ;;  %v337_v44 = vld [vmem:[%s15036_s4 + $0x88] sm:$0xff]  ;;  %v3796_v35 = vsel %vm586_vm0, %v12664_v60, 0  ;;  %v3351_v60 = vrot.slane %v12635_v49, 3  ;;  %v3688_v49 = vrot.slane %v2958_v36, 3 }
 0x1fc   : > { %v3055_v31 = vsel %vm2407_vm6, %v3045_v53, %v3054_v25  ;;  %v3342_v53 = vrot.slane %v12818_v51, 3  ;;  %v3697_v36 = vrot.slane %v2979_v54, 4 }
 0x1fd   : > { %v3063_v42 = vor.u32 %v3062_v13, %v3059_v46  ;;  %v339_v13 = vld [vmem:[%s15036_s4 + $0x98] sm:$0xff]  ;;  %4181 = vperm.xlu1 %11459, %v338_v57   ;;  %v3346_v46 = vsel %vm3341_vm8, %v3343_v5, %v3345_v47 }
 0x1ff   : > { %v3064_v58 = vsel %vm2407_vm6, %v3054_v25, %v3063_v42  ;;  %4176 = vperm.xlu0 %11458, %v337_v44   ;;  %v3347_v25 = vrot.slane %v12613_v9, 3  ;;  %v344_v44 = vld [vmem:[%s15036_s4 + $0xc0] sm:$0xff]  ;;  %v3680_v9 = vrot.slane %v2940_v21, 3  ;;  %v3689_v21 = vrot.slane %v2961_v52, 4 }
 0x201   : > { %4191 = vperm.xlu1 %11459, %v340_v41   ;;  %v3348_v42 = vsel %vm3341_vm8, %v3345_v47, %v3347_v25  ;;  %v347_v47 = vld [vmem:[%s15036_s4 + $0xd8] sm:$0xff]  ;;  %v3353_v41 = vrot.slane %v12649_v38, 3  ;;  %v3692_v38 = vrot.slane %v2967_v0, 3  ;;  %v3701_v0 = vrot.slane %v2988_v48, 4 }
 0x202   : > { %10278 = vmatmul.mubr.msk.bf16.gmra.mrb[28].mxu0 %vm531_vm2, %v3046_v4  ;;  %v341_v4 = vld [vmem:[%s15036_s4 + $0xa8] sm:$0xff] }
 0x203   : > { %10281 = vmatprep.mubr.msk.bf16.mxu0 %vm531_vm2, %v3055_v31  ;;  %v3344_v31 = vsel %vm3341_vm8, %v3342_v53, %v3343_v5  ;;  %4186 = vperm.xlu0 %11458, %v339_v13   ;;  %v342_v53 = vld [vmem:[%s15036_s4 + $0xb0] sm:$0xff]  ;;  %v3349_v5 = vrot.slane %v12627_v19, 3  ;;  %v3684_v19 = vrot.slane %v2949_v39, 3  ;;  %v3693_v39 = vrot.slane %v2970_v20, 4 }
 0x204   : > { %v346_v13 = vld [vmem:[%s15036_s4 + $0xd0] sm:$0xff] }
 0x205   : > { %4201 = vperm.xlu1 %11459, %v342_v53   ;;  %v3352_v57 = vsel %vm3341_vm8, %v3349_v5, %v3351_v60  ;;  %v350_v53 = vld [vmem:[%s15036_s4 + $0xf0] sm:$0xff]  ;;  %v3694_v52 = vor.u32 %v3693_v39, %v3692_v38  ;;  %v13122_v38 = vld [vmem:[%s15034_s2] sm:$0xf] }
 0x207   : > { %4196 = vperm.xlu0 %11458, %v341_v4   ;;  %v348_v4 = vld [vmem:[%s15036_s4 + $0xe0] sm:$0xff] }
 0x209   : > { %4211 = vperm.xlu1 %11459, %v344_v44   ;;  %v352_v44 = vld [vmem:[%s15036_s4 + $0x100] sm:$0xff] }
 0x20a   : > { %10282 = vmatmul.mubr.msk.bf16.gmra.mrb[32].mxu0 %vm531_vm2, %v3064_v58  ;;  %v345_v58 = vld [vmem:[%s15036_s4 + $0xc8] sm:$0xff] }
 0x20b   : > { %10287 = vmatprep.mubr.msk.bf16.mxu0 %vm531_vm2, %v3344_v31  ;;  %4206 = vperm.xlu0 %11458, %v343_v59   ;;  %v3350_v31 = vsel %vm3341_vm8, %v3347_v25, %v3349_v5  ;;  %v3355_v25 = vrot.slane %v12659_v6, 3  ;;  %v351_v59 = vld [vmem:[%s15036_s4 + $0xf8] sm:$0xff]  ;;  %v3357_v5 = vrot.slane %v12680_v45, 3  ;;  %v3696_v6 = vrot.slane %v2976_v3, 3 }
 0x20c   : > { %v3700_v45 = vrot.slane %v2985_v1, 3  ;;  %v3705_v3 = vrot.slane %v2997_v12, 4  ;;  %v3709_v1 = vrot.slane %v3006_v7, 4  ;;  %v3717_v7 = vrot.slane %v3024_v37, 4 }
 0x20d   : > { %4221 = vperm.xlu1 %11459, %v346_v13   ;;  %v354_v13 = vld [vmem:[%s15036_s4 + $0x110] sm:$0xff]  ;;  %v15149_v37 = vshll.u32 %v12768_v10, 16 }
 0x20e   : > { %v3702_v54 = vor.u32 %v3701_v0, %v3700_v45 }
 0x20f   : > { %4216 = vperm.xlu0 %11458, %v345_v58   ;;  %v353_v58 = vld [vmem:[%s15036_s4 + $0x108] sm:$0xff] }
 0x211   : > { %4231 = vperm.xlu1 %11459, %v348_v4   ;;  %v321_v4 = vld [vmem:[%s15036_s4 + $0x8] sm:$0xff] }
 0x212   : > { %10288 = vmatmul.mubr.msk.bf16.vlgmr.msra.gmra.mrb[0].mxu0 %vm531_vm2, %v3346_v46  ;;  %v349_v46 = vld [vmem:[%s15036_s4 + $0xe8] sm:$0xff] }
 0x213   : > { %10324 = vmatpush3.bf16.msra.mxu0 %v3796_v35  ;;  %10291 = vmatprep.mubr.msk.bf16.mxu0 %vm531_vm2, %v3348_v42  ;;  %v3354_v35 = vsel %vm3341_vm8, %v3351_v60, %v3353_v41  ;;  %v3356_v42 = vsel %vm3341_vm8, %v3353_v41, %v3355_v25  ;;  %v3359_v60 = vrot.slane %v12688_v28, 3  ;;  %v3361_v41 = vrot.slane %v12702_v14, 3 }
 0x214   : > { %4226 = vperm.xlu0 %11458, %v347_v47   ;;  %v320_v47 = vld [vmem:[%s15036_s4] sm:$0xff]  ;;  %v3704_v28 = vrot.slane %v2994_v27, 3  ;;  %v3708_v14 = vrot.slane %v3003_v56, 3  ;;  %v3713_v27 = vrot.slane %v3015_v30, 4 }
 0x215   : > { %4241 = vperm.xlu1 %11459, %v350_v53   ;;  %v323_v53 = vld [vmem:[%s15036_s4 + $0x18] sm:$0xff] }
 0x216   : > { %v3710_v12 = vor.u32 %v3709_v1, %v3708_v14 }
 0x218   : > { %4236 = vperm.xlu0 %11458, %v349_v46   ;;  %v322_v46 = vld [vmem:[%s15036_s4 + $0x10] sm:$0xff] }
 0x219   : > { %4251 = vperm.xlu1 %11459, %v352_v44   ;;  %v325_v44 = vld [vmem:[%s15036_s4 + $0x28] sm:$0xff] }
 0x21a   : > { %10292 = vmatmul.mubr.msk.bf16.gmra.mrb[4].mxu0 %vm531_vm2, %v3350_v31  ;;  %v3358_v31 = vsel %vm3341_vm8, %v3355_v25, %v3357_v5  ;;  %v3363_v25 = vrot.slane %v12710_v34, 3  ;;  %v3712_v34 = vrot.slane %v3012_v8, 3 }
 0x21b   : > { %10295 = vmatprep.mubr.msk.bf16.mxu0 %vm531_vm2, %v3352_v57  ;;  %v3360_v57 = vsel %vm3341_vm8, %v3357_v5, %v3359_v60  ;;  %v3365_v5 = vrot.slane %v12724_v23, 3  ;;  %v3716_v23 = vrot.slane %v3021_v17, 3  ;;  %v15148_v17 = vshrl.u32 %v12768_v10, 16 }
 0x21c   : > { %4246 = vperm.xlu0 %11458, %v351_v59   ;;  %v324_v59 = vld [vmem:[%s15036_s4 + $0x20] sm:$0xff] }
 0x21d   : > { %4261 = vperm.xlu1 %11459, %v354_v13   ;;  %v327_v13 = vld [vmem:[%s15036_s4 + $0x38] sm:$0xff] }
 0x220   : > { %4256 = vperm.xlu0 %11458, %v353_v58   ;;  %v326_v58 = vld [vmem:[%s15036_s4 + $0x30] sm:$0xff] }
 0x221   : > { %4096 = vperm.xlu1 %11459, %v321_v4   ;;  %v329_v4 = vld [vmem:[%s15036_s4 + $0x48] sm:$0xff] }
 0x222   : > { %10296 = vmatmul.mubr.msk.bf16.gmra.mrb[8].mxu0 %vm531_vm2, %v3354_v35  ;;  %v3362_v35 = vsel %vm3341_vm8, %v3359_v60, %v3361_v41  ;;  %v3367_v60 = vrot.slane %v12732_v43, 3  ;;  %v15146_v43 = vshrl.u32 %v12754_v33, 16 }
 0x223   : > { %10299 = vmatprep.mubr.msk.bf16.mxu0 %vm531_vm2, %v3356_v42  ;;  %v3364_v42 = vsel %vm3341_vm8, %v3361_v41, %v3363_v25  ;;  %v3369_v41 = vrot.slane %v12746_v55, 3  ;;  %v3724_v55 = vrot.slane %v15148_v17, 3 }
 0x224   : > { %4091 = vperm.xlu0 %11458, %v320_v47   ;;  %v328_v47 = vld [vmem:[%s15036_s4 + $0x40] sm:$0xff]  ;;  %v3720_v30 = vrot.slane %v15146_v43, 3 }
 0x225   : > { %4106 = vperm.xlu1 %11459, %v323_v53   ;;  %v331_v53 = vld [vmem:[%s15036_s4 + $0x58] sm:$0xff] }
 0x228   : > { %4101 = vperm.xlu0 %11458, %v322_v46   ;;  %v330_v46 = vld [vmem:[%s15036_s4 + $0x50] sm:$0xff] }
 0x229   : > { %4116 = vperm.xlu1 %11459, %v325_v44   ;;  %v3657_v44 = vshrl.u32 %v12818_v51, 16 }
 0x22a   : > { %10300 = vmatmul.mubr.msk.bf16.gmra.mrb[12].mxu0 %vm531_vm2, %v3358_v31  ;;  %v3366_v31 = vsel %vm3341_vm8, %v3363_v25, %v3365_v5  ;;  %v3371_v25 = vrot.slane %v12754_v33, 3 }
 0x22b   : > { %10303 = vmatprep.mubr.msk.bf16.mxu0 %vm531_vm2, %v3360_v57  ;;  %v3368_v57 = vsel %vm3341_vm8, %v3365_v5, %v3367_v60  ;;  %v3373_v5 = vrot.slane %v12768_v10, 3 }
 0x22c   : > { %4111 = vperm.xlu0 %11458, %v324_v59   ;;  %v332_v59 = vld [vmem:[%s15036_s4 + $0x60] sm:$0xff] }
 0x22d   : > { %4126 = vperm.xlu1 %11459, %v327_v13  }
 0x230   : > { %4121 = vperm.xlu0 %11458, %v326_v58   ;;  %v3660_v58 = vshll.u32 %v12818_v51, 16  ;;  %v3377_v51 = vrot.slane %v12790_v15, 3 }
 0x231   : > { %4136 = vperm.xlu1 %11459, %v329_v4   ;;  %v3664_v4 = vrot.slane %v2904_v63, 3  ;;  %v3669_v63 = vrot.slane %v2916_v11, 4 }
 0x232   : > { %10304 = vmatmul.mubr.msk.bf16.gmra.mrb[16].mxu0 %vm531_vm2, %v3362_v35  ;;  %v3370_v35 = vsel %vm3341_vm8, %v3367_v60, %v3369_v41  ;;  %v3375_v60 = vrot.slane %v12776_v2, 3 }
 0x233   : > { %10307 = vmatprep.mubr.msk.bf16.mxu0 %vm531_vm2, %v3364_v42  ;;  %v3372_v42 = vsel %vm3341_vm8, %v3369_v41, %v3371_v25  ;;  %v3662_v41 = vrot.slane %v3660_v58, 4 }
 0x234   : > { %4131 = vperm.xlu0 %11458, %v328_v47   ;;  %v3376_v13 = vsel %vm3341_vm8, %v3373_v5, %v3375_v60  ;;  %v3659_v47 = vrot.slane %v3657_v44, 3 }
 0x235   : > { %4146 = vperm.xlu1 %11459, %v331_v53   ;;  %v3668_v53 = vrot.slane %v2913_v40, 3  ;;  %v3677_v40 = vrot.slane %v2934_v26, 4 }
 0x237   : > { %v3670_v15 = vor.u32 %v3669_v63, %v3668_v53  ;;  %v3725_v63 = vrot.slane %v15149_v37, 4 }
 0x238   : > { %4141 = vperm.xlu0 %11458, %v330_v46   ;;  %v3665_v46 = vrot.slane %v2907_v32, 4  ;;  %v3672_v32 = vrot.slane %v2922_v22, 3  ;;  %v3681_v22 = vrot.slane %v2943_v50, 4  ;;  %v3686_v50 = vor.u32 %v3685_v29, %v3684_v19 }
 0x23a   : > { %10308 = vmatmul.mubr.msk.bf16.gmra.mrb[20].mxu0 %vm531_vm2, %v3366_v31  ;;  %v355_v31 = vld [vmem:[%s15036_s4 + $0x118] sm:$0xff]  ;;  %v3682_v44 = vor.u32 %v3681_v22, %v3680_v9 }
 0x23b   : > { %10311 = vmatprep.mubr.msk.bf16.mxu0 %vm531_vm2, %v3368_v57  ;;  %v3374_v57 = vsel %vm3341_vm8, %v3371_v25, %v3373_v5  ;;  %4266 = vperm.xlu1 %11459, %v355_v31   ;;  %v3378_v25 = vsel %vm3341_vm8, %v3375_v60, %v3377_v51  ;;  %v3690_v31 = vor.u32 %v3689_v21, %v3688_v49  ;;  %v15147_v51 = vshll.u32 %v12754_v33, 16 }
 0x23c   : > { %4151 = vperm.xlu0 %11458, %v332_v59   ;;  %v3673_v59 = vrot.slane %v2925_v24, 4  ;;  %v3678_v24 = vor.u32 %v3677_v40, %v3676_v18  ;;  %v15150_v33 = vshrl.u32 %v12776_v2, 16 }
 0x23d   : > { %v3691_v16 = vsel %vm3655_vm9, %v3686_v50, %v3690_v31 }
 0x23e   : > { %v3674_v5 = vor.u32 %v3673_v59, %v3672_v32  ;;  %v3683_v26 = vsel %vm3655_vm9, %v3678_v24, %v3682_v44  ;;  %v3728_v59 = vrot.slane %v15150_v33, 3 }
 0x240   : > { %v3675_v11 = vsel %vm3655_vm9, %v3670_v15, %v3674_v5  ;;  %v3679_v58 = vsel %vm3655_vm9, %v3674_v5, %v3678_v24 }
 0x242   : > { %10312 = vmatmul.mubr.msk.bf16.gmra.mrb[24].mxu0 %vm531_vm2, %v3370_v35  ;;  %v3663_v35 = vor.u32 %v3662_v41, %v3659_v47  ;;  %v3695_v47 = vsel %vm3655_vm9, %v3690_v31, %v3694_v52  ;;  %v3706_v41 = vor.u32 %v3705_v3, %v3704_v28 }
 0x243   : > { %10315 = vmatprep.mubr.msk.bf16.mxu0 %vm531_vm2, %v3372_v42  ;;  %v3666_v42 = vor.u32 %v3665_v46, %v3664_v4  ;;  %v3714_v46 = vor.u32 %v3713_v27, %v3712_v34  ;;  %v13157_v34 = vld [vmem:[%s15037_s5] ss:$0 sm:$0xff]  ;;  %v4598_v27 = vld [vmem:[#allocation2 + $0xc] sm:$0xf] }
 0x244   : > { %v3707_v48 = vsel %vm3655_vm9, %v3702_v54, %v3706_v41  ;;  %v3711_v56 = vsel %vm3655_vm9, %v3706_v41, %v3710_v12 }
 0x245   : > { %v3667_v62 = vsel %vm3655_vm9, %v3663_v35, %v3666_v42  ;;  %v3671_v60 = vsel %vm3655_vm9, %v3666_v42, %v3670_v15  ;;  %v3715_v8 = vsel %vm3655_vm9, %v3710_v12, %v3714_v46  ;;  %v3721_v35 = vrot.slane %v15147_v51, 4  ;;  %v4597_v12 = vld [vmem:[#allocation2 + $0x8] sm:$0xf] }
 0x246   : > { %v3718_v42 = vor.u32 %v3717_v7, %v3716_v23  ;;  %v15151_v15 = vshll.u32 %v12776_v2, 16  ;;  %v9314_v51 = vcombine.low %v4597_v12, %v4598_v27 }
 0x248   : > { %v3719_v53 = vsel %vm3655_vm9, %v3714_v46, %v3718_v42  ;;  %v3729_v5 = vrot.slane %v15151_v15, 4  ;;  %v5010_v33 = vshll.u32 %v9314_v51, 16 }
 0x24a   : > { %10316 = vmatmul.mubr.msk.bf16.gmra.mrb[28].mxu0 %vm531_vm2, %v3374_v57  ;;  %v3687_v57 = vsel %vm3655_vm9, %v3682_v44, %v3686_v50 }
 0x24b   : > { %10319 = vmatprep.mubr.msk.bf16.mxu0 %vm531_vm2, %v3376_v13  ;;  %v3698_v13 = vor.u32 %v3697_v36, %v3696_v6 }
 0x24d   : > { %v3699_v20 = vsel %vm3655_vm9, %v3694_v52, %v3698_v13  ;;  %v3703_v4 = vsel %vm3655_vm9, %v3698_v13, %v3702_v54 }
 0x252   : > { %10320 = vmatmul.mubr.msk.bf16.gmra.mrb[32].mxu0 %vm531_vm2, %v3378_v25  ;;  %v3722_v25 = vor.u32 %v3721_v35, %v3720_v30 }
 0x253   : > { %10325 = vmatprep.mubr.msk.bf16.mxu0 %vm531_vm2, %v3667_v62  ;;  %v11522_v62 = vld [vmem:[%s11681_s14 + $0xa8] ss:$0 sps:$4 sm:$0xff]  }
 0x254   : > { %v3723_v32 = vsel %vm3655_vm9, %v3718_v42, %v3722_v25  ;;  %v3733_v18 = vshrl.u32 %v11522_v62, 16  ;;  %v3736_v40 = vshll.u32 %v11522_v62, 16 }
 0x256   : > { %v3735_v9 = vrot.slane %v3733_v18, 3  ;;  %v3738_v22 = vrot.slane %v3736_v40, 4 }
 0x258   : > { %v3739_v2 = vor.u32 %v3738_v22, %v3735_v9 }
 0x25a   : > { %10326 = vmatmul.mubr.msk.bf16.vlgmr.msra.gmra.mrb[0].mxu0 %vm531_vm2, %v3671_v60  ;;  %v3726_v60 = vor.u32 %v3725_v63, %v3724_v55  ;;  %v4635_v63 = vld [vmem:[#allocation2 + $0x8] sm:$0xe] }
 0x25b   : > { %10329 = vmatprep.mubr.msk.bf16.mxu0 %vm531_vm2, %v3675_v11  ;;  %v3730_v11 = vor.u32 %v3729_v5, %v3728_v59 }
 0x25c   : > { %v3727_v10 = vsel %vm3655_vm9, %v3722_v25, %v3726_v60 }
 0x25d   : > { %v3731_v24 = vsel %vm3655_vm9, %v3726_v60, %v3730_v11  ;;  %v3740_v44 = vsel %vm3655_vm9, %v3730_v11, %v3739_v2 }
 0x262   : > { %10330 = vmatmul.mubr.msk.bf16.gmra.mrb[4].mxu0 %vm531_vm2, %v3679_v58  ;;  %v9276_v58 = vld [vmem:[%s15034_s2 + $0x4] sm:$0xf] }
 0x263   : > { %10333 = vmatprep.mubr.msk.bf16.mxu0 %vm531_vm2, %v3683_v26  ;;  %11436 = vmatprep.subr.msk.bf16.mxu0 %vm4823_vm12, %v9276_v58  ;;  %v4825_v19 = vsel %vm4823_vm12, %v9276_v58, 0 }
 0x264   : > { %11437 = vmatprep.subr.msk.bf16.mxu1 %vm4823_vm12, %v9276_v58  ;;  %10362 = vmatpush3.bf16.msra.mxu0 %v4825_v19 }
 0x265   : > { %10742 = vmatpush3.bf16.msra.mxu1 %v4825_v19 }
 0x266   : > { %11438 = vmatprep.subr.msk.bf16.mxu1 %vm4823_vm12, %v13122_v38 }
 0x26a   : > { %10334 = vmatmul.mubr.msk.bf16.gmra.mrb[8].mxu0 %vm531_vm2, %v3687_v57 }
 0x26b   : > { %10337 = vmatprep.mubr.msk.bf16.mxu0 %vm531_vm2, %v3691_v16 }
 0x272   : > { %10338 = vmatmul.mubr.msk.bf16.gmra.mrb[12].mxu0 %vm531_vm2, %v3695_v47 }
 0x273   : > { %10341 = vmatprep.mubr.msk.bf16.mxu0 %vm531_vm2, %v3699_v20  ;;  %v13103_v29 = vpop.permute.xlu0 %4156 }
 0x274   : > { %v13105_v26 = vpop.permute.xlu1 %4166 }
 0x278   : > { %v13109_v61 = vpop.permute.xlu1 %4171 }
 0x27a   : > { %10342 = vmatmul.mubr.msk.bf16.gmra.mrb[16].mxu0 %vm531_vm2, %v3703_v4  ;;  %v13107_v49 = vpop.permute.xlu0 %4161 }
 0x27b   : > { %10345 = vmatprep.mubr.msk.bf16.mxu0 %vm531_vm2, %v3707_v48 }
 0x27c   : > { %v13113_v50 = vpop.permute.xlu1 %4181 }
 0x27e   : > { %v13111_v21 = vpop.permute.xlu0 %4176 }
 0x280   : > { %v13117_v57 = vpop.permute.xlu1 %4191 }
 0x282   : > { %10346 = vmatmul.mubr.msk.bf16.gmra.mrb[20].mxu0 %vm531_vm2, %v3711_v56  ;;  %v13115_v31 = vpop.permute.xlu0 %4186 }
 0x283   : > { %10349 = vmatprep.mubr.msk.bf16.mxu0 %vm531_vm2, %v3715_v8 }
 0x284   : > { %v13128_v16 = vpop.permute.xlu1 %4201 }
 0x286   : > { %v13124_v39 = vpop.permute.xlu0 %4196 }
 0x288   : > { %v13132_v36 = vpop.permute.xlu1 %4211 }
 0x28a   : > { %10350 = vmatmul.mubr.msk.bf16.gmra.mrb[24].mxu0 %vm531_vm2, %v3719_v53  ;;  %v13130_v6 = vpop.permute.xlu0 %4206 }
 0x28b   : > { %10353 = vmatprep.mubr.msk.bf16.mxu0 %vm531_vm2, %v3723_v32 }
 0x28c   : > { %v13136_v13 = vpop.permute.xlu1 %4221 }
 0x28e   : > { %v13134_v52 = vpop.permute.xlu0 %4216 }
 0x290   : > { %v13140_v45 = vpop.permute.xlu1 %4231 }
 0x292   : > { %10354 = vmatmul.mubr.msk.bf16.gmra.mrb[28].mxu0 %vm531_vm2, %v3727_v10  ;;  %v13163_v10 = vcombine.low %v4635_v63, %v4598_v27 }
 0x293   : > { %10357 = vmatprep.mubr.msk.bf16.mxu0 %vm531_vm2, %v3731_v24  ;;  %v13138_v47 = vpop.permute.xlu0 %4226 }
 0x294   : > { %v13144_v20 = vpop.permute.xlu1 %4241 }
 0x297   : > { %v13142_v0 = vpop.permute.xlu0 %4236 }
 0x298   : > { %v13148_v3 = vpop.permute.xlu1 %4251 }
 0x29a   : > { %10358 = vmatmul.mubr.msk.bf16.gmra.mrb[32].mxu0 %vm531_vm2, %v3740_v44  ;;  %v5008_v44 = vshrl.u32 %v9314_v51, 16 }
 0x29b   : > { %v13146_v28 = vpop.permute.xlu0 %4246 }
 0x29c   : > { %v13152_v41 = vpop.permute.xlu1 %4261 }
 0x29f   : > { %v13150_v54 = vpop.permute.xlu0 %4256 }
 0x2a0   : > { %v4097_v14 = vpop.permute.xlu1 %4096 }
 0x2a3   : > { %v4092_v4 = vpop.permute.xlu0 %4091 }
 0x2a4   : > { %v4107_v48 = vpop.permute.xlu1 %4106 }
 0x2a7   : > { %v4102_v1 = vpop.permute.xlu0 %4101 }
 0x2a8   : > { %v4117_v30 = vpop.permute.xlu1 %4116 }
 0x2ab   : > { %v4112_v7 = vpop.permute.xlu0 %4111 }
 0x2ac   : > { %v4127_v11 = vpop.permute.xlu1 %4126 }
 0x2af   : > { %v4122_v5 = vpop.permute.xlu0 %4121 }
 0x32d   : > { %v10327_v46 = vpop.f32.mrb[0].mxu0 }
 0x32e   : > { %v4019_v56 = vadd.f32 %v10327_v46, %v13157_v34  ;;  %v3832_v23 = vpop.f32.mrb[1].mxu0 }
 0x32f   : > { %v4017_v8 = vadd.f32 %v13157_v34, %v3832_v23  ;;  %v10328_v43 = vpop.f32.mrb[2].mxu0 }
 0x330   : > { %v4055_v35 = vmax.f32 %v4019_v56, 0.0  ;;  %v4020_v42 = vadd.f32 %v10328_v43, %v13157_v34  ;;  %v3835_v25 = vpop.f32.mrb[3].mxu0 }
 0x331   : > { %v4053_v53 = vmax.f32 %v4017_v8, 0.0  ;;  %v4018_v17 = vadd.f32 %v13157_v34, %v3835_v25 }
 0x332   : > { %v4056_v55 = vmax.f32 %v4020_v42, 0.0  ;;  %v4271_v37 = vmul.f32 %v4102_v1, %v4055_v35 }
 0x333   : > { %v4269_v62 = vmul.f32 %v4092_v4, %v4053_v53  ;;  %v4054_v32 = vmax.f32 %v4018_v17, 0.0  ;;  %v4132_v17 = vpop.permute.xlu0 %4131 }
 0x334   : > { %v9588_v59 = vpack.c.bf16 %v4271_v37, %v4271_v37  ;;  %v4272_v15 = vmul.f32 %v4107_v48, %v4056_v55  ;;  %v5012_v48 = vrot.slane %v5010_v33, 1  ;;  %v4731_v55 = vrot.slane %v13163_v10, 1  ;;  %v4137_v33 = vpop.permute.xlu1 %4136 }
 0x335   : > { %v9586_v60 = vpack.c.bf16 %v4269_v62, %v4269_v62  ;;  %v4270_v18 = vmul.f32 %v4097_v14, %v4054_v32  ;;  %v10331_v40 = vpop.f32.mrb[4].mxu0 }
 0x336   : > { %v4421_v9 = vrot.slane %v9588_v59, 6  ;;  %v9589_v22 = vpack.c.bf16 %v4272_v15, %v4272_v15  ;;  %v4023_v24 = vadd.f32 %v10331_v40, %v13157_v34  ;;  %v3848_v2 = vpop.f32.mrb[5].mxu0 }
 0x337   : > { %v4416_v19 = vrot.slane %v9586_v60, 6  ;;  %v9587_v4 = vpack.c.bf16 %v4270_v18, %v4270_v18  ;;  %v4021_v1 = vadd.f32 %v13157_v34, %v3848_v2  ;;  %v10332_v14 = vpop.f32.mrb[6].mxu0  ;;  %v13184_v60 = vsel %vm4823_vm12, %v13122_v38, 0 }
 0x338   : > { %v4423_v12 = vrot.slane %v4421_v9, 4  ;;  %v4424_v27 = vrot.slane %v9589_v22, 6  ;;  %v4059_v46 = vmax.f32 %v4023_v24, 0.0  ;;  %v4024_v56 = vadd.f32 %v10332_v14, %v13157_v34  ;;  %v3851_v23 = vpop.f32.mrb[7].mxu0 }
 0x339   : > { %v4417_v8 = vrot.slane %v4416_v19, 4  ;;  %4560 = vst.msk [vmem:[#allocation2 + $0x10] sm:$0xc] %vm314_vm10, %v4416_v19  ;;  %v4418_v43 = vrot.slane %v9587_v4, 6  ;;  %v4057_v51 = vmax.f32 %v4021_v1, 0.0  ;;  %v4022_v35 = vadd.f32 %v13157_v34, %v3851_v23 }
 0x33a   : > { %v4425_v42 = vsel %vm13167_vm14, %v4423_v12, %v4424_v27  ;;  %v4060_v25 = vmax.f32 %v4024_v56, 0.0  ;;  %v4275_v53 = vmul.f32 %v4122_v5, %v4059_v46  ;;  %v13186_v5 = vor.u32 %v5012_v48, %v5008_v44 }
 0x33b   : > { %v4419_v37 = vsel %vm13167_vm14, %v4417_v8, %v4418_v43  ;;  %v4420_v63 = vrot.slane %v4418_v43, 4  ;;  %4563 = vst.msk [vmem:[#allocation2 + $0x1c] sm:$0xf] %vm307_vm7, %v4425_v42  ;;  %v4273_v62 = vmul.f32 %v4112_v7, %v4057_v51  ;;  %v4058_v32 = vmax.f32 %v4022_v35, 0.0  ;;  %v4142_v8 = vpop.permute.xlu0 %4141 }
 0x33c   : > { %4561 = vst.msk [vmem:[#allocation2 + $0x14] sm:$0xf] %vm307_vm7, %v4419_v37  ;;  %v9592_v59 = vpack.c.bf16 %v4275_v53, %v4275_v53  ;;  %v4276_v15 = vmul.f32 %v4127_v11, %v4060_v25  ;;  %v5396_v7 = vshrl.u32 %v13163_v10, 16  ;;  %v5399_v38 = vshll.u32 %v13163_v10, 16  ;;  %v4147_v25 = vpop.permute.xlu1 %4146 }
 0x33d   : > { %v4422_v18 = vsel %vm13167_vm14, %v4420_v63, %v4421_v9  ;;  %v9590_v40 = vpack.c.bf16 %v4273_v62, %v4273_v62  ;;  %v4274_v22 = vmul.f32 %v4117_v30, %v4058_v32  ;;  %v10335_v24 = vpop.f32.mrb[8].mxu0  ;;  %v4426_v44 = vrot.slane %v4424_v27, 4 }
 0x33e   : > { %4562 = vst.msk [vmem:[#allocation2 + $0x18] sm:$0xf] %vm307_vm7, %v4422_v18  ;;  %v4433_v2 = vrot.slane %v9592_v59, 6  ;;  %v9593_v19 = vpack.c.bf16 %v4276_v15, %v4276_v15  ;;  %v4027_v11 = vadd.f32 %v10335_v24, %v13157_v34  ;;  %v3864_v4 = vpop.f32.mrb[9].mxu0  ;;  %v13202_v63 = vrot.slane %v5396_v7, 1 }
 0x33f   : > { %v4427_v1 = vrot.slane %v9590_v40, 6  ;;  %v9591_v14 = vpack.c.bf16 %v4274_v22, %v4274_v22  ;;  %v4025_v9 = vadd.f32 %v13157_v34, %v3864_v4  ;;  %v10336_v48 = vpop.f32.mrb[10].mxu0 }
 0x340   : > { %v4435_v30 = vrot.slane %v4433_v2, 4  ;;  %v4436_v12 = vrot.slane %v9593_v19, 6  ;;  %v4063_v46 = vmax.f32 %v4027_v11, 0.0  ;;  %v4028_v56 = vadd.f32 %v10336_v48, %v13157_v34  ;;  %v3867_v23 = vpop.f32.mrb[11].mxu0 }
 0x341   : > { %v4428_v43 = vsel %vm13167_vm14, %v4426_v44, %v4427_v1  ;;  %v4429_v51 = vrot.slane %v4427_v1, 4  ;;  %v4430_v35 = vrot.slane %v9591_v14, 6  ;;  %v4061_v42 = vmax.f32 %v4025_v9, 0.0 }
 0x342   : > { %4564 = vst.msk [vmem:[#allocation2 + $0x20] sm:$0xf] %vm307_vm7, %v4428_v43  ;;  %v4437_v27 = vsel %vm13167_vm14, %v4435_v30, %v4436_v12  ;;  %v4064_v53 = vmax.f32 %v4028_v56, 0.0  ;;  %v4026_v37 = vadd.f32 %v13157_v34, %v3867_v23  ;;  %v4279_v15 = vmul.f32 %v4142_v8, %v4063_v46 }
 0x343   : > { %v4431_v62 = vsel %vm13167_vm14, %v4429_v51, %v4430_v35  ;;  %v4432_v32 = vrot.slane %v4430_v35, 4  ;;  %4567 = vst.msk [vmem:[#allocation2 + $0x2c] sm:$0xf] %vm307_vm7, %v4437_v27  ;;  %v4277_v59 = vmul.f32 %v4132_v17, %v4061_v42  ;;  %v13207_v18 = vld [vmem:[#allocation2 + $0x10] sm:$0xff]   ;;  %v4438_v40 = vrot.slane %v4436_v12, 4  ;;  %v4152_v42 = vpop.permute.xlu0 %4151 }
 0x344   : > { %4565 = vst.msk [vmem:[#allocation2 + $0x24] sm:$0xf] %vm307_vm7, %v4431_v62  ;;  %v4062_v22 = vmax.f32 %v4026_v37, 0.0  ;;  %v4280_v24 = vmul.f32 %v4147_v25, %v4064_v53  ;;  %v13210_v19 = vrot.slane %v5399_v38, 2  ;;  %v9596_v4 = vpack.c.bf16 %v4279_v15, %v4279_v15 }
 0x345   : > { %v4434_v7 = vsel %vm13167_vm14, %v4432_v32, %v4433_v2  ;;  %v9594_v11 = vpack.c.bf16 %v4277_v59, %v4277_v59  ;;  %v10339_v44 = vpop.f32.mrb[12].mxu0  ;;  %v4732_v1 = vrot.slane %v13207_v18, 1  ;;  %v5015_v30 = vshll.u32 %v13207_v18, 16  ;;  %v13222_v23 = vld [vmem:[#allocation2 + $0x18] sm:$0xff]  }
 0x346   : > { %4566 = vst.msk [vmem:[#allocation2 + $0x28] sm:$0xf] %vm307_vm7, %v4434_v7  ;;  %v4278_v17 = vmul.f32 %v4137_v33, %v4062_v22  ;;  %v9597_v14 = vpack.c.bf16 %v4280_v24, %v4280_v24  ;;  %v4031_v9 = vadd.f32 %v10339_v44, %v13157_v34  ;;  %v3880_v48 = vpop.f32.mrb[13].mxu0  ;;  %v4445_v38 = vrot.slane %v9596_v4, 6 }
 0x347   : > { %v4439_v12 = vrot.slane %v9594_v11, 6  ;;  %v4029_v46 = vadd.f32 %v13157_v34, %v3880_v48  ;;  %v10340_v56 = vpop.f32.mrb[14].mxu0  ;;  %v4733_v2 = vsel %vm493_vm1, %v4731_v55, %v4732_v1  ;;  %v4734_v24 = vrot.slane %v13222_v23, 1 }
 0x348   : > { %v9595_v8 = vpack.c.bf16 %v4278_v17, %v4278_v17  ;;  %v4448_v43 = vrot.slane %v9597_v14, 6  ;;  %v4067_v33 = vmax.f32 %v4031_v9, 0.0  ;;  %v4032_v51 = vadd.f32 %v10340_v56, %v13157_v34  ;;  %v3883_v35 = vpop.f32.mrb[15].mxu0  ;;  %10363 = vmatprep.mubr.msk.bf16.mxu0 %vm4768_vm15, %v4733_v2 }
 0x349   : > { %v4440_v25 = vsel %vm13167_vm14, %v4438_v40, %v4439_v12  ;;  %v4441_v27 = vrot.slane %v4439_v12, 4  ;;  %v4447_v53 = vrot.slane %v4445_v38, 4  ;;  %v4065_v37 = vmax.f32 %v4029_v46, 0.0 }
 0x34a   : > { %4568 = vst.msk [vmem:[#allocation2 + $0x30] sm:$0xf] %vm307_vm7, %v4440_v25  ;;  %v4442_v10 = vrot.slane %v9595_v8, 6  ;;  %v4450_v55 = vrot.slane %v4448_v43, 4  ;;  %v4283_v62 = vmul.f32 %v13107_v49, %v4067_v33  ;;  %v4068_v32 = vmax.f32 %v4032_v51, 0.0 }
 0x34b   : > { %v4449_v59 = vsel %vm13167_vm14, %v4447_v53, %v4448_v43  ;;  %v4030_v15 = vadd.f32 %v13157_v34, %v3883_v35  ;;  %v4281_v22 = vmul.f32 %v4152_v42, %v4065_v37  ;;  %v13234_v7 = vld [vmem:[#allocation2 + $0x20] sm:$0xff]   ;;  %v4735_v14 = vsel %vm493_vm1, %v4732_v1, %v4734_v24 }
 0x34c   : > { %v4443_v40 = vsel %vm13167_vm14, %v4441_v27, %v4442_v10  ;;  %v4444_v11 = vrot.slane %v4442_v10, 4  ;;  %4571 = vst.msk [vmem:[#allocation2 + $0x3c] sm:$0xf] %vm307_vm7, %v4449_v59  ;;  %v9600_v4 = vpack.c.bf16 %v4283_v62, %v4283_v62  ;;  %v4284_v49 = vmul.f32 %v13105_v26, %v4068_v32  ;;  %10364 = vmatmul.mubr.msk.bf16.vlgmr.msra.gmra.mrb[36].mxu0 %vm4768_vm15, %v4735_v14 }
 0x34d   : > { %4569 = vst.msk [vmem:[#allocation2 + $0x34] sm:$0xf] %vm307_vm7, %v4443_v40  ;;  %v4066_v44 = vmax.f32 %v4030_v15, 0.0  ;;  %v9598_v17 = vpack.c.bf16 %v4281_v22, %v4281_v22  ;;  %v10343_v9 = vpop.f32.mrb[16].mxu0  ;;  %v4736_v48 = vrot.slane %v13234_v7, 1  ;;  %v13251_v35 = vld [vmem:[#allocation2 + $0x28] sm:$0xff]  }
 0x34e   : > { %v4446_v12 = vsel %vm13167_vm14, %v4444_v11, %v4445_v38  ;;  %v4457_v46 = vrot.slane %v9600_v4, 6  ;;  %v9601_v56 = vpack.c.bf16 %v4284_v49, %v4284_v49  ;;  %v4035_v2 = vadd.f32 %v10343_v9, %v13157_v34  ;;  %v3896_v8 = vpop.f32.mrb[17].mxu0 }
 0x34f   : > { %4570 = vst.msk [vmem:[#allocation2 + $0x38] sm:$0xf] %vm307_vm7, %v4446_v12  ;;  %v4282_v26 = vmul.f32 %v13103_v29, %v4066_v44  ;;  %v4451_v43 = vrot.slane %v9598_v17, 6  ;;  %v4033_v1 = vadd.f32 %v13157_v34, %v3896_v8  ;;  %v10344_v33 = vpop.f32.mrb[18].mxu0  ;;  %v4737_v51 = vsel %vm493_vm1, %v4734_v24, %v4736_v48 }
 0x350   : > { %v4459_v38 = vrot.slane %v4457_v46, 4  ;;  %v4460_v42 = vrot.slane %v9601_v56, 6  ;;  %v4071_v25 = vmax.f32 %v4035_v2, 0.0  ;;  %v4036_v27 = vadd.f32 %v10344_v33, %v13157_v34  ;;  %v3899_v53 = vpop.f32.mrb[19].mxu0  ;;  %10367 = vmatprep.mubr.msk.bf16.mxu0 %vm4768_vm15, %v4737_v51 }
 0x351   : > { %v9599_v37 = vpack.c.bf16 %v4282_v26, %v4282_v26  ;;  %v4452_v29 = vsel %vm13167_vm14, %v4450_v55, %v4451_v43  ;;  %v4453_v10 = vrot.slane %v4451_v43, 4  ;;  %v4069_v62 = vmax.f32 %v4033_v1, 0.0 }
 0x352   : > { %v4461_v32 = vsel %vm13167_vm14, %v4459_v38, %v4460_v42  ;;  %v4462_v59 = vrot.slane %v4460_v42, 4  ;;  %4572 = vst.msk [vmem:[#allocation2 + $0x40] sm:$0xf] %vm307_vm7, %v4452_v29  ;;  %v4287_v15 = vmul.f32 %v13113_v50, %v4071_v25  ;;  %v4072_v22 = vmax.f32 %v4036_v27, 0.0 }
 0x353   : > { %4575 = vst.msk [vmem:[#allocation2 + $0x4c] sm:$0xf] %vm307_vm7, %v4461_v32  ;;  %v4454_v24 = vrot.slane %v9599_v37, 6  ;;  %v4285_v40 = vmul.f32 %v13109_v61, %v4069_v62  ;;  %v4034_v11 = vadd.f32 %v13157_v34, %v3899_v53  ;;  %v4738_v55 = vrot.slane %v13251_v35, 1 }
 0x354   : > { %v9604_v4 = vpack.c.bf16 %v4287_v15, %v4287_v15  ;;  %v4288_v49 = vmul.f32 %v13115_v31, %v4072_v22  ;;  %v13268_v44 = vrot.slane %v5015_v30, 1  ;;  %v5019_v17 = vshrl.u32 %v13207_v18, 16  ;;  %v13276_v43 = vld [vmem:[#allocation2 + $0x30] sm:$0xff]  }
 0x355   : > { %v4456_v50 = vrot.slane %v4454_v24, 4  ;;  %v4455_v14 = vsel %vm13167_vm14, %v4453_v10, %v4454_v24  ;;  %v9602_v9 = vpack.c.bf16 %v4285_v40, %v4285_v40  ;;  %v4070_v12 = vmax.f32 %v4034_v11, 0.0  ;;  %v10347_v61 = vpop.f32.mrb[20].mxu0 }
 0x356   : > { %4573 = vst.msk [vmem:[#allocation2 + $0x44] sm:$0xf] %vm307_vm7, %v4455_v14  ;;  %v4469_v56 = vrot.slane %v9604_v4, 6  ;;  %v9605_v2 = vpack.c.bf16 %v4288_v49, %v4288_v49  ;;  %v4739_v8 = vsel %vm493_vm1, %v4736_v48, %v4738_v55  ;;  %v4039_v31 = vadd.f32 %v10347_v61, %v13157_v34  ;;  %v3912_v26 = vpop.f32.mrb[21].mxu0  ;;  %v13278_v1 = vld [vmem:[#allocation2 + $0x38] sm:$0xff]  }
 0x357   : > { %v4458_v33 = vsel %vm13167_vm14, %v4456_v50, %v4457_v46  ;;  %v4463_v51 = vrot.slane %v9602_v9, 6  ;;  %v4286_v38 = vmul.f32 %v13111_v21, %v4070_v12  ;;  %10368 = vmatmul.mubr.msk.bf16.gmra.mrb[40].mxu0 %vm4768_vm15, %v4739_v8  ;;  %v4037_v42 = vadd.f32 %v13157_v34, %v3912_v26  ;;  %v10348_v25 = vpop.f32.mrb[22].mxu0 }
 0x358   : > { %4574 = vst.msk [vmem:[#allocation2 + $0x48] sm:$0xf] %vm307_vm7, %v4458_v33  ;;  %v4471_v48 = vrot.slane %v4469_v56, 4  ;;  %v4472_v27 = vrot.slane %v9605_v2, 6  ;;  %v4075_v53 = vmax.f32 %v4039_v31, 0.0  ;;  %v4040_v37 = vadd.f32 %v10348_v25, %v13157_v34  ;;  %v3915_v29 = vpop.f32.mrb[23].mxu0 }
 0x359   : > { %v4464_v10 = vsel %vm13167_vm14, %v4462_v59, %v4463_v51  ;;  %v4465_v46 = vrot.slane %v4463_v51, 4  ;;  %v9603_v62 = vpack.c.bf16 %v4286_v38, %v4286_v38  ;;  %v4073_v32 = vmax.f32 %v4037_v42, 0.0 }
 0x35a   : > { %4576 = vst.msk [vmem:[#allocation2 + $0x50] sm:$0xf] %vm307_vm7, %v4464_v10  ;;  %v4473_v21 = vsel %vm13167_vm14, %v4471_v48, %v4472_v27  ;;  %v4474_v15 = vrot.slane %v4472_v27, 4  ;;  %v4291_v22 = vmul.f32 %v13128_v16, %v4075_v53  ;;  %v4076_v24 = vmax.f32 %v4040_v37, 0.0 }
 0x35b   : > { %4579 = vst.msk [vmem:[#allocation2 + $0x5c] sm:$0xf] %vm307_vm7, %v4473_v21  ;;  %v4466_v40 = vrot.slane %v9603_v62, 6  ;;  %v4289_v11 = vmul.f32 %v13117_v57, %v4073_v32  ;;  %v4038_v4 = vadd.f32 %v13157_v34, %v3915_v29  ;;  %v4740_v59 = vrot.slane %v13276_v43, 1 }
 0x35c   : > { %v9608_v49 = vpack.c.bf16 %v4291_v22, %v4291_v22  ;;  %v4292_v50 = vmul.f32 %v13130_v6, %v4076_v24  ;;  %v4742_v14 = vrot.slane %v13278_v1, 1  ;;  %v13302_v9 = vsel %vm770_vm3, %v13186_v5, %v13268_v44 }
 0x35d   : > { %v4467_v16 = vsel %vm13167_vm14, %v4465_v46, %v4466_v40  ;;  %v4468_v12 = vrot.slane %v4466_v40, 4  ;;  %v9606_v61 = vpack.c.bf16 %v4289_v11, %v4289_v11  ;;  %v4074_v57 = vmax.f32 %v4038_v4, 0.0  ;;  %v10351_v2 = vpop.f32.mrb[24].mxu0  ;;  %v13314_v48 = vld [vmem:[#allocation2 + $0x40] sm:$0xff]  }
 0x35e   : > { %4577 = vst.msk [vmem:[#allocation2 + $0x54] sm:$0xf] %vm307_vm7, %v4467_v16  ;;  %v4481_v8 = vrot.slane %v9608_v49, 6  ;;  %v9609_v31 = vpack.c.bf16 %v4292_v50, %v4292_v50  ;;  %v4741_v6 = vsel %vm493_vm1, %v4738_v55, %v4740_v59  ;;  %v4743_v26 = vsel %vm493_vm1, %v4740_v59, %v4742_v14  ;;  %v3928_v33 = vpop.f32.mrb[25].mxu0 }
 0x35f   : > { %v4470_v5 = vsel %vm13167_vm14, %v4468_v12, %v4469_v56  ;;  %v4475_v51 = vrot.slane %v9606_v61, 6  ;;  %v4290_v38 = vmul.f32 %v13124_v39, %v4074_v57  ;;  %10371 = vmatprep.mubr.msk.bf16.mxu0 %vm4768_vm15, %v4741_v6  ;;  %v4043_v42 = vadd.f32 %v10351_v2, %v13157_v34  ;;  %v10352_v25 = vpop.f32.mrb[26].mxu0  ;;  %v13320_v29 = vld [vmem:[#allocation2 + $0x48] sm:$0xff]  }
 0x360   : > { %4578 = vst.msk [vmem:[#allocation2 + $0x58] sm:$0xf] %vm307_vm7, %v4470_v5  ;;  %v4483_v27 = vrot.slane %v4481_v8, 4  ;;  %v4484_v55 = vrot.slane %v9609_v31, 6  ;;  %10372 = vmatmul.mubr.msk.bf16.gmra.mrb[44].mxu0 %vm4768_vm15, %v4743_v26  ;;  %v4041_v53 = vadd.f32 %v13157_v34, %v3928_v33  ;;  %v4044_v56 = vadd.f32 %v10352_v25, %v13157_v34  ;;  %v3931_v37 = vpop.f32.mrb[27].mxu0 }
 0x361   : > { %v4476_v39 = vsel %vm13167_vm14, %v4474_v15, %v4475_v51  ;;  %v4477_v10 = vrot.slane %v4475_v51, 4  ;;  %v9607_v46 = vpack.c.bf16 %v4290_v38, %v4290_v38  ;;  %v4079_v62 = vmax.f32 %v4043_v42, 0.0 }
 0x362   : > { %4580 = vst.msk [vmem:[#allocation2 + $0x60] sm:$0xf] %vm307_vm7, %v4476_v39  ;;  %v4485_v32 = vsel %vm13167_vm14, %v4483_v27, %v4484_v55  ;;  %v4486_v21 = vrot.slane %v4484_v55, 4  ;;  %v4077_v22 = vmax.f32 %v4041_v53, 0.0  ;;  %v4080_v24 = vmax.f32 %v4044_v56, 0.0 }
 0x363   : > { %4583 = vst.msk [vmem:[#allocation2 + $0x6c] sm:$0xf] %vm307_vm7, %v4485_v32  ;;  %v4478_v40 = vrot.slane %v9607_v46, 6  ;;  %v4295_v11 = vmul.f32 %v13136_v13, %v4079_v62  ;;  %v4042_v4 = vadd.f32 %v13157_v34, %v3931_v37  ;;  %v4744_v15 = vrot.slane %v13314_v48, 1 }
 0x364   : > { %v4293_v59 = vmul.f32 %v13132_v36, %v4077_v22  ;;  %v4296_v49 = vmul.f32 %v13138_v47, %v4080_v24  ;;  %v4746_v50 = vrot.slane %v13320_v29, 1  ;;  %v13337_v16 = vor.u32 %v5019_v17, %v13268_v44 }
 0x365   : > { %v4479_v12 = vsel %vm13167_vm14, %v4477_v10, %v4478_v40  ;;  %v4480_v61 = vrot.slane %v4478_v40, 4  ;;  %v9612_v13 = vpack.c.bf16 %v4295_v11, %v4295_v11  ;;  %v4078_v57 = vmax.f32 %v4042_v4, 0.0  ;;  %v10355_v2 = vpop.f32.mrb[28].mxu0  ;;  %v13349_v42 = vld [vmem:[#allocation2 + $0x50] sm:$0xff]  }
 0x366   : > { %4581 = vst.msk [vmem:[#allocation2 + $0x64] sm:$0xf] %vm307_vm7, %v4479_v12  ;;  %v9610_v31 = vpack.c.bf16 %v4293_v59, %v4293_v59  ;;  %v9613_v36 = vpack.c.bf16 %v4296_v49, %v4296_v49  ;;  %v4745_v47 = vsel %vm493_vm1, %v4742_v14, %v4744_v15  ;;  %v4747_v6 = vsel %vm493_vm1, %v4744_v15, %v4746_v50  ;;  %v3944_v26 = vpop.f32.mrb[29].mxu0 }
 0x367   : > { %v4482_v44 = vsel %vm13167_vm14, %v4480_v61, %v4481_v8  ;;  %v4493_v33 = vrot.slane %v9612_v13, 6  ;;  %v4294_v5 = vmul.f32 %v13134_v52, %v4078_v57  ;;  %10375 = vmatprep.mubr.msk.bf16.mxu0 %vm4768_vm15, %v4745_v47  ;;  %v4047_v51 = vadd.f32 %v10355_v2, %v13157_v34  ;;  %v10356_v38 = vpop.f32.mrb[30].mxu0  ;;  %v13355_v53 = vld [vmem:[#allocation2 + $0x58] sm:$0xff]  }
 0x368   : > { %4582 = vst.msk [vmem:[#allocation2 + $0x68] sm:$0xf] %vm307_vm7, %v4482_v44  ;;  %v4487_v25 = vrot.slane %v9610_v31, 6  ;;  %v4496_v14 = vrot.slane %v9613_v36, 6  ;;  %10376 = vmatmul.mubr.msk.bf16.gmra.mrb[48].mxu0 %vm4768_vm15, %v4747_v6  ;;  %v4045_v27 = vadd.f32 %v13157_v34, %v3944_v26  ;;  %v4048_v8 = vadd.f32 %v10356_v38, %v13157_v34  ;;  %v3947_v55 = vpop.f32.mrb[31].mxu0 }
 0x369   : > { %v4495_v52 = vrot.slane %v4493_v33, 4  ;;  %v9611_v56 = vpack.c.bf16 %v4294_v5, %v4294_v5  ;;  %v4083_v37 = vmax.f32 %v4047_v51, 0.0  ;;  %v4046_v39 = vadd.f32 %v13157_v34, %v3947_v55 }
 0x36a   : > { %v4488_v10 = vsel %vm13167_vm14, %v4486_v21, %v4487_v25  ;;  %v4489_v46 = vrot.slane %v4487_v25, 4  ;;  %v4498_v62 = vrot.slane %v4496_v14, 4  ;;  %v4081_v32 = vmax.f32 %v4045_v27, 0.0 }
 0x36b   : > { %4584 = vst.msk [vmem:[#allocation2 + $0x70] sm:$0xf] %vm307_vm7, %v4488_v10  ;;  %v4497_v22 = vsel %vm13167_vm14, %v4495_v52, %v4496_v14  ;;  %v4490_v24 = vrot.slane %v9611_v56, 6  ;;  %v4299_v40 = vmul.f32 %v13144_v20, %v4083_v37  ;;  %v4084_v11 = vmax.f32 %v4048_v8, 0.0  ;;  %v13374_v20 = vld [vmem:[%s15034_s2 + $0x8] sm:$0xf] }
 0x36c   : > { %4587 = vst.msk [vmem:[#allocation2 + $0x7c] sm:$0xf] %vm307_vm7, %v4497_v22  ;;  %v4297_v4 = vmul.f32 %v13140_v45, %v4081_v32  ;;  %v4082_v15 = vmax.f32 %v4046_v39, 0.0  ;;  %v4748_v59 = vrot.slane %v13349_v42, 1  ;;  %v4750_v21 = vrot.slane %v13355_v53, 1  ;;  %v4267_v22 = vpop.permute.xlu1 %4266 }
 0x36d   : > { %v4491_v49 = vsel %vm13167_vm14, %v4489_v46, %v4490_v24  ;;  %v4492_v12 = vrot.slane %v4490_v24, 4  ;;  %v9616_v61 = vpack.c.bf16 %v4299_v40, %v4299_v40  ;;  %v4300_v13 = vmul.f32 %v13146_v28, %v4084_v11  ;;  %v10359_v57 = vpop.f32.mrb[32].mxu0  ;;  %v13386_v51 = vld [vmem:[#allocation2 + $0x60] sm:$0xff]  }
 0x36e   : > { %4585 = vst.msk [vmem:[#allocation2 + $0x74] sm:$0xf] %vm307_vm7, %v4491_v49  ;;  %v9614_v45 = vpack.c.bf16 %v4297_v4, %v4297_v4  ;;  %v4298_v2 = vmul.f32 %v13142_v0, %v4082_v15  ;;  %v4749_v31 = vsel %vm493_vm1, %v4746_v50, %v4748_v59  ;;  %v4751_v36 = vsel %vm493_vm1, %v4748_v59, %v4750_v21  ;;  %v3960_v47 = vpop.f32.mrb[33].mxu0 }
 0x36f   : > { %v4494_v28 = vsel %vm13167_vm14, %v4492_v12, %v4493_v33  ;;  %v4505_v6 = vrot.slane %v9616_v61, 6  ;;  %v9617_v26 = vpack.c.bf16 %v4300_v13, %v4300_v13  ;;  %10379 = vmatprep.mubr.msk.bf16.mxu1 %vm4768_vm15, %v4749_v31  ;;  %v4051_v44 = vadd.f32 %v10359_v57, %v13157_v34  ;;  %v10360_v5 = vpop.f32.mrb[34].mxu0  ;;  %v13394_v52 = vld [vmem:[#allocation2 + $0x68] sm:$0xff]  }
 0x370   : > { %4586 = vst.msk [vmem:[#allocation2 + $0x78] sm:$0xf] %vm307_vm7, %v4494_v28  ;;  %v4499_v0 = vrot.slane %v9614_v45, 6  ;;  %v9615_v50 = vpack.c.bf16 %v4298_v2, %v4298_v2  ;;  %10380 = vmatmul.mubr.msk.bf16.vlgmr.msra.gmra.mrb[0].mxu1 %vm4768_vm15, %v4751_v36  ;;  %v4049_v38 = vadd.f32 %v13157_v34, %v3960_v47  ;;  %v4052_v25 = vadd.f32 %v10360_v5, %v13157_v34  ;;  %v3963_v33 = vpop.f32.mrb[35].mxu0 }
 0x371   : > { %v4507_v14 = vrot.slane %v4505_v6, 4  ;;  %v4508_v27 = vrot.slane %v9617_v26, 6  ;;  %10400 = vmatpush3.bf16.msra.mxu1 %v13184_v60  ;;  %v4087_v8 = vmax.f32 %v4051_v44, 0.0  ;;  %v4050_v55 = vadd.f32 %v13157_v34, %v3963_v33 }
 0x372   : > { %v4500_v56 = vsel %vm13167_vm14, %v4498_v62, %v4499_v0  ;;  %v4501_v37 = vrot.slane %v4499_v0, 4  ;;  %v4502_v39 = vrot.slane %v9615_v50, 6  ;;  %v4085_v10 = vmax.f32 %v4049_v38, 0.0  ;;  %11439 = vmatprep.subr.msk.bf16.mxu1 %vm4823_vm12, %v13374_v20 }
 0x373   : > { %4588 = vst.msk [vmem:[#allocation2 + $0x80] sm:$0xf] %vm307_vm7, %v4500_v56  ;;  %v4509_v46 = vsel %vm13167_vm14, %v4507_v14, %v4508_v27  ;;  %v4510_v60 = vrot.slane %v4508_v27, 4  ;;  %v4303_v32 = vmul.f32 %v13152_v41, %v4087_v8  ;;  %v4088_v34 = vmax.f32 %v4052_v25, 0.0 }
 0x374   : > { %4591 = vst.msk [vmem:[#allocation2 + $0x8c] sm:$0xf] %vm307_vm7, %v4509_v46  ;;  %v4503_v62 = vsel %vm13167_vm14, %v4501_v37, %v4502_v39  ;;  %v4504_v24 = vrot.slane %v4502_v39, 4  ;;  %v4301_v40 = vmul.f32 %v13148_v3, %v4085_v10  ;;  %v4086_v11 = vmax.f32 %v4050_v55, 0.0 }
 0x375   : > { %4589 = vst.msk [vmem:[#allocation2 + $0x84] sm:$0xf] %vm307_vm7, %v4503_v62  ;;  %v9620_v4 = vpack.c.bf16 %v4303_v32, %v4303_v32  ;;  %v4304_v15 = vmul.f32 %v4267_v22, %v4088_v34  ;;  %v4752_v59 = vrot.slane %v13386_v51, 1  ;;  %v4754_v49 = vrot.slane %v13394_v52, 1  ;;  %v13411_v41 = vld [vmem:[#allocation2 + $0x70] sm:$0xff]  }
 0x376   : > { %v4506_v12 = vsel %vm13167_vm14, %v4504_v24, %v4505_v6  ;;  %v9618_v61 = vpack.c.bf16 %v4301_v40, %v4301_v40  ;;  %v4302_v13 = vmul.f32 %v13150_v54, %v4086_v11  ;;  %v5023_v57 = vshll.u32 %v13222_v23, 16 }
 0x377   : > { %4590 = vst.msk [vmem:[#allocation2 + $0x88] sm:$0xf] %vm307_vm7, %v4506_v12  ;;  %v4517_v3 = vrot.slane %v9620_v4, 6  ;;  %v9621_v45 = vpack.c.bf16 %v4304_v15, %v4304_v15  ;;  %v4753_v2 = vsel %vm493_vm1, %v4750_v21, %v4752_v59  ;;  %v4755_v31 = vsel %vm493_vm1, %v4752_v59, %v4754_v49  ;;  %v13422_v36 = vld [vmem:[#allocation2 + $0x78] sm:$0xff]  }
 0x378   : > { %v4511_v47 = vrot.slane %v9618_v61, 6  ;;  %v9619_v28 = vpack.c.bf16 %v4302_v13, %v4302_v13  ;;  %10383 = vmatprep.mubr.msk.bf16.mxu1 %vm4768_vm15, %v4753_v2  ;;  %v4756_v54 = vrot.slane %v13411_v41, 1  ;;  %v5025_v6 = vrot.slane %v5023_v57, 1 }
 0x379   : > { %v4519_v26 = vrot.slane %v4517_v3, 4  ;;  %v4520_v44 = vrot.slane %v9621_v45, 6  ;;  %10384 = vmatmul.mubr.msk.bf16.gmra.mrb[4].mxu1 %vm4768_vm15, %v4755_v31  ;;  %v4758_v5 = vrot.slane %v13422_v36, 1  ;;  %v5027_v21 = vshrl.u32 %v13222_v23, 16 }
 0x37a   : > { %v4512_v0 = vsel %vm13167_vm14, %v4510_v60, %v4511_v47  ;;  %v4513_v50 = vrot.slane %v4511_v47, 4  ;;  %v4514_v38 = vrot.slane %v9619_v28, 6  ;;  %v4757_v25 = vsel %vm493_vm1, %v4754_v49, %v4756_v54 }
 0x37b   : > { %4592 = vst.msk [vmem:[#allocation2 + $0x90] sm:$0xf] %vm307_vm7, %v4512_v0  ;;  %v4521_v33 = vsel %vm13167_vm14, %v4519_v26, %v4520_v44  ;;  %v4522_v14 = vrot.slane %v4520_v44, 4  ;;  %10387 = vmatprep.mubr.msk.bf16.mxu1 %vm4768_vm15, %v4757_v25  ;;  %v4759_v27 = vsel %vm493_vm1, %v4756_v54, %v4758_v5  ;;  %v13441_v8 = vsel %vm770_vm3, %v13337_v16, %v5025_v6 }
 0x37c   : > { %4595 = vst.msk [vmem:[#allocation2 + $0x9c] sm:$0xf] %vm307_vm7, %v4521_v33  ;;  %v4515_v55 = vsel %vm13167_vm14, %v4513_v50, %v4514_v38  ;;  %v4516_v56 = vrot.slane %v4514_v38, 4  ;;  %v13446_v37 = vld [vmem:[#allocation2 + $0x80] sm:$0xff]   ;;  %v5029_v39 = vor.u32 %v5027_v21, %v5025_v6  ;;  %v5031_v10 = vshll.u32 %v13234_v7, 16 }
 0x37d   : > { %4596 = vst.msk [vmem:[#allocation2 + $0xa0] sm:$0x3] %vm312_vm11, %v4522_v14  ;;  %v13451_v46 = vrot.slane %v5027_v21, 1  ;;  %v5035_v16 = vshrl.u32 %v13234_v7, 16  ;;  %v5039_v60 = vshll.u32 %v13251_v35, 16  ;;  %v5043_v32 = vshrl.u32 %v13251_v35, 16 }
 0x37e   : > { %4593 = vst.msk [vmem:[#allocation2 + $0x94] sm:$0xf] %vm307_vm7, %v4515_v55  ;;  %v4518_v34 = vsel %vm13167_vm14, %v4516_v56, %v4517_v3  ;;  %v4760_v22 = vrot.slane %v13446_v37, 1  ;;  %v13459_v62 = vld [vmem:[#allocation2 + $0x88] sm:$0xff]   ;;  %v5033_v24 = vrot.slane %v5031_v10, 1  ;;  %v5047_v40 = vshll.u32 %v13276_v43, 16 }
 0x37f   : > { %4594 = vst.msk [vmem:[#allocation2 + $0x98] sm:$0xf] %vm307_vm7, %v4518_v34  ;;  %v5041_v11 = vrot.slane %v5039_v60, 1  ;;  %v5051_v4 = vshrl.u32 %v13276_v43, 16  ;;  %v5055_v15 = vshll.u32 %v13278_v1, 16  ;;  %v5059_v58 = vshrl.u32 %v13278_v1, 16 }
 0x380   : > { %v4761_v59 = vsel %vm493_vm1, %v4758_v5, %v4760_v22  ;;  %v4762_v49 = vrot.slane %v13459_v62, 1  ;;  %v13473_v12 = vsel %vm770_vm3, %v5029_v39, %v5033_v24  ;;  %v5037_v61 = vor.u32 %v5035_v16, %v5033_v24 }
 0x381   : > { %10388 = vmatmul.mubr.msk.bf16.gmra.mrb[8].mxu1 %vm4768_vm15, %v4759_v27  ;;  %v5045_v13 = vor.u32 %v5043_v32, %v5041_v11  ;;  %v5049_v3 = vrot.slane %v5047_v40, 1  ;;  %v5057_v45 = vrot.slane %v5055_v15, 1  ;;  %v15090_v2 = vshll.u32 %v13314_v48, 16 }
 0x382   : > { %10391 = vmatprep.mubr.msk.bf16.mxu1 %vm4768_vm15, %v4761_v59  ;;  %v13487_v31 = vsel %vm770_vm3, %v5037_v61, %v5041_v11  ;;  %v5067_v47 = vshrl.u32 %v13314_v48, 16  ;;  %v15085_v28 = vshll.u32 %v13320_v29, 16  ;;  %v15088_v0 = vshrl.u32 %v13320_v29, 16 }
 0x383   : > { %v13492_v54 = vsel %vm770_vm3, %v5045_v13, %v5049_v3  ;;  %v5053_v6 = vor.u32 %v5051_v4, %v5049_v3  ;;  %v5061_v26 = vor.u32 %v5059_v58, %v5057_v45  ;;  %v5065_v44 = vrot.slane %v15090_v2, 1 }
 0x384   : > { %v5073_v21 = vrot.slane %v15085_v28, 1  ;;  %v15079_v50 = vshll.u32 %v13349_v42, 16  ;;  %v15082_v14 = vshrl.u32 %v13349_v42, 16  ;;  %v4763_v27 = vsel %vm493_vm1, %v4760_v22, %v4762_v49 }
 0x385   : > { %v13500_v5 = vld [vmem:[#allocation2 + $0x90] sm:$0xff]   ;;  %v13507_v38 = vsel %vm770_vm3, %v5053_v6, %v5057_v45  ;;  %v13510_v25 = vsel %vm770_vm3, %v5061_v26, %v5065_v44  ;;  %v5069_v33 = vor.u32 %v5067_v47, %v5065_v44  ;;  %v5402_v34 = vor.u32 %v13210_v19, %v13202_v63  ;;  %v13650_v19 = vld [vmem:[%s15034_s2 + $0xc] sm:$0xf] }
 0x386   : > { %v4764_v55 = vrot.slane %v13500_v5, 1  ;;  %v11541_v56 = vld [vmem:[#allocation2 + $0x98] ss:$0 sps:$4 sm:$0x11]   ;;  %v5077_v39 = vor.u32 %v15088_v0, %v5073_v21  ;;  %v5081_v11 = vrot.slane %v15079_v50, 1  ;;  %v15080_v59 = vshll.u32 %v13355_v53, 16 }
 0x387   : > { %v13522_v24 = vsel %vm770_vm3, %v5069_v33, %v5073_v21  ;;  %v15084_v61 = vshrl.u32 %v13355_v53, 16  ;;  %v4766_v13 = vrot.slane %v11541_v56, 1  ;;  %v15081_v3 = vshll.u32 %v13386_v51, 16 }
 0x388   : > { %v4765_v22 = vsel %vm493_vm1, %v4762_v49, %v4764_v55  ;;  %v15087_v45 = vshrl.u32 %v13386_v51, 16  ;;  %v13533_v6 = vsel %vm770_vm3, %v5077_v39, %v5081_v11  ;;  %v5085_v26 = vor.u32 %v15082_v14, %v5081_v11 }
 0x389   : > { %10392 = vmatmul.mubr.msk.bf16.gmra.mrb[12].mxu1 %vm4768_vm15, %v4763_v27  ;;  %v5089_v44 = vrot.slane %v15080_v59, 1  ;;  %v15083_v21 = vshll.u32 %v13394_v52, 16  ;;  %v4767_v49 = vsel %vm493_vm1, %v4764_v55, %v4766_v13  ;;  %v5097_v33 = vrot.slane %v15081_v3, 1 }
 0x38a   : > { %10395 = vmatprep.mubr.msk.bf16.mxu1 %vm4768_vm15, %v4765_v22  ;;  %v15089_v27 = vshrl.u32 %v13394_v52, 16  ;;  %v15086_v39 = vshll.u32 %v13411_v41, 16  ;;  %v15092_v22 = vshrl.u32 %v13411_v41, 16  ;;  %v15091_v3 = vshll.u32 %v13422_v36, 16 }
 0x38b   : > { %v13547_v50 = vsel %vm770_vm3, %v5085_v26, %v5089_v44  ;;  %v5093_v11 = vor.u32 %v15084_v61, %v5089_v44  ;;  %v5105_v59 = vrot.slane %v15083_v21, 1  ;;  %v5101_v55 = vor.u32 %v15087_v45, %v5097_v33 }
 0x38c   : > { %v5113_v13 = vrot.slane %v15086_v39, 1  ;;  %v5123_v14 = vshrl.u32 %v13422_v36, 16  ;;  %v15093_v21 = vshll.u32 %v13446_v37, 16  ;;  %v15095_v61 = vshrl.u32 %v13446_v37, 16 }
 0x38d   : > { %v13561_v26 = vsel %vm770_vm3, %v5093_v11, %v5097_v33  ;;  %v5109_v44 = vor.u32 %v15089_v27, %v5105_v59  ;;  %v13568_v28 = vsel %vm770_vm3, %v5101_v55, %v5105_v59  ;;  %v5121_v45 = vrot.slane %v15091_v3, 1 }
 0x38e   : > { %v5117_v39 = vor.u32 %v15092_v22, %v5113_v13  ;;  %v15094_v0 = vshll.u32 %v13459_v62, 16  ;;  %v5129_v11 = vrot.slane %v15093_v21, 1  ;;  %v5139_v27 = vshrl.u32 %v13459_v62, 16 }
 0x38f   : > { %v13576_v33 = vsel %vm770_vm3, %v5109_v44, %v5113_v13  ;;  %v15096_v2 = vshll.u32 %v13500_v5, 16  ;;  %v5125_v55 = vor.u32 %v5123_v14, %v5121_v45  ;;  %v5147_v22 = vshrl.u32 %v13500_v5, 16 }
 0x390   : > { %v13583_v59 = vsel %vm770_vm3, %v5117_v39, %v5121_v45  ;;  %v5137_v3 = vrot.slane %v15094_v0, 1  ;;  %v5133_v13 = vor.u32 %v15095_v61, %v5129_v11  ;;  %v5151_v21 = vshll.u32 %v11541_v56, 16 }
 0x391   : > { %10396 = vmatmul.mubr.msk.bf16.gmra.mrb[16].mxu1 %vm4768_vm15, %v4767_v49  ;;  %v5145_v44 = vrot.slane %v15096_v2, 1  ;;  %v5403_v39 = vrot.slane %v5019_v17, 1  ;;  %v13600_v45 = vsel %vm770_vm3, %v5125_v55, %v5129_v11  ;;  %v5404_v49 = vrot.slane %v5015_v30, 2 }
 0x392   : > { %10401 = vmatprep.mubr.msk.bf16.mxu1 %vm4768_vm15, %v13302_v9  ;;  %v5141_v0 = vor.u32 %v5139_v27, %v5137_v3  ;;  %v5408_v61 = vrot.slane %v5023_v57, 2  ;;  %v5535_v56 = vsel %vm4823_vm12, %v13374_v20, 0  ;;  %v13611_v17 = vsel %vm770_vm3, %v5133_v13, %v5137_v3 }
 0x393   : > { %v5149_v9 = vor.u32 %v5147_v22, %v5145_v44  ;;  %v5153_v11 = vrot.slane %v5151_v21, 1  ;;  %v5405_v2 = vor.u32 %v5404_v49, %v5403_v39  ;;  %v5411_v30 = vrot.slane %v5035_v16, 1 }
 0x394   : > { %v13616_v55 = vsel %vm770_vm3, %v5141_v0, %v5145_v44  ;;  %v5409_v18 = vor.u32 %v5408_v61, %v13451_v46  ;;  %v5412_v20 = vrot.slane %v5031_v10, 2  ;;  %v5415_v57 = vrot.slane %v5043_v32, 1 }
 0x395   : > { %v13622_v23 = vsel %vm770_vm3, %v5149_v9, %v5153_v11  ;;  %v5416_v3 = vrot.slane %v5039_v60, 2  ;;  %v13634_v46 = vsel %vm1159_vm4, %v5402_v34, %v5405_v2  ;;  %v5419_v0 = vrot.slane %v5051_v4, 1 }
 0x396   : > { %v13637_v16 = vsel %vm1159_vm4, %v5405_v2, %v5409_v18  ;;  %v5420_v7 = vrot.slane %v5047_v40, 2  ;;  %v5413_v10 = vor.u32 %v5412_v20, %v5411_v30  ;;  %v5423_v35 = vrot.slane %v5059_v58, 1 }
 0x397   : > { %v5417_v32 = vor.u32 %v5416_v3, %v5415_v57  ;;  %v5424_v63 = vrot.slane %v5055_v15, 2  ;;  %v5427_v4 = vrot.slane %v5067_v47, 1  ;;  %v15154_v43 = vshll.u32 %v13314_v48, 16 }
 0x398   : > { %v5421_v60 = vor.u32 %v5420_v7, %v5419_v0  ;;  %v15155_v2 = vshrl.u32 %v13320_v29, 16  ;;  %v13661_v1 = vsel %vm1159_vm4, %v5409_v18, %v5413_v10  ;;  %v15156_v61 = vshll.u32 %v13320_v29, 16 }
 0x399   : > { %v5428_v40 = vrot.slane %v15154_v43, 2  ;;  %10402 = vmatmul.mubr.msk.bf16.vlgmr.msra.gmra.mrb[20].mxu1 %vm4768_vm15, %v13441_v8  ;;  %v13664_v15 = vsel %vm1159_vm4, %v5413_v10, %v5417_v32  ;;  %v5425_v58 = vor.u32 %v5424_v63, %v5423_v35  ;;  %v15157_v8 = vshrl.u32 %v13349_v42, 16 }
 0x39a   : > { %v5431_v34 = vrot.slane %v15155_v2, 1  ;;  %v5432_v21 = vrot.slane %v15156_v61, 2  ;;  %10438 = vmatpush3.bf16.msra.mxu1 %v5535_v56  ;;  %10405 = vmatprep.mubr.msk.bf16.mxu1 %vm4768_vm15, %v13473_v12  ;;  %v13671_v48 = vsel %vm1159_vm4, %v5417_v32, %v5421_v60  ;;  %v15158_v44 = vshll.u32 %v13349_v42, 16 }
 0x39b   : > { %v5429_v47 = vor.u32 %v5428_v40, %v5427_v4  ;;  %v5435_v13 = vrot.slane %v15157_v8, 1  ;;  %11440 = vmatprep.subr.msk.bf16.mxu1 %vm4823_vm12, %v13650_v19  ;;  %v13680_v29 = vsel %vm1159_vm4, %v5421_v60, %v5425_v58  ;;  %v15159_v56 = vshrl.u32 %v13355_v53, 16 }
 0x39c   : > { %v5436_v39 = vrot.slane %v15158_v44, 2  ;;  %v5433_v49 = vor.u32 %v5432_v21, %v5431_v34  ;;  %v15160_v9 = vshll.u32 %v13355_v53, 16  ;;  %v15161_v42 = vshrl.u32 %v13386_v51, 16 }
 0x39d   : > { %v5439_v12 = vrot.slane %v15159_v56, 1  ;;  %v13687_v18 = vsel %vm1159_vm4, %v5425_v58, %v5429_v47  ;;  %v15162_v57 = vshll.u32 %v13386_v51, 16  ;;  %v15163_v10 = vshrl.u32 %v13394_v52, 16 }
 0x39e   : > { %v5440_v11 = vrot.slane %v15160_v9, 2  ;;  %v5437_v30 = vor.u32 %v5436_v39, %v5435_v13  ;;  %v5443_v20 = vrot.slane %v15161_v42, 1  ;;  %v13694_v0 = vsel %vm1159_vm4, %v5429_v47, %v5433_v49 }
 0x39f   : > { %v5444_v3 = vrot.slane %v15162_v57, 2  ;;  %v5447_v32 = vrot.slane %v15163_v10, 1  ;;  %v15164_v53 = vshll.u32 %v13394_v52, 16  ;;  %v15165_v4 = vshrl.u32 %v13411_v41, 16  ;;  %v13766_v57 = vld [vmem:[#allocation2 + $0x20] sm:$0xff]  }
 0x3a0   : > { %v5441_v7 = vor.u32 %v5440_v11, %v5439_v12  ;;  %v13701_v63 = vsel %vm1159_vm4, %v5433_v49, %v5437_v30  ;;  %v15166_v51 = vshll.u32 %v13411_v41, 16  ;;  %v5455_v58 = vrot.slane %v5123_v14, 1  ;;  %v13774_v10 = vld [vmem:[#allocation2 + $0x40] sm:$0xff]  }
 0x3a1   : > { %v5448_v35 = vrot.slane %v15164_v53, 2  ;;  %v5445_v60 = vor.u32 %v5444_v3, %v5443_v20  ;;  %v5451_v43 = vrot.slane %v15165_v4, 1  ;;  %v15167_v52 = vshll.u32 %v13422_v36, 16  ;;  %10406 = vmatmul.mubr.msk.bf16.gmra.mrb[24].mxu1 %vm4768_vm15, %v13487_v31  ;;  %v13768_v3 = vld [vmem:[#allocation2 + $0x28] sm:$0xff]  }
 0x3a2   : > { %v5452_v40 = vrot.slane %v15166_v51, 2  ;;  %v13708_v2 = vsel %vm1159_vm4, %v5437_v30, %v5441_v7  ;;  %v15168_v8 = vshrl.u32 %v13446_v37, 16  ;;  %v15169_v41 = vshll.u32 %v13446_v37, 16  ;;  %10409 = vmatprep.mubr.msk.bf16.mxu1 %vm4768_vm15, %v13492_v54 }
 0x3a3   : > { %v5449_v34 = vor.u32 %v5448_v35, %v5447_v32  ;;  %v5456_v61 = vrot.slane %v15167_v52, 2  ;;  %v13715_v21 = vsel %vm1159_vm4, %v5441_v7, %v5445_v60  ;;  %v5463_v36 = vrot.slane %v5139_v27, 1  ;;  %v13770_v7 = vld [vmem:[#allocation2 + $0x30] sm:$0xff]  }
 0x3a4   : > { %v5453_v47 = vor.u32 %v5452_v40, %v5451_v43  ;;  %v5459_v13 = vrot.slane %v15168_v8, 1  ;;  %v5460_v44 = vrot.slane %v15169_v41, 2  ;;  %v15170_v49 = vshll.u32 %v13459_v62, 16  ;;  %v13791_v43 = vld [vmem:[#allocation2 + $0x58] sm:$0xff]   ;;  %v13801_v52 = vld [vmem:[#allocation2 + $0x70] sm:$0xff]  }
 0x3a5   : > { %v13724_v39 = vsel %vm1159_vm4, %v5445_v60, %v5449_v34  ;;  %v5457_v14 = vor.u32 %v5456_v61, %v5455_v58  ;;  %v5467_v31 = vrot.slane %v5147_v22, 1  ;;  %v15171_v9 = vshll.u32 %v13500_v5, 16  ;;  %v13762_v5 = vld [vmem:[#allocation2 + $0x14] sm:$0xf]  ;;  %v13764_v22 = vld [vmem:[#allocation2 + $0x18] sm:$0xff]   ;;  %v13799_v58 = vld [vmem:[#allocation2 + $0x68] sm:$0xff]  }
 0x3a6   : > { %v5464_v56 = vrot.slane %v15170_v49, 2  ;;  %v13733_v12 = vsel %vm1159_vm4, %v5449_v34, %v5453_v47  ;;  %v5461_v37 = vor.u32 %v5460_v44, %v5459_v13  ;;  %v13807_v41 = vld [vmem:[#allocation2 + $0x78] sm:$0xff]   ;;  %v6335_v49 = vrot.slane %v13770_v7, 2  ;;  %v13867_v34 = vld [vmem:[#allocation2 + $0xa0] ss:$0 sps:$4 sm:$0x33]  }
 0x3a7   : > { %v5468_v11 = vrot.slane %v15171_v9, 2  ;;  %v13740_v30 = vsel %vm1159_vm4, %v5453_v47, %v5457_v14  ;;  %v13830_v8 = vld [vmem:[#allocation2 + $0x98] sm:$0xff]   ;;  %v6345_v40 = vrot.slane %v13791_v43, 2  ;;  %v6351_v51 = vrot.slane %v13801_v52, 2 }
 0x3a8   : > { %v5465_v27 = vor.u32 %v5464_v56, %v5463_v36  ;;  %v13743_v62 = vsel %vm1159_vm4, %v5457_v14, %v5461_v37  ;;  %v13813_v56 = vld [vmem:[#allocation2 + $0x80] sm:$0xff]   ;;  %v6353_v4 = vrot.slane %v13807_v41, 2 }
 0x3a9   : > { %v13745_v42 = vor.u32 %v5468_v11, %v5467_v31  ;;  %10410 = vmatmul.mubr.msk.bf16.gmra.mrb[28].mxu1 %vm4768_vm15, %v13507_v38  ;;  %v13772_v38 = vld [vmem:[#allocation2 + $0x38] sm:$0xff]   ;;  %v6331_v11 = vrot.slane %v13766_v57, 2  ;;  %v6339_v31 = vrot.slane %v13774_v10, 2 }
 0x3aa   : > { %v13748_v54 = vsel %vm1159_vm4, %v5461_v37, %v5465_v27  ;;  %10413 = vmatprep.mubr.msk.bf16.mxu1 %vm4768_vm15, %v13510_v25  ;;  %v6322_v25 = vld [vmem:[#allocation2 + $0x10] sm:$0xc]  ;;  %v13815_v37 = vld [vmem:[#allocation2 + $0x88] sm:$0xff]   ;;  %v6337_v47 = vrot.slane %v13772_v38, 2 }
 0x3ab   : > { %v13752_v20 = vsel %vm1159_vm4, %v5465_v27, %v13745_v42  ;;  %v13783_v32 = vcombine.low %v6322_v25, %v13762_v5  ;;  %v13821_v25 = vld [vmem:[#allocation2 + $0x90] sm:$0xff]   ;;  %v6329_v27 = vrot.slane %v13764_v22, 2  ;;  %v6357_v35 = vrot.slane %v13815_v37, 2 }
 0x3ad   : > { %v6328_v44 = vrot.slane %v13783_v32, 2  ;;  %v13849_v36 = vsel %vm2093_vm5, %v6329_v27, %v6331_v11 }
 0x3ae   : > { %15173 = vst [vmem:[#allocation4_spill] sm:$0xff] %v13849_v36 }
 0x3af   : > { %v13844_v13 = vsel %vm2093_vm5, %v6328_v44, %v6329_v27  ;;  %v13864_v27 = vsel %vm2093_vm5, %v6335_v49, %v6337_v47 }
 0x3b0   : > { %15172 = vst [vmem:[#allocation3_spill] sm:$0xff] %v13844_v13  ;;  %15176 = vst [vmem:[#allocation7_spill] sm:$0xff] %v13864_v27 }
 0x3b1   : > { %10414 = vmatmul.mubr.msk.bf16.gmra.mrb[32].mxu1 %vm4768_vm15, %v13522_v24  ;;  %v13778_v24 = vld [vmem:[#allocation2 + $0x48] sm:$0xff]  }
 0x3b2   : > { %10417 = vmatprep.mubr.msk.bf16.mxu1 %vm4768_vm15, %v13533_v6  ;;  %v13780_v6 = vld [vmem:[#allocation2 + $0x50] sm:$0xff]   ;;  %v6341_v44 = vrot.slane %v13778_v24, 2 }
 0x3b9   : > { %10418 = vmatmul.mubr.msk.bf16.gmra.mrb[0].mxu1 %vm4768_vm15, %v13547_v50  ;;  %v13793_v50 = vld [vmem:[#allocation2 + $0x60] sm:$0xff]  }
 0x3ba   : > { %10421 = vmatprep.mubr.msk.bf16.mxu1 %vm4768_vm15, %v13561_v26  ;;  %v6343_v26 = vrot.slane %v13780_v6, 2  ;;  %v6347_v61 = vrot.slane %v13793_v50, 2 }
 0x3bc   : > { %v13884_v60 = vsel %vm2093_vm5, %v6343_v26, %v6345_v40 }
 0x3bd   : > { %15180 = vst [vmem:[#allocation11_spill] sm:$0xff] %v13884_v60 }
 0x3c1   : > { %10422 = vmatmul.mubr.msk.bf16.gmra.mrb[4].mxu1 %vm4768_vm15, %v13568_v28  ;;  %v6333_v28 = vrot.slane %v13768_v3, 2 }
 0x3c2   : > { %10425 = vmatprep.mubr.msk.bf16.mxu1 %vm4768_vm15, %v13576_v33  ;;  %v13870_v33 = vsel %vm2093_vm5, %v6337_v47, %v6339_v31  ;;  %v13887_v47 = vsel %vm2093_vm5, %v6345_v40, %v6347_v61 }
 0x3c3   : > { %v13855_v9 = vsel %vm2093_vm5, %v6331_v11, %v6333_v28  ;;  %v13861_v14 = vsel %vm2093_vm5, %v6333_v28, %v6335_v49  ;;  %15177 = vst [vmem:[#allocation8_spill] sm:$0xff] %v13870_v33  ;;  %v13873_v11 = vsel %vm2093_vm5, %v6339_v31, %v6341_v44  ;;  %v13878_v28 = vsel %vm2093_vm5, %v6341_v44, %v6343_v26 }
 0x3c4   : > { %15174 = vst [vmem:[#allocation5_spill] sm:$0xff] %v13855_v9  ;;  %15175 = vst [vmem:[#allocation6_spill] sm:$0xff] %v13861_v14  ;;  %v6349_v49 = vrot.slane %v13799_v58, 2  ;;  %v6355_v31 = vrot.slane %v13813_v56, 2  ;;  %v6359_v26 = vrot.slane %v13821_v25, 2  ;;  %v15194_v33 = vshrl.u32 %v13768_v3, 16 }
 0x3c5   : > { %15178 = vst [vmem:[#allocation9_spill] sm:$0xff] %v13873_v11  ;;  %15179 = vst [vmem:[#allocation10_spill] sm:$0xff] %v13878_v28  ;;  %v13900_v28 = vsel %vm2093_vm5, %v6351_v51, %v6353_v4  ;;  %v15193_v11 = vshll.u32 %v13766_v57, 16 }
 0x3c6   : > { %15181 = vst [vmem:[#allocation12_spill] sm:$0xff] %v13887_v47  ;;  %v13894_v44 = vsel %vm2093_vm5, %v6347_v61, %v6349_v49  ;;  %v13897_v53 = vsel %vm2093_vm5, %v6349_v49, %v6351_v51  ;;  %15184 = vst [vmem:[#allocation15_spill] sm:$0xff] %v13900_v28  ;;  %v13906_v40 = vsel %vm2093_vm5, %v6353_v4, %v6355_v31  ;;  %v6363_v61 = vrot.slane %v13867_v34, 2 }
 0x3c7   : > { %15182 = vst [vmem:[#allocation13_spill] sm:$0xff] %v13894_v44  ;;  %15183 = vst [vmem:[#allocation14_spill] sm:$0xff] %v13897_v53  ;;  %v13909_v47 = vsel %vm2093_vm5, %v6355_v31, %v6357_v35  ;;  %v13914_v49 = vsel %vm2093_vm5, %v6357_v35, %v6359_v26  ;;  %v6642_v51 = vshrl.u32 %v13783_v32, 16  ;;  %v6645_v28 = vshll.u32 %v13783_v32, 16 }
 0x3c8   : > { %15185 = vst [vmem:[#allocation16_spill] sm:$0xff] %v13906_v40  ;;  %15186 = vst [vmem:[#allocation17_spill] sm:$0xff] %v13909_v47  ;;  %v15188_v53 = vshrl.u32 %v13764_v22, 16  ;;  %v15191_v47 = vshll.u32 %v13764_v22, 16  ;;  %v15192_v44 = vshrl.u32 %v13766_v57, 16  ;;  %v6654_v32 = vrot.slane %v15193_v11, 3 }
 0x3c9   : > { %10426 = vmatmul.mubr.msk.bf16.gmra.mrb[8].mxu1 %vm4768_vm15, %v13583_v59  ;;  %v6361_v59 = vrot.slane %v13830_v8, 2  ;;  %15187 = vst [vmem:[#allocation18_spill] sm:$0xff] %v13914_v49  ;;  %v6644_v49 = vrot.slane %v6642_v51, 2  ;;  %v6647_v60 = vrot.slane %v6645_v28, 3  ;;  %v15198_v28 = vshrl.u32 %v13772_v38, 16 }
 0x3ca   : > { %10429 = vmatprep.mubr.msk.bf16.mxu1 %vm4768_vm15, %v13600_v45  ;;  %v6649_v45 = vrot.slane %v15188_v53, 2  ;;  %v6650_v40 = vrot.slane %v15191_v47, 3  ;;  %v6653_v35 = vrot.slane %v15192_v44, 2  ;;  %v6657_v53 = vrot.slane %v15194_v33, 2 }
 0x3cb   : > { %v13921_v4 = vsel %vm2093_vm5, %v6359_v26, %v6361_v59  ;;  %v13924_v31 = vsel %vm2093_vm5, %v6361_v59, %v6363_v61  ;;  %v15195_v26 = vshll.u32 %v13768_v3, 16  ;;  %v15196_v59 = vshrl.u32 %v13770_v7, 16 }
 0x3cc   : > { %15189 = vst [vmem:[#allocation19_spill] sm:$0xff] %v13921_v4  ;;  %15190 = vst [vmem:[#allocation20_spill] sm:$0xff] %v13924_v31  ;;  %v6651_v27 = vor.u32 %v6650_v40, %v6649_v45  ;;  %v15197_v47 = vshll.u32 %v13770_v7, 16  ;;  %v6648_v14 = vor.u32 %v6647_v60, %v6644_v49  ;;  %v6655_v44 = vor.u32 %v6654_v32, %v6653_v35 }
 0x3cd   : > { %v6658_v4 = vrot.slane %v15195_v26, 3  ;;  %v6661_v61 = vrot.slane %v15196_v59, 2  ;;  %v6665_v51 = vrot.slane %v15198_v28, 2  ;;  %v15199_v11 = vshll.u32 %v13772_v38, 16 }
 0x3ce   : > { %v6662_v31 = vrot.slane %v15197_v47, 3  ;;  %v15200_v40 = vshrl.u32 %v13774_v10, 16  ;;  %v15201_v26 = vshll.u32 %v13774_v10, 16  ;;  %v13951_v60 = vsel %vm2407_vm6, %v6648_v14, %v6651_v27 }
 0x3cf   : > { %v6666_v9 = vrot.slane %v15199_v11, 3  ;;  %v6659_v36 = vor.u32 %v6658_v4, %v6657_v53  ;;  %15202 = vst [vmem:[#allocation21_spill] sm:$0xff] %v13951_v60  ;;  %v13954_v49 = vsel %vm2407_vm6, %v6651_v27, %v6655_v44  ;;  %v15204_v32 = vshrl.u32 %v13778_v24, 16 }
 0x3d0   : > { %v6663_v33 = vor.u32 %v6662_v31, %v6661_v61  ;;  %v6669_v45 = vrot.slane %v15200_v40, 2  ;;  %v6670_v13 = vrot.slane %v15201_v26, 3  ;;  %15203 = vst [vmem:[#allocation22_spill] sm:$0xff] %v13954_v49  ;;  %v15207_v14 = vshll.u32 %v13778_v24, 16 }
 0x3d1   : > { %10430 = vmatmul.mubr.msk.bf16.gmra.mrb[12].mxu1 %vm4768_vm15, %v13611_v17  ;;  %v6667_v35 = vor.u32 %v6666_v9, %v6665_v51  ;;  %v6673_v4 = vrot.slane %v15204_v32, 2  ;;  %v13961_v31 = vsel %vm2407_vm6, %v6655_v44, %v6659_v36  ;;  %v15209_v9 = vshrl.u32 %v13780_v6, 16 }
 0x3d2   : > { %10433 = vmatprep.mubr.msk.bf16.mxu1 %vm4768_vm15, %v13616_v55  ;;  %15205 = vst [vmem:[#allocation23_spill] sm:$0xff] %v13961_v31  ;;  %v13964_v53 = vsel %vm2407_vm6, %v6659_v36, %v6663_v33  ;;  %v6671_v17 = vor.u32 %v6670_v13, %v6669_v45  ;;  %v6674_v59 = vrot.slane %v15207_v14, 3  ;;  %v15210_v47 = vshll.u32 %v13780_v6, 16 }
 0x3d3   : > { %15206 = vst [vmem:[#allocation24_spill] sm:$0xff] %v13964_v53  ;;  %v13969_v27 = vsel %vm2407_vm6, %v6663_v33, %v6667_v35  ;;  %v6677_v61 = vrot.slane %v15209_v9, 2  ;;  %v15211_v55 = vshrl.u32 %v13791_v43, 16  ;;  %v15213_v13 = vshll.u32 %v13791_v43, 16 }
 0x3d4   : > { %15208 = vst [vmem:[#allocation25_spill] sm:$0xff] %v13969_v27  ;;  %v6678_v28 = vrot.slane %v15210_v47, 3  ;;  %v13978_v51 = vsel %vm2407_vm6, %v6667_v35, %v6671_v17  ;;  %v6675_v36 = vor.u32 %v6674_v59, %v6673_v4  ;;  %v15214_v40 = vshrl.u32 %v13793_v50, 16 }
 0x3d5   : > { %v6681_v44 = vrot.slane %v15211_v55, 2  ;;  %15212 = vst [vmem:[#allocation26_spill] sm:$0xff] %v13978_v51  ;;  %v6682_v11 = vrot.slane %v15213_v13, 3  ;;  %v15215_v26 = vshll.u32 %v13793_v50, 16  ;;  %v15216_v14 = vshrl.u32 %v13799_v58, 16 }
 0x3d6   : > { %v6685_v33 = vrot.slane %v15214_v40, 2  ;;  %v6679_v45 = vor.u32 %v6678_v28, %v6677_v61  ;;  %v15217_v47 = vshll.u32 %v13799_v58, 16  ;;  %v13991_v35 = vsel %vm2407_vm6, %v6671_v17, %v6675_v36 }
 0x3d7   : > { %v6686_v32 = vrot.slane %v15215_v26, 3  ;;  %v6689_v9 = vrot.slane %v15216_v14, 2  ;;  %15218 = vst [vmem:[#allocation27_spill] sm:$0xff] %v13991_v35  ;;  %v6683_v4 = vor.u32 %v6682_v11, %v6681_v44  ;;  %v15219_v59 = vshrl.u32 %v13801_v52, 16 }
 0x3d8   : > { %v6690_v55 = vrot.slane %v15217_v47, 3  ;;  %v15220_v51 = vshll.u32 %v13801_v52, 16  ;;  %v13998_v61 = vsel %vm2407_vm6, %v6675_v36, %v6679_v45  ;;  %v15222_v14 = vshrl.u32 %v13807_v41, 16 }
 0x3d9   : > { %v6693_v13 = vrot.slane %v15219_v59, 2  ;;  %15221 = vst [vmem:[#allocation28_spill] sm:$0xff] %v13998_v61  ;;  %v6687_v28 = vor.u32 %v6686_v32, %v6685_v33  ;;  %v14003_v47 = vsel %vm2407_vm6, %v6679_v45, %v6683_v4  ;;  %v15224_v44 = vshll.u32 %v13807_v41, 16  ;;  %10434 = vmatmul.mubr.msk.bf16.gmra.mrb[16].mxu1 %vm4768_vm15, %v13622_v23 }
 0x3da   : > { %v6694_v40 = vrot.slane %v15220_v51, 3  ;;  %v6691_v26 = vor.u32 %v6690_v55, %v6689_v9  ;;  %v6697_v27 = vrot.slane %v15222_v14, 2  ;;  %15223 = vst [vmem:[#allocation29_spill] sm:$0xff] %v14003_v47  ;;  %v15225_v59 = vshrl.u32 %v13813_v56, 16  ;;  %10439 = vmatprep.mubr.msk.bf16.mxu1 %vm4768_vm15, %v13634_v46 }
 0x3db   : > { %v6698_v11 = vrot.slane %v15224_v44, 3  ;;  %v14012_v51 = vsel %vm2407_vm6, %v6683_v4, %v6687_v28  ;;  %v15228_v33 = vshll.u32 %v13813_v56, 16  ;;  %v15229_v32 = vshrl.u32 %v13815_v37, 16 }
 0x3dc   : > { %v6695_v17 = vor.u32 %v6694_v40, %v6693_v13  ;;  %v6701_v35 = vrot.slane %v15225_v59, 2  ;;  %15226 = vst [vmem:[#allocation30_spill] sm:$0xff] %v14012_v51  ;;  %v14015_v36 = vsel %vm2407_vm6, %v6687_v28, %v6691_v26  ;;  %v15231_v23 = vshll.u32 %v13815_v37, 16 }
 0x3dd   : > { %15227 = vst [vmem:[#allocation31_spill] sm:$0xff] %v14015_v36  ;;  %v6702_v45 = vrot.slane %v15228_v33, 3  ;;  %v6705_v9 = vrot.slane %v15229_v32, 2  ;;  %v6699_v13 = vor.u32 %v6698_v11, %v6697_v27  ;;  %v15232_v40 = vshrl.u32 %v13821_v25, 16 }
 0x3de   : > { %v14024_v55 = vsel %vm2407_vm6, %v6691_v26, %v6695_v17  ;;  %v6706_v4 = vrot.slane %v15231_v23, 3  ;;  %v15233_v44 = vshll.u32 %v13821_v25, 16  ;;  %v15234_v33 = vshrl.u32 %v13830_v8, 16 }
 0x3df   : > { %15230 = vst [vmem:[#allocation32_spill] sm:$0xff] %v14024_v55  ;;  %v6709_v28 = vrot.slane %v15232_v40, 2  ;;  %v6703_v14 = vor.u32 %v6702_v45, %v6701_v35  ;;  %v15235_v36 = vshll.u32 %v13830_v8, 16  ;;  %v14037_v26 = vsel %vm2407_vm6, %v6695_v17, %v6699_v13 }
 0x3e0   : > { %v6710_v59 = vrot.slane %v15233_v44, 3  ;;  %v6713_v32 = vrot.slane %v15234_v33, 2  ;;  %15236 = vst [vmem:[#allocation33_spill] sm:$0xff] %v14037_v26  ;;  %v6707_v27 = vor.u32 %v6706_v4, %v6705_v9  ;;  %v6107_v45 = vsel %vm4823_vm12, %v13650_v19, 0  ;;  %v5750_v19 = vld [vmem:[#allocation2 + $0x10] sm:$0xe] }
 0x3e1   : > { %v6714_v46 = vrot.slane %v15235_v36, 3  ;;  %v14040_v11 = vsel %vm2407_vm6, %v6699_v13, %v6703_v14  ;;  %v14059_v36 = vld [vmem:[%s15034_s2 + $0x10] sm:$0xf]  ;;  %10440 = vmatmul.mubr.msk.bf16.vlgmr.msra.gmra.mrb[20].mxu1 %vm4768_vm15, %v13637_v16  ;;  %v14071_v9 = vld [vmem:[#allocation2 + $0x98] ss:$0 sps:$4 sm:$0x33]   ;;  %v14074_v13 = vcombine.low %v5750_v19, %v13762_v5 }
 0x3e2   : > { %15237 = vst [vmem:[#allocation34_spill] sm:$0xff] %v14040_v11  ;;  %v6711_v23 = vor.u32 %v6710_v59, %v6709_v28  ;;  %v14045_v35 = vsel %vm2407_vm6, %v6703_v14, %v6707_v27  ;;  %10476 = vmatpush3.bf16.msra.mxu1 %v6107_v45  ;;  %10443 = vmatprep.mubr.msk.bf16.mxu1 %vm4768_vm15, %v13661_v1  ;;  %v14076_v16 = vld [vmem:[#allocation2 + $0x20] sm:$0xff]   ;;  %v14078_v4 = vld [vmem:[#allocation2 + $0x28] sm:$0xff]   ;;  %v14082_v1 = vld [vmem:[#allocation2 + $0x30] sm:$0xff]  }
 0x3e3   : > { %v14042_v55 = vor.u32 %v6714_v46, %v6713_v32  ;;  %15239 = vst [vmem:[#allocation36_spill] sm:$0xff] %v14045_v35  ;;  %11441 = vmatprep.subr.msk.bf16.mxu1 %vm4823_vm12, %v14059_v36  ;;  %15242 = vst [vmem:[#allocation39_spill] sm:$0xff] %v14076_v16  ;;  %v14084_v28 = vld [vmem:[#allocation2 + $0x38] sm:$0xff]   ;;  %v14106_v45 = vld [vmem:[#allocation2 + $0x68] sm:$0xff]   ;;  %v15098_v44 = vrot.slane %v14076_v16, 3  ;;  %v7577_v26 = vrot.slane %v14078_v4, 3 }
 0x3e4   : > { %v14050_v40 = vsel %vm2407_vm6, %v6707_v27, %v6711_v23  ;;  %v14098_v33 = vld [vmem:[#allocation2 + $0x58] sm:$0xff]   ;;  %v14112_v5 = vld [vmem:[#allocation2 + $0x70] sm:$0xff]   ;;  %v14122_v19 = vld [vmem:[#allocation2 + $0x88] sm:$0xff]   ;;  %v7579_v46 = vrot.slane %v14082_v1, 3 }
 0x3e5   : > { %15238 = vst [vmem:[#allocation35_spill] sm:$0xff] %v14042_v55  ;;  %15240 = vst [vmem:[#allocation37_spill] sm:$0xff] %v14050_v40  ;;  %v14054_v17 = vsel %vm2407_vm6, %v6711_v23, %v14042_v55  ;;  %v14104_v23 = vld [vmem:[#allocation2 + $0x60] sm:$0xff]   ;;  %v14114_v32 = vld [vmem:[#allocation2 + $0x78] sm:$0xff]   ;;  %v7581_v55 = vrot.slane %v14084_v28, 3  ;;  %v14164_v59 = vsel %vm3341_vm8, %v15098_v44, %v7577_v26  ;;  %v7589_v51 = vrot.slane %v14098_v33, 3 }
 0x3e6   : > { %15241 = vst [vmem:[#allocation38_spill] sm:$0xff] %v14054_v17  ;;  %v14120_v17 = vld [vmem:[#allocation2 + $0x80] sm:$0xff]   ;;  %v14128_v35 = vld [vmem:[#allocation2 + $0x90] sm:$0xff]   ;;  %v14134_v11 = vld [vmem:[#allocation2 + $0x98] sm:$0xff]   ;;  %v14173_v61 = vsel %vm3341_vm8, %v7577_v26, %v7579_v46  ;;  %v7593_v26 = vrot.slane %v14106_v45, 3 }
 0x3e7   : > { %v14142_v27 = vld [vmem:[#allocation2 + $0xa0] sm:$0xff]   ;;  %v7568_v40 = vld [vmem:[#allocation2 + $0x18] sm:$0x8]  ;;  %15244 = vst [vmem:[#allocation41_spill] sm:$0xff] %v14164_v59  ;;  %15246 = vst [vmem:[#allocation43_spill] sm:$0xff] %v14173_v61  ;;  %v14176_v53 = vsel %vm3341_vm8, %v7579_v46, %v7581_v55  ;;  %v7595_v61 = vrot.slane %v14112_v5, 3 }
 0x3e8   : > { %15247 = vst [vmem:[#allocation44_spill] sm:$0xff] %v14176_v53  ;;  %v7597_v46 = vrot.slane %v14114_v32, 3 }
 0x3e9   : > { %10444 = vmatmul.mubr.msk.bf16.gmra.mrb[24].mxu1 %vm4768_vm15, %v13664_v15  ;;  %v14088_v15 = vld [vmem:[#allocation2 + $0x40] sm:$0xff]  }
 0x3ea   : > { %10447 = vmatprep.mubr.msk.bf16.mxu1 %vm4768_vm15, %v13671_v48  ;;  %v14090_v48 = vld [vmem:[#allocation2 + $0x48] sm:$0xff]   ;;  %v7583_v14 = vrot.slane %v14088_v15, 3 }
 0x3eb   : > { %v7585_v47 = vrot.slane %v14090_v48, 3 }
 0x3ec   : > { %v14181_v44 = vsel %vm3341_vm8, %v7581_v55, %v7583_v14 }
 0x3ed   : > { %15249 = vst [vmem:[#allocation46_spill] sm:$0xff] %v14181_v44  ;;  %v14184_v59 = vsel %vm3341_vm8, %v7583_v14, %v7585_v47  ;;  %v7601_v44 = vrot.slane %v14122_v19, 3 }
 0x3ee   : > { %15250 = vst [vmem:[#allocation47_spill] sm:$0xff] %v14184_v59  ;;  %v7599_v59 = vrot.slane %v14120_v17, 3 }
 0x3f1   : > { %10448 = vmatmul.mubr.msk.bf16.gmra.mrb[28].mxu1 %vm4768_vm15, %v13680_v29  ;;  %v14096_v29 = vld [vmem:[#allocation2 + $0x50] sm:$0xff]  }
 0x3f2   : > { %10451 = vmatprep.mubr.msk.bf16.mxu1 %vm4768_vm15, %v13687_v18  ;;  %v14158_v18 = vld [vmem:[#allocation2 + $0x1c] sm:$0xf]  ;;  %v7587_v31 = vrot.slane %v14096_v29, 3 }
 0x3f3   : > { %15243 = vst [vmem:[#allocation40_spill] sm:$0xff] %v14158_v18 }
 0x3f4   : > { %v14195_v55 = vsel %vm3341_vm8, %v7585_v47, %v7587_v31  ;;  %v14198_v14 = vsel %vm3341_vm8, %v7587_v31, %v7589_v51  ;;  %v14214_v47 = vsel %vm3341_vm8, %v7595_v61, %v7597_v46  ;;  %v14217_v31 = vsel %vm3341_vm8, %v7597_v46, %v7599_v59 }
 0x3f5   : > { %15251 = vst [vmem:[#allocation48_spill] sm:$0xff] %v14195_v55  ;;  %15252 = vst [vmem:[#allocation49_spill] sm:$0xff] %v14198_v14  ;;  %v14220_v14 = vsel %vm3341_vm8, %v7599_v59, %v7601_v44  ;;  %v15261_v59 = vshrl.u32 %v14076_v16, 16 }
 0x3f6   : > { %15256 = vst [vmem:[#allocation53_spill] sm:$0xff] %v14214_v47  ;;  %15257 = vst [vmem:[#allocation54_spill] sm:$0xff] %v14217_v31  ;;  %v15262_v31 = vshll.u32 %v14076_v16, 16 }
 0x3f7   : > { %15258 = vst [vmem:[#allocation55_spill] sm:$0xff] %v14220_v14  ;;  %v7895_v14 = vrot.slane %v15261_v59, 3  ;;  %v15267_v59 = vshrl.u32 %v14082_v1, 16 }
 0x3f8   : > { %v7896_v47 = vrot.slane %v15262_v31, 4  ;;  %v15268_v31 = vshll.u32 %v14082_v1, 16 }
 0x3f9   : > { %10452 = vmatmul.mubr.msk.bf16.gmra.mrb[32].mxu1 %vm4768_vm15, %v13694_v0  ;;  %v14178_v0 = vld [vmem:[#allocation2 + $0xa8] ss:$0 sps:$4 sm:$0x77]   ;;  %v7903_v60 = vrot.slane %v15267_v59, 3 }
 0x3fa   : > { %10455 = vmatprep.mubr.msk.bf16.mxu1 %vm4768_vm15, %v13701_v63  ;;  %v14170_v63 = vcombine.low %v7568_v40, %v14158_v18  ;;  %15248 = vst [vmem:[#allocation45_spill] sm:$0xff] %v14178_v0  ;;  %v7591_v40 = vrot.slane %v14104_v23, 3  ;;  %v7897_v49 = vor.u32 %v7896_v47, %v7895_v14  ;;  %v15271_v47 = vshrl.u32 %v14088_v15, 16 }
 0x3fc   : > { %15245 = vst [vmem:[#allocation42_spill] sm:$0xff] %v14170_v63  ;;  %v14205_v53 = vsel %vm3341_vm8, %v7589_v51, %v7591_v40  ;;  %v14208_v18 = vsel %vm3341_vm8, %v7591_v40, %v7593_v26  ;;  %v7605_v51 = vrot.slane %v14134_v11, 3  ;;  %v7609_v40 = vrot.slane %v14178_v0, 3 }
 0x3fd   : > { %15253 = vst [vmem:[#allocation50_spill] sm:$0xff] %v14205_v53  ;;  %15254 = vst [vmem:[#allocation51_spill] sm:$0xff] %v14208_v18  ;;  %v7607_v53 = vrot.slane %v14142_v27, 3 }
 0x3ff   : > { %v14239_v18 = vsel %vm3341_vm8, %v7605_v51, %v7607_v53  ;;  %v14242_v55 = vsel %vm3341_vm8, %v7607_v53, %v7609_v40  ;;  %v15270_v40 = vshll.u32 %v14084_v28, 16 }
 0x400   : > { %15263 = vst [vmem:[#allocation58_spill] sm:$0xff] %v14239_v18  ;;  %15264 = vst [vmem:[#allocation59_spill] sm:$0xff] %v14242_v55  ;;  %v15269_v18 = vshrl.u32 %v14084_v28, 16 }
 0x401   : > { %10456 = vmatmul.mubr.msk.bf16.gmra.mrb[0].mxu1 %vm4768_vm15, %v13708_v2  ;;  %v14211_v2 = vsel %vm3341_vm8, %v7593_v26, %v7595_v61  ;;  %v7888_v26 = vshrl.u32 %v14170_v63, 16 }
 0x402   : > { %10459 = vmatprep.mubr.msk.bf16.mxu1 %vm4768_vm15, %v13715_v21  ;;  %15255 = vst [vmem:[#allocation52_spill] sm:$0xff] %v14211_v2  ;;  %v7603_v21 = vrot.slane %v14128_v35, 3  ;;  %v7891_v2 = vshll.u32 %v14170_v63, 16  ;;  %v7907_v53 = vrot.slane %v15269_v18, 3 }
 0x403   : > { %v7890_v0 = vrot.slane %v7888_v26, 3  ;;  %v7911_v26 = vrot.slane %v15271_v47, 3  ;;  %v15276_v47 = vshrl.u32 %v14096_v29, 16 }
 0x404   : > { %v14229_v61 = vsel %vm3341_vm8, %v7601_v44, %v7603_v21  ;;  %v14232_v46 = vsel %vm3341_vm8, %v7603_v21, %v7605_v51  ;;  %v7893_v63 = vrot.slane %v7891_v2, 4  ;;  %v15265_v44 = vshrl.u32 %v14078_v4, 16 }
 0x405   : > { %15259 = vst [vmem:[#allocation56_spill] sm:$0xff] %v14229_v61  ;;  %15260 = vst [vmem:[#allocation57_spill] sm:$0xff] %v14232_v46  ;;  %v15266_v21 = vshll.u32 %v14078_v4, 16  ;;  %v7904_v51 = vrot.slane %v15268_v31, 4  ;;  %v7908_v2 = vrot.slane %v15270_v40, 4 }
 0x406   : > { %v7899_v61 = vrot.slane %v15265_v44, 3  ;;  %v7894_v16 = vor.u32 %v7893_v63, %v7890_v0  ;;  %v15272_v44 = vshll.u32 %v14088_v15, 16  ;;  %v15273_v0 = vshrl.u32 %v14090_v48, 16 }
 0x407   : > { %v7900_v46 = vrot.slane %v15266_v21, 4  ;;  %v7905_v59 = vor.u32 %v7904_v51, %v7903_v60  ;;  %v7909_v31 = vor.u32 %v7908_v2, %v7907_v53  ;;  %v15280_v51 = vshrl.u32 %v14098_v33, 16 }
 0x408   : > { %v7912_v21 = vrot.slane %v15272_v44, 4  ;;  %v7915_v63 = vrot.slane %v15273_v0, 3  ;;  %v14267_v18 = vsel %vm3655_vm9, %v7894_v16, %v7897_v49  ;;  %v7919_v44 = vrot.slane %v15276_v47, 3 }
 0x409   : > { %10460 = vmatmul.mubr.msk.bf16.gmra.mrb[4].mxu1 %vm4768_vm15, %v13724_v39  ;;  %v7901_v14 = vor.u32 %v7900_v46, %v7899_v61  ;;  %v15274_v39 = vshll.u32 %v14090_v48, 16  ;;  %v15277_v0 = vshll.u32 %v14096_v29, 16  ;;  %v14282_v16 = vsel %vm3655_vm9, %v7905_v59, %v7909_v31 }
 0x40a   : > { %10463 = vmatprep.mubr.msk.bf16.mxu1 %vm4768_vm15, %v13733_v12  ;;  %v7913_v40 = vor.u32 %v7912_v21, %v7911_v26  ;;  %15279 = vst [vmem:[#allocation62_spill] sm:$0xff] %v14282_v16  ;;  %v7923_v53 = vrot.slane %v15280_v51, 3  ;;  %v15282_v26 = vshll.u32 %v14098_v33, 16  ;;  %v15287_v51 = vshll.u32 %v14106_v45, 16 }
 0x40b   : > { %v7916_v61 = vrot.slane %v15274_v39, 4  ;;  %v14272_v46 = vsel %vm3655_vm9, %v7897_v49, %v7901_v14  ;;  %v7920_v55 = vrot.slane %v15277_v0, 4  ;;  %v14279_v12 = vsel %vm3655_vm9, %v7901_v14, %v7905_v59 }
 0x40c   : > { %15275 = vst [vmem:[#allocation60_spill] sm:$0xff] %v14272_v46  ;;  %15278 = vst [vmem:[#allocation61_spill] sm:$0xff] %v14279_v12  ;;  %v14287_v49 = vsel %vm3655_vm9, %v7909_v31, %v7913_v40  ;;  %v7924_v21 = vrot.slane %v15282_v26, 4  ;;  %v15283_v39 = vshrl.u32 %v14104_v23, 16  ;;  %v15285_v59 = vshll.u32 %v14104_v23, 16 }
 0x40d   : > { %v7917_v60 = vor.u32 %v7916_v61, %v7915_v63  ;;  %15281 = vst [vmem:[#allocation63_spill] sm:$0xff] %v14287_v49  ;;  %v7921_v2 = vor.u32 %v7920_v55, %v7919_v44  ;;  %v15286_v63 = vshrl.u32 %v14106_v45, 16  ;;  %v7932_v31 = vrot.slane %v15287_v51, 4 }
 0x40e   : > { %v7927_v47 = vrot.slane %v15283_v39, 3  ;;  %v7928_v0 = vrot.slane %v15285_v59, 4  ;;  %v7925_v44 = vor.u32 %v7924_v21, %v7923_v53  ;;  %v15288_v26 = vshrl.u32 %v14112_v5, 16 }
 0x40f   : > { %v14294_v14 = vsel %vm3655_vm9, %v7913_v40, %v7917_v60  ;;  %v7931_v61 = vrot.slane %v15286_v63, 3  ;;  %v14303_v55 = vsel %vm3655_vm9, %v7917_v60, %v7921_v2  ;;  %v15289_v39 = vshll.u32 %v14112_v5, 16 }
 0x410   : > { %15284 = vst [vmem:[#allocation64_spill] sm:$0xff] %v14294_v14  ;;  %v7935_v49 = vrot.slane %v15288_v26, 3  ;;  %v7929_v14 = vor.u32 %v7928_v0, %v7927_v47  ;;  %v15290_v59 = vshrl.u32 %v14114_v32, 16  ;;  %v15291_v63 = vshll.u32 %v14114_v32, 16 }
 0x411   : > { %v7936_v40 = vrot.slane %v15289_v39, 4  ;;  %v7933_v16 = vor.u32 %v7932_v31, %v7931_v61  ;;  %10464 = vmatmul.mubr.msk.bf16.gmra.mrb[8].mxu1 %vm4768_vm15, %v13740_v30  ;;  %v14316_v60 = vsel %vm3655_vm9, %v7921_v2, %v7925_v44  ;;  %v15292_v21 = vshrl.u32 %v14120_v17, 16 }
 0x412   : > { %v7939_v12 = vrot.slane %v15290_v59, 3  ;;  %v7940_v46 = vrot.slane %v15291_v63, 4  ;;  %v15293_v26 = vshll.u32 %v14120_v17, 16  ;;  %10467 = vmatprep.mubr.msk.bf16.mxu1 %vm4768_vm15, %v13743_v62  ;;  %v14325_v0 = vsel %vm3655_vm9, %v7925_v44, %v7929_v14 }
 0x413   : > { %v7937_v53 = vor.u32 %v7936_v40, %v7935_v49  ;;  %v7943_v51 = vrot.slane %v15292_v21, 3  ;;  %15294 = vst [vmem:[#allocation65_spill] sm:$0xff] %v14325_v0  ;;  %v14328_v61 = vsel %vm3655_vm9, %v7929_v14, %v7933_v16  ;;  %v15296_v2 = vshrl.u32 %v14122_v19, 16 }
 0x414   : > { %v7944_v47 = vrot.slane %v15293_v26, 4  ;;  %15295 = vst [vmem:[#allocation66_spill] sm:$0xff] %v14328_v61  ;;  %v7941_v30 = vor.u32 %v7940_v46, %v7939_v12  ;;  %v15298_v40 = vshll.u32 %v14122_v19, 16  ;;  %v15299_v63 = vshrl.u32 %v14128_v35, 16 }
 0x415   : > { %v7947_v31 = vrot.slane %v15296_v2, 3  ;;  %v14333_v49 = vsel %vm3655_vm9, %v7933_v16, %v7937_v53  ;;  %v15301_v14 = vshll.u32 %v14128_v35, 16  ;;  %v15302_v46 = vshrl.u32 %v14134_v11, 16 }
 0x416   : > { %15297 = vst [vmem:[#allocation67_spill] sm:$0xff] %v14333_v49  ;;  %v7945_v39 = vor.u32 %v7944_v47, %v7943_v51  ;;  %v7948_v59 = vrot.slane %v15298_v40, 4  ;;  %v7951_v62 = vrot.slane %v15299_v63, 3  ;;  %v14340_v44 = vsel %vm3655_vm9, %v7937_v53, %v7941_v30 }
 0x417   : > { %15300 = vst [vmem:[#allocation68_spill] sm:$0xff] %v14340_v44  ;;  %v7952_v21 = vrot.slane %v15301_v14, 4  ;;  %v7955_v12 = vrot.slane %v15302_v46, 3  ;;  %v15303_v26 = vshll.u32 %v14134_v11, 16  ;;  %v15304_v2 = vshrl.u32 %v14142_v27, 16 }
 0x418   : > { %v14349_v51 = vsel %vm3655_vm9, %v7941_v30, %v7945_v39  ;;  %v7949_v47 = vor.u32 %v7948_v59, %v7947_v31  ;;  %v15305_v63 = vshll.u32 %v14142_v27, 16  ;;  %v15306_v14 = vshrl.u32 %v14071_v9, 16 }
 0x419   : > { %v7956_v16 = vrot.slane %v15303_v26, 4  ;;  %v7959_v40 = vrot.slane %v15304_v2, 3  ;;  %v7953_v44 = vor.u32 %v7952_v21, %v7951_v62  ;;  %v15307_v30 = vshll.u32 %v14071_v9, 16  ;;  %10468 = vmatmul.mubr.msk.bf16.gmra.mrb[12].mxu1 %vm4768_vm15, %v13748_v54 }
 0x41a   : > { %v7960_v53 = vrot.slane %v15305_v63, 4  ;;  %v5474_v61 = vrot.slane %v15306_v14, 1  ;;  %v14358_v46 = vsel %vm3655_vm9, %v7945_v39, %v7949_v47  ;;  %v15308_v31 = vshrl.u32 %v14074_v13, 16  ;;  %10471 = vmatprep.mubr.msk.bf16.mxu1 %vm4768_vm15, %v13752_v20 }
 0x41b   : > { %v7957_v49 = vor.u32 %v7956_v16, %v7955_v12  ;;  %v5477_v26 = vrot.slane %v15307_v30, 2  ;;  %v14367_v2 = vsel %vm3655_vm9, %v7949_v47, %v7953_v44  ;;  %v15309_v39 = vshll.u32 %v14074_v13, 16 }
 0x41c   : > { %v14360_v0 = vor.u32 %v7960_v53, %v7959_v40  ;;  %v5885_v59 = vrot.slane %v15308_v31, 1  ;;  %v15310_v12 = vshrl.u32 %v13764_v22, 16  ;;  %v15311_v9 = vshll.u32 %v13764_v22, 16 }
 0x41d   : > { %v14370_v62 = vsel %vm3655_vm9, %v7953_v44, %v7957_v49  ;;  %v5888_v21 = vrot.slane %v15309_v39, 2  ;;  %v5478_v44 = vor.u32 %v5477_v26, %v5474_v61  ;;  %v15312_v13 = vshrl.u32 %v13766_v57, 16 }
 0x41e   : > { %v5893_v16 = vrot.slane %v15310_v12, 1  ;;  %v5896_v40 = vrot.slane %v15311_v9, 2  ;;  %v14382_v63 = vsel %vm3655_vm9, %v7957_v49, %v14360_v0  ;;  %v15313_v30 = vshll.u32 %v13766_v57, 16 }
 0x41f   : > { %v5889_v47 = vor.u32 %v5888_v21, %v5885_v59  ;;  %v5479_v54 = vsel %vm1159_vm4, %v13745_v42, %v5478_v44  ;;  %v5902_v14 = vrot.slane %v15312_v13, 1  ;;  %v14394_v31 = vpop.f32.mrb[36].mxu0  ;;  %v15314_v20 = vshrl.u32 %v13768_v3, 16 }
 0x420   : > { %v5897_v53 = vor.u32 %v5896_v40, %v5893_v16  ;;  %v5905_v22 = vrot.slane %v15313_v30, 2  ;;  %v15315_v26 = vshll.u32 %v13768_v3, 16  ;;  %v14401_v42 = vpop.f32.mrb[37].mxu0  ;;  %v6420_v16 = vsel %vm4823_vm12, %v14059_v36, 0 }
 0x421   : > { %10472 = vmatmul.mubr.msk.bf16.gmra.mrb[16].mxu1 %vm4768_vm15, %v5479_v54  ;;  %v5911_v61 = vrot.slane %v15314_v20, 1  ;;  %v14403_v39 = vpop.f32.mrb[38].mxu0  ;;  %v15316_v40 = vshrl.u32 %v13770_v7, 16  ;;  %v15317_v3 = vshll.u32 %v13770_v7, 16  ;;  %v14417_v54 = vld [vmem:[%s15034_s2 + $0x14] sm:$0xf] }
 0x422   : > { %v5898_v49 = vsel %vm1159_vm4, %v5889_v47, %v5897_v53  ;;  %v5914_v59 = vrot.slane %v15315_v26, 2  ;;  %v14405_v57 = vpop.f32.mrb[39].mxu0  ;;  %v5906_v21 = vor.u32 %v5905_v22, %v5902_v14  ;;  %v15318_v14 = vshrl.u32 %v13772_v38, 16 }
 0x423   : > { %10477 = vmatprep.mubr.msk.bf16.mxu1 %vm4768_vm15, %v5898_v49  ;;  %v5920_v44 = vrot.slane %v15316_v40, 1  ;;  %v5923_v47 = vrot.slane %v15317_v3, 2  ;;  %v15322_v3 = vshrl.u32 %v13778_v24, 16 }
 0x424   : > { %v5915_v12 = vor.u32 %v5914_v59, %v5911_v61  ;;  %v5907_v9 = vsel %vm1159_vm4, %v5897_v53, %v5906_v21  ;;  %v5929_v36 = vrot.slane %v15318_v14, 1  ;;  %v15319_v53 = vshll.u32 %v13772_v38, 16 }
 0x425   : > { %v5924_v20 = vor.u32 %v5923_v47, %v5920_v44  ;;  %v15320_v38 = vshrl.u32 %v13774_v10, 16  ;;  %v15323_v44 = vshll.u32 %v13778_v24, 16  ;;  %v15325_v24 = vshll.u32 %v13780_v6, 16 }
 0x426   : > { %v5916_v13 = vsel %vm1159_vm4, %v5906_v21, %v5915_v12  ;;  %v5932_v30 = vrot.slane %v15319_v53, 2 }
 0x427   : > { %v5925_v59 = vsel %vm1159_vm4, %v5915_v12, %v5924_v20  ;;  %v5938_v21 = vrot.slane %v15320_v38, 1  ;;  %v5950_v47 = vrot.slane %v15323_v44, 2 }
 0x428   : > { %v5933_v26 = vor.u32 %v5932_v30, %v5929_v36 }
 0x429   : > { %10478 = vmatmul.mubr.msk.bf16.vlgmr.msra.gmra.mrb[20].mxu1 %vm4768_vm15, %v5907_v9 }
 0x42a   : > { %10514 = vmatpush3.bf16.msra.mxu1 %v6420_v16  ;;  %10481 = vmatprep.mubr.msk.bf16.mxu1 %vm4768_vm15, %v5916_v13  ;;  %v14426_v7 = vpop.f32.mrb[40].mxu0  ;;  %v15321_v16 = vshll.u32 %v13774_v10, 16  ;;  %v5934_v40 = vsel %vm1159_vm4, %v5924_v20, %v5933_v26  ;;  %v5947_v13 = vrot.slane %v15322_v3, 1  ;;  %v15326_v3 = vshrl.u32 %v13791_v43, 16 }
 0x42b   : > { %v14428_v22 = vpop.f32.mrb[41].mxu0  ;;  %11442 = vmatprep.subr.msk.bf16.mxu1 %vm4823_vm12, %v14417_v54 }
 0x42c   : > { %v14432_v49 = vpop.f32.mrb[42].mxu0  ;;  %v5941_v9 = vrot.slane %v15321_v16, 2  ;;  %v5951_v10 = vor.u32 %v5950_v47, %v5947_v13  ;;  %v5959_v16 = vrot.slane %v15325_v24, 2 }
 0x42d   : > { %v14434_v61 = vpop.f32.mrb[43].mxu0 }
 0x42e   : > { %v5942_v36 = vor.u32 %v5941_v9, %v5938_v21  ;;  %v5965_v21 = vrot.slane %v15326_v3, 1  ;;  %v15327_v9 = vshll.u32 %v13791_v43, 16  ;;  %v15331_v43 = vshll.u32 %v13793_v50, 16 }
 0x430   : > { %v5943_v20 = vsel %vm1159_vm4, %v5933_v26, %v5942_v36  ;;  %v5968_v13 = vrot.slane %v15327_v9, 2  ;;  %v5977_v9 = vrot.slane %v15331_v43, 2  ;;  %v15335_v43 = vshll.u32 %v13801_v52, 16 }
 0x431   : > { %10482 = vmatmul.mubr.msk.bf16.gmra.mrb[24].mxu1 %vm4768_vm15, %v5925_v59  ;;  %v15324_v59 = vshrl.u32 %v13780_v6, 16 }
 0x432   : > { %10485 = vmatprep.mubr.msk.bf16.mxu1 %vm4768_vm15, %v5934_v40  ;;  %v5952_v40 = vsel %vm1159_vm4, %v5942_v36, %v5951_v10  ;;  %v5969_v6 = vor.u32 %v5968_v13, %v5965_v21 }
 0x433   : > { %v14448_v14 = vpop.f32.mrb[44].mxu0  ;;  %v5956_v38 = vrot.slane %v15324_v59, 1 }
 0x434   : > { %v14450_v12 = vpop.f32.mrb[45].mxu0 }
 0x435   : > { %v14452_v53 = vpop.f32.mrb[46].mxu0  ;;  %v5960_v47 = vor.u32 %v5959_v16, %v5956_v38  ;;  %v15333_v16 = vshll.u32 %v13799_v58, 16 }
 0x436   : > { %v14454_v30 = vpop.f32.mrb[47].mxu0 }
 0x437   : > { %v5961_v36 = vsel %vm1159_vm4, %v5951_v10, %v5960_v47  ;;  %v5986_v21 = vrot.slane %v15333_v16, 2  ;;  %v15337_v16 = vshll.u32 %v13807_v41, 16 }
 0x439   : > { %10486 = vmatmul.mubr.msk.bf16.gmra.mrb[28].mxu1 %vm4768_vm15, %v5943_v20  ;;  %v15330_v20 = vshrl.u32 %v13793_v50, 16 }
 0x43a   : > { %10489 = vmatprep.mubr.msk.bf16.mxu1 %vm4768_vm15, %v5952_v40  ;;  %v5970_v40 = vsel %vm1159_vm4, %v5960_v47, %v5969_v6 }
 0x43b   : > { %v14468_v44 = vpop.f32.mrb[48].mxu0  ;;  %v5974_v3 = vrot.slane %v15330_v20, 1  ;;  %v15334_v20 = vshrl.u32 %v13801_v52, 16 }
 0x43c   : > { %v14470_v26 = vpop.f32.mrb[49].mxu0 }
 0x43d   : > { %15328 = vst [vmem:[#allocation69_spill] sm:$0xff] %v14470_v26  ;;  %v14472_v59 = vpop.f32.mrb[50].mxu0  ;;  %v15332_v26 = vshrl.u32 %v13799_v58, 16  ;;  %v5978_v13 = vor.u32 %v5977_v9, %v5974_v3  ;;  %v5992_v50 = vrot.slane %v15334_v20, 1  ;;  %v15340_v20 = vshrl.u32 %v13815_v37, 16 }
 0x43e   : > { %v14474_v24 = vpop.f32.mrb[51].mxu0 }
 0x43f   : > { %15329 = vst [vmem:[#allocation70_spill] sm:$0xff] %v14474_v24  ;;  %v5983_v38 = vrot.slane %v15332_v26, 1  ;;  %v5979_v24 = vsel %vm1159_vm4, %v5969_v6, %v5978_v13  ;;  %v15336_v26 = vshrl.u32 %v13807_v41, 16  ;;  %v6019_v41 = vrot.slane %v15340_v20, 1 }
 0x441   : > { %10490 = vmatmul.mubr.msk.bf16.gmra.mrb[32].mxu1 %vm4768_vm15, %v5961_v36  ;;  %v5987_v10 = vor.u32 %v5986_v21, %v5983_v38  ;;  %v5995_v36 = vrot.slane %v15335_v43, 2  ;;  %v6001_v58 = vrot.slane %v15336_v26, 1  ;;  %v15338_v38 = vshrl.u32 %v13813_v56, 16 }
 0x442   : > { %10493 = vmatprep.mubr.msk.bf16.mxu1 %vm4768_vm15, %v5970_v40  ;;  %v6004_v40 = vrot.slane %v15337_v16, 2  ;;  %v15339_v21 = vshll.u32 %v13813_v56, 16  ;;  %v15341_v43 = vshll.u32 %v13815_v37, 16  ;;  %v15342_v26 = vshrl.u32 %v13821_v25, 16 }
 0x443   : > { %v5988_v47 = vsel %vm1159_vm4, %v5978_v13, %v5987_v10  ;;  %v5996_v3 = vor.u32 %v5995_v36, %v5992_v50  ;;  %v6010_v52 = vrot.slane %v15338_v38, 1 }
 0x444   : > { %v6005_v6 = vor.u32 %v6004_v40, %v6001_v58  ;;  %v6028_v56 = vrot.slane %v15342_v26, 1  ;;  %v15343_v58 = vshll.u32 %v13821_v25, 16  ;;  %v15349_v26 = vld [vmem:[#allocation6_spill] sm:$0xff] }
 0x445   : > { %v5997_v9 = vsel %vm1159_vm4, %v5987_v10, %v5996_v3 }
 0x446   : > { %v6006_v13 = vsel %vm1159_vm4, %v5996_v3, %v6005_v6  ;;  %v6031_v16 = vrot.slane %v15343_v58, 2  ;;  %v15344_v3 = vshrl.u32 %v13830_v8, 16  ;;  %v15352_v58 = vld [vmem:[#allocation9_spill] sm:$0xff] }
 0x448   : > { %v6037_v37 = vrot.slane %v15344_v3, 1  ;;  %v15355_v3 = vld [vmem:[#allocation12_spill] sm:$0xff] }
 0x449   : > { %10494 = vmatmul.mubr.msk.bf16.gmra.mrb[0].mxu1 %vm4768_vm15, %v5979_v24  ;;  %v6013_v24 = vrot.slane %v15339_v21, 2  ;;  %v6044_v21 = vshrl.u32 %v13867_v34, 16 }
 0x44a   : > { %10497 = vmatprep.mubr.msk.bf16.mxu1 %vm4768_vm15, %v5988_v47  ;;  %v6022_v47 = vrot.slane %v15341_v43, 2 }
 0x44b   : > { %v6014_v50 = vor.u32 %v6013_v24, %v6010_v52  ;;  %v6032_v52 = vor.u32 %v6031_v16, %v6028_v56  ;;  %v6047_v24 = vshll.u32 %v13867_v34, 16  ;;  %v6046_v20 = vrot.slane %v6044_v21, 1  ;;  %v15350_v56 = vld [vmem:[#allocation7_spill] sm:$0xff]  ;;  %v15353_v16 = vld [vmem:[#allocation10_spill] sm:$0xff] }
 0x44c   : > { %v6023_v10 = vor.u32 %v6022_v47, %v6019_v41  ;;  %v15346_v47 = vld [vmem:[#allocation3_spill] sm:$0xff]  ;;  %v6781_v34 = vsel %vm4823_vm12, %v14417_v54, 0  ;;  %v15351_v54 = vld [vmem:[#allocation8_spill] sm:$0xff]  ;;  %v15361_v21 = vld [vmem:[#allocation18_spill] sm:$0xff] }
 0x44d   : > { %v6015_v36 = vsel %vm1159_vm4, %v6005_v6, %v6014_v50  ;;  %v6049_v41 = vrot.slane %v6047_v24, 2  ;;  %v15362_v24 = vld [vmem:[#allocation19_spill] sm:$0xff] }
 0x44e   : > { %v6024_v40 = vsel %vm1159_vm4, %v6014_v50, %v6023_v10  ;;  %v6033_v25 = vsel %vm1159_vm4, %v6023_v10, %v6032_v52  ;;  %v9431_v50 = vld [vmem:[%s15034_s2 + $0x18] sm:$0xf]  ;;  %v15347_v10 = vld [vmem:[#allocation4_spill] sm:$0xff] }
 0x451   : > { %10498 = vmatmul.mubr.msk.bf16.gmra.mrb[4].mxu1 %vm4768_vm15, %v5997_v9  ;;  %v15345_v9 = vshll.u32 %v13830_v8, 16  ;;  %v6050_v8 = vor.u32 %v6049_v41, %v6046_v20  ;;  %v7353_v20 = vsel %vm4823_vm12, %v9431_v50, 0  ;;  %v9469_v41 = vld [vmem:[%s15034_s2 + $0x1c] sm:$0xf] }
 0x452   : > { %10501 = vmatprep.mubr.msk.bf16.mxu1 %vm4768_vm15, %v6006_v13 }
 0x453   : > { %v6040_v38 = vrot.slane %v15345_v9, 2  ;;  %v15357_v9 = vld [vmem:[#allocation14_spill] sm:$0xff] }
 0x455   : > { %v6041_v6 = vor.u32 %v6040_v38, %v6037_v37  ;;  %v15356_v37 = vld [vmem:[#allocation13_spill] sm:$0xff]  ;;  %v15358_v38 = vld [vmem:[#allocation15_spill] sm:$0xff] }
 0x457   : > { %v6042_v13 = vsel %vm1159_vm4, %v6032_v52, %v6041_v6  ;;  %v6051_v43 = vsel %vm1159_vm4, %v6041_v6, %v6050_v8  ;;  %v15359_v52 = vld [vmem:[#allocation16_spill] sm:$0xff]  ;;  %v15360_v6 = vld [vmem:[#allocation17_spill] sm:$0xff]  ;;  %v15365_v8 = vld [vmem:[#allocation22_spill] sm:$0xff] }
 0x459   : > { %10502 = vmatmul.mubr.msk.bf16.gmra.mrb[8].mxu1 %vm4768_vm15, %v6015_v36  ;;  %v15348_v36 = vld [vmem:[#allocation5_spill] sm:$0xff] }
 0x45a   : > { %10505 = vmatprep.mubr.msk.bf16.mxu1 %vm4768_vm15, %v6024_v40  ;;  %v15354_v40 = vld [vmem:[#allocation11_spill] sm:$0xff] }
 0x461   : > { %10506 = vmatmul.mubr.msk.bf16.gmra.mrb[12].mxu1 %vm4768_vm15, %v6033_v25  ;;  %v15363_v25 = vld [vmem:[#allocation20_spill] sm:$0xff] }
 0x462   : > { %10509 = vmatprep.mubr.msk.bf16.mxu1 %vm4768_vm15, %v6042_v13  ;;  %v15364_v13 = vld [vmem:[#allocation21_spill] sm:$0xff] }
 0x469   : > { %10510 = vmatmul.mubr.msk.bf16.gmra.mrb[16].mxu1 %vm4768_vm15, %v6051_v43  ;;  %v15366_v43 = vld [vmem:[#allocation23_spill] sm:$0xff] }
 0x46a   : > { %10515 = vmatprep.mubr.msk.bf16.mxu1 %vm4768_vm15, %v15346_v47  ;;  %v15367_v47 = vld [vmem:[#allocation24_spill] sm:$0xff] }
 0x471   : > { %10516 = vmatmul.mubr.msk.bf16.vlgmr.msra.gmra.mrb[20].mxu1 %vm4768_vm15, %v15347_v10  ;;  %v15370_v10 = vld [vmem:[#allocation27_spill] sm:$0xff] }
 0x472   : > { %10552 = vmatpush3.bf16.msra.mxu1 %v6781_v34  ;;  %10519 = vmatprep.mubr.msk.bf16.mxu1 %vm4768_vm15, %v15348_v36  ;;  %v15368_v34 = vld [vmem:[#allocation25_spill] sm:$0xff]  ;;  %v15371_v36 = vld [vmem:[#allocation28_spill] sm:$0xff] }
 0x473   : > { %11443 = vmatprep.subr.msk.bf16.mxu1 %vm4823_vm12, %v9431_v50  ;;  %v15369_v50 = vld [vmem:[#allocation26_spill] sm:$0xff] }
 0x479   : > { %10520 = vmatmul.mubr.msk.bf16.gmra.mrb[24].mxu1 %vm4768_vm15, %v15349_v26  ;;  %v15372_v26 = vld [vmem:[#allocation29_spill] sm:$0xff] }
 0x47a   : > { %10523 = vmatprep.mubr.msk.bf16.mxu1 %vm4768_vm15, %v15350_v56  ;;  %v15373_v56 = vld [vmem:[#allocation30_spill] sm:$0xff] }
 0x481   : > { %10524 = vmatmul.mubr.msk.bf16.gmra.mrb[28].mxu1 %vm4768_vm15, %v15351_v54  ;;  %v15374_v54 = vld [vmem:[#allocation31_spill] sm:$0xff] }
 0x482   : > { %10527 = vmatprep.mubr.msk.bf16.mxu1 %vm4768_vm15, %v15352_v58  ;;  %v15375_v58 = vld [vmem:[#allocation32_spill] sm:$0xff] }
 0x489   : > { %10528 = vmatmul.mubr.msk.bf16.gmra.mrb[32].mxu1 %vm4768_vm15, %v15353_v16  ;;  %v15376_v16 = vld [vmem:[#allocation33_spill] sm:$0xff] }
 0x48a   : > { %10531 = vmatprep.mubr.msk.bf16.mxu1 %vm4768_vm15, %v15354_v40  ;;  %v6996_v40 = vld [vmem:[#allocation2 + $0x18] sm:$0xc] }
 0x491   : > { %10532 = vmatmul.mubr.msk.bf16.gmra.mrb[0].mxu1 %vm4768_vm15, %v15355_v3  ;;  %v15377_v3 = vld [vmem:[#allocation34_spill] sm:$0xff] }
 0x492   : > { %10535 = vmatprep.mubr.msk.bf16.mxu1 %vm4768_vm15, %v15356_v37  ;;  %v15378_v37 = vld [vmem:[#allocation36_spill] sm:$0xff] }
 0x499   : > { %10536 = vmatmul.mubr.msk.bf16.gmra.mrb[4].mxu1 %vm4768_vm15, %v15357_v9  ;;  %v11563_v9 = vld [vmem:[#allocation2 + $0xa0] ss:$0 sps:$4 sm:$0x77]  }
 0x49a   : > { %10539 = vmatprep.mubr.msk.bf16.mxu1 %vm4768_vm15, %v15358_v38  ;;  %v15379_v38 = vld [vmem:[#allocation40_spill] sm:$0xff] }
 0x4a1   : > { %10540 = vmatmul.mubr.msk.bf16.gmra.mrb[8].mxu1 %vm4768_vm15, %v15359_v52  ;;  %v9432_v52 = vcombine.low %v6996_v40, %v15379_v38  ;;  %v15385_v40 = vld [vmem:[#allocation35_spill] sm:$0xff]  ;;  %v15387_v38 = vshll.u32 %v14078_v4, 16 }
 0x4a2   : > { %10543 = vmatprep.mubr.msk.bf16.mxu1 %vm4768_vm15, %v15360_v6  ;;  %v6718_v6 = vshrl.u32 %v11563_v9, 16 }
 0x4a9   : > { %10544 = vmatmul.mubr.msk.bf16.gmra.mrb[12].mxu1 %vm4768_vm15, %v15361_v21  ;;  %v6721_v21 = vshll.u32 %v11563_v9, 16 }
 0x4aa   : > { %10547 = vmatprep.mubr.msk.bf16.mxu1 %vm4768_vm15, %v15362_v24  ;;  %v7129_v24 = vshrl.u32 %v9432_v52, 16 }
 0x4b1   : > { %10548 = vmatmul.mubr.msk.bf16.gmra.mrb[16].mxu1 %vm4768_vm15, %v15363_v25  ;;  %v7132_v25 = vshll.u32 %v9432_v52, 16  ;;  %v7151_v52 = vrot.slane %v15387_v38, 3 }
 0x4b2   : > { %10553 = vmatprep.mubr.msk.bf16.mxu1 %vm4768_vm15, %v15364_v13  ;;  %v15380_v13 = vld [vmem:[#allocation37_spill] sm:$0xff] }
 0x4b9   : > { %10554 = vmatmul.mubr.msk.bf16.vlgmr.msra.gmra.mrb[20].mxu1 %vm4768_vm15, %v15365_v8 }
 0x4ba   : > { %10590 = vmatpush3.bf16.msra.mxu1 %v7353_v20  ;;  %10557 = vmatprep.mubr.msk.bf16.mxu1 %vm4768_vm15, %v15366_v43  ;;  %v15381_v20 = vld [vmem:[#allocation39_spill] sm:$0xff] }
 0x4bb   : > { %11444 = vmatprep.subr.msk.bf16.mxu1 %vm4823_vm12, %v9469_v41  ;;  %v15382_v8 = vshrl.u32 %v15381_v20, 16 }
 0x4bd   : > { %v7139_v43 = vrot.slane %v15382_v8, 2 }
 0x4c1   : > { %10558 = vmatmul.mubr.msk.bf16.gmra.mrb[24].mxu1 %vm4768_vm15, %v15367_v47  ;;  %v15383_v47 = vshll.u32 %v15381_v20, 16 }
 0x4c2   : > { %10561 = vmatprep.mubr.msk.bf16.mxu1 %vm4768_vm15, %v15368_v34 }
 0x4c3   : > { %v7142_v34 = vrot.slane %v15383_v47, 3  ;;  %v7666_v47 = vsel %vm4823_vm12, %v9469_v41, 0 }
 0x4c9   : > { %10562 = vmatmul.mubr.msk.bf16.gmra.mrb[28].mxu1 %vm4768_vm15, %v15369_v50  ;;  %v15384_v50 = vld [vmem:[#allocation38_spill] sm:$0xff] }
 0x4ca   : > { %10565 = vmatprep.mubr.msk.bf16.mxu1 %vm4768_vm15, %v15370_v10  ;;  %v6720_v10 = vrot.slane %v6718_v6, 2  ;;  %v15388_v6 = vshrl.u32 %v14082_v1, 16 }
 0x4d1   : > { %10566 = vmatmul.mubr.msk.bf16.gmra.mrb[32].mxu1 %vm4768_vm15, %v15371_v36  ;;  %v6723_v36 = vrot.slane %v6721_v21, 3  ;;  %v7157_v21 = vrot.slane %v15388_v6, 2  ;;  %v15397_v6 = vshll.u32 %v14096_v29, 16 }
 0x4d2   : > { %10569 = vmatprep.mubr.msk.bf16.mxu1 %vm4768_vm15, %v15372_v26  ;;  %v7131_v26 = vrot.slane %v7129_v24, 2  ;;  %v15389_v24 = vshll.u32 %v14082_v1, 16 }
 0x4d9   : > { %10570 = vmatmul.mubr.msk.bf16.gmra.mrb[0].mxu1 %vm4768_vm15, %v15373_v56  ;;  %v7134_v56 = vrot.slane %v7132_v25, 3  ;;  %v7160_v25 = vrot.slane %v15389_v24, 3 }
 0x4da   : > { %10573 = vmatprep.mubr.msk.bf16.mxu1 %vm4768_vm15, %v15374_v54  ;;  %v7143_v54 = vor.u32 %v7142_v34, %v7139_v43 }
 0x4db   : > { %v7161_v43 = vor.u32 %v7160_v25, %v7157_v21  ;;  %v7196_v21 = vrot.slane %v15397_v6, 3 }
 0x4e1   : > { %10574 = vmatmul.mubr.msk.bf16.gmra.mrb[4].mxu1 %vm4768_vm15, %v15375_v58  ;;  %v6724_v58 = vor.u32 %v6723_v36, %v6720_v10  ;;  %v15391_v10 = vshll.u32 %v14084_v28, 16 }
 0x4e2   : > { %10577 = vmatprep.mubr.msk.bf16.mxu1 %vm4768_vm15, %v15376_v16  ;;  %v7135_v16 = vor.u32 %v7134_v56, %v7131_v26  ;;  %v14640_v26 = vld [vmem:[%s15034_s2 + $0x20] sm:$0xf]  ;;  %v15392_v56 = vshrl.u32 %v14088_v15, 16 }
 0x4e3   : > { %v7169_v36 = vrot.slane %v15391_v10, 3  ;;  %v15401_v10 = vshll.u32 %v14104_v23, 16 }
 0x4e4   : > { %v7175_v41 = vrot.slane %v15392_v56, 2 }
 0x4e9   : > { %10578 = vmatmul.mubr.msk.bf16.gmra.mrb[8].mxu1 %vm4768_vm15, %v15377_v3  ;;  %v6725_v3 = vsel %vm2407_vm6, %v15385_v40, %v6724_v58 }
 0x4ea   : > { %10581 = vmatprep.mubr.msk.bf16.mxu1 %vm4768_vm15, %v15378_v37  ;;  %v15386_v37 = vshrl.u32 %v14078_v4, 16  ;;  %v15390_v4 = vshrl.u32 %v14084_v28, 16 }
 0x4ec   : > { %v7148_v9 = vrot.slane %v15386_v37, 2 }
 0x4ee   : > { %v7152_v8 = vor.u32 %v7151_v52, %v7148_v9  ;;  %v15395_v9 = vshll.u32 %v14090_v48, 16  ;;  %v15396_v52 = vshrl.u32 %v14096_v29, 16 }
 0x4f0   : > { %v7153_v34 = vsel %vm2407_vm6, %v7143_v54, %v7152_v8  ;;  %v7162_v1 = vsel %vm2407_vm6, %v7152_v8, %v7161_v43  ;;  %v7187_v38 = vrot.slane %v15395_v9, 3 }
 0x4f1   : > { %10582 = vmatmul.mubr.msk.bf16.gmra.mrb[12].mxu1 %vm4768_vm15, %v15380_v13  ;;  %v7144_v13 = vsel %vm2407_vm6, %v7135_v16, %v7143_v54  ;;  %v15393_v54 = vshll.u32 %v14088_v15, 16 }
 0x4f2   : > { %10585 = vmatprep.mubr.msk.bf16.mxu1 %vm4768_vm15, %v15384_v50  ;;  %v7166_v50 = vrot.slane %v15390_v4, 2 }
 0x4f3   : > { %v7178_v58 = vrot.slane %v15393_v54, 3  ;;  %v15402_v54 = vshrl.u32 %v14106_v45, 16 }
 0x4f4   : > { %v7170_v28 = vor.u32 %v7169_v36, %v7166_v50  ;;  %v15400_v50 = vshrl.u32 %v14104_v23, 16  ;;  %v7214_v36 = vrot.slane %v15401_v10, 3  ;;  %v15412_v10 = vshrl.u32 %v14128_v35, 16 }
 0x4f5   : > { %v7179_v16 = vor.u32 %v7178_v58, %v7175_v41  ;;  %v15403_v58 = vshll.u32 %v14106_v45, 16 }
 0x4f6   : > { %v7171_v40 = vsel %vm2407_vm6, %v7161_v43, %v7170_v28  ;;  %v15398_v43 = vshrl.u32 %v14098_v33, 16  ;;  %v7211_v29 = vrot.slane %v15400_v50, 2 }
 0x4f7   : > { %v7180_v15 = vsel %vm2407_vm6, %v7170_v28, %v7179_v16  ;;  %v7223_v28 = vrot.slane %v15403_v58, 3  ;;  %v15415_v58 = vshll.u32 %v14134_v11, 16 }
 0x4f8   : > { %v7215_v56 = vor.u32 %v7214_v36, %v7211_v29  ;;  %v15413_v36 = vshll.u32 %v14128_v35, 16  ;;  %v15416_v35 = vshrl.u32 %v14142_v27, 16 }
 0x4f9   : > { %10586 = vmatmul.mubr.msk.bf16.gmra.mrb[16].mxu1 %vm4768_vm15, %v6725_v3  ;;  %v15394_v3 = vshrl.u32 %v14090_v48, 16  ;;  %v7202_v48 = vrot.slane %v15398_v43, 2 }
 0x4fa   : > { %10591 = vmatprep.mubr.msk.bf16.mxu1 %vm4768_vm15, %v7144_v13  ;;  %v7193_v13 = vrot.slane %v15396_v52, 2  ;;  %v15406_v52 = vshrl.u32 %v14114_v32, 16 }
 0x4fb   : > { %v7184_v37 = vrot.slane %v15394_v3, 2  ;;  %v15405_v3 = vshll.u32 %v14112_v5, 16 }
 0x4fc   : > { %v7197_v25 = vor.u32 %v7196_v21, %v7193_v13  ;;  %v7238_v45 = vrot.slane %v15406_v52, 2  ;;  %v15407_v13 = vshll.u32 %v14114_v32, 16 }
 0x4fd   : > { %v7188_v24 = vor.u32 %v7187_v38, %v7184_v37  ;;  %v7232_v37 = vrot.slane %v15405_v3, 3 }
 0x4fe   : > { %v7241_v6 = vrot.slane %v15407_v13, 3 }
 0x4ff   : > { %v7189_v8 = vsel %vm2407_vm6, %v7179_v16, %v7188_v24  ;;  %v7198_v4 = vsel %vm2407_vm6, %v7188_v24, %v7197_v25  ;;  %v15408_v24 = vshrl.u32 %v14120_v17, 16 }
 0x500   : > { %v7242_v43 = vor.u32 %v7241_v6, %v7238_v45 }
 0x501   : > { %10592 = vmatmul.mubr.msk.bf16.vlgmr.msra.gmra.mrb[20].mxu1 %vm4768_vm15, %v7153_v34 }
 0x502   : > { %10628 = vmatpush3.bf16.msra.mxu1 %v7666_v47  ;;  %10595 = vmatprep.mubr.msk.bf16.mxu1 %vm4768_vm15, %v7162_v1  ;;  %v15399_v47 = vshll.u32 %v14098_v33, 16  ;;  %v7220_v33 = vrot.slane %v15402_v54, 2 }
 0x503   : > { %11445 = vmatprep.subr.msk.bf16.mxu1 %vm4823_vm12, %v14640_v26 }
 0x504   : > { %v7205_v34 = vrot.slane %v15399_v47, 3  ;;  %v7224_v9 = vor.u32 %v7223_v28, %v7220_v33  ;;  %v15414_v33 = vshrl.u32 %v14134_v11, 16  ;;  %v7277_v28 = vrot.slane %v15415_v58, 3 }
 0x506   : > { %v7206_v1 = vor.u32 %v7205_v34, %v7202_v48  ;;  %v15410_v34 = vshrl.u32 %v14122_v19, 16 }
 0x508   : > { %v7207_v41 = vsel %vm2407_vm6, %v7197_v25, %v7206_v1  ;;  %v7216_v16 = vsel %vm2407_vm6, %v7206_v1, %v7215_v56  ;;  %v15409_v25 = vshll.u32 %v14120_v17, 16  ;;  %v7256_v32 = vrot.slane %v15410_v34, 2  ;;  %v15422_v34 = vld [vmem:[#allocation43_spill] sm:$0xff] }
 0x509   : > { %10596 = vmatmul.mubr.msk.bf16.gmra.mrb[24].mxu1 %vm4768_vm15, %v7171_v40  ;;  %v15404_v40 = vshrl.u32 %v14112_v5, 16  ;;  %v7247_v5 = vrot.slane %v15408_v24, 2  ;;  %v7265_v17 = vrot.slane %v15412_v10, 2  ;;  %v7268_v1 = vrot.slane %v15413_v36, 3  ;;  %v15419_v24 = vld [vmem:[#allocation42_spill] sm:$0xff]  ;;  %v15429_v10 = vld [vmem:[#allocation51_spill] sm:$0xff] }
 0x50a   : > { %10599 = vmatprep.mubr.msk.bf16.mxu1 %vm4768_vm15, %v7180_v15  ;;  %v7225_v15 = vsel %vm2407_vm6, %v7215_v56, %v7224_v9  ;;  %v15431_v36 = vld [vmem:[#allocation53_spill] sm:$0xff] }
 0x50b   : > { %v7229_v23 = vrot.slane %v15404_v40, 2  ;;  %v7283_v40 = vrot.slane %v15416_v35, 2  ;;  %v15440_v35 = vld [vmem:[#allocation62_spill] sm:$0xff] }
 0x50d   : > { %v7233_v38 = vor.u32 %v7232_v37, %v7229_v23  ;;  %v15417_v23 = vshll.u32 %v14142_v27, 16  ;;  %v7574_v27 = vrot.slane %v15419_v24, 3 }
 0x50f   : > { %v7234_v21 = vsel %vm2407_vm6, %v7224_v9, %v7233_v38  ;;  %v7243_v47 = vsel %vm2407_vm6, %v7233_v38, %v7242_v43  ;;  %v7286_v3 = vrot.slane %v15417_v23, 3  ;;  %v15418_v9 = vld [vmem:[#allocation45_spill] sm:$0xff]  ;;  %v15442_v23 = vld [vmem:[#allocation64_spill] sm:$0xff] }
 0x510   : > { %v7290_v38 = vshrl.u32 %v15418_v9, 16 }
 0x511   : > { %10600 = vmatmul.mubr.msk.bf16.gmra.mrb[28].mxu1 %vm4768_vm15, %v7189_v8  ;;  %v7250_v8 = vrot.slane %v15409_v25, 3  ;;  %v7287_v52 = vor.u32 %v7286_v3, %v7283_v40  ;;  %v15420_v25 = vrot.slane %v15381_v20, 3  ;;  %v15423_v20 = vld [vmem:[#allocation44_spill] sm:$0xff]  ;;  %v15441_v40 = vld [vmem:[#allocation63_spill] sm:$0xff]  ;;  %v15444_v3 = vld [vmem:[#allocation66_spill] sm:$0xff] }
 0x512   : > { %10603 = vmatprep.mubr.msk.bf16.mxu1 %vm4768_vm15, %v7198_v4  ;;  %v15411_v4 = vshll.u32 %v14122_v19, 16  ;;  %v7274_v19 = vrot.slane %v15414_v33, 2  ;;  %v7292_v45 = vrot.slane %v7290_v38, 2  ;;  %v15436_v33 = vld [vmem:[#allocation58_spill] sm:$0xff] }
 0x513   : > { %v7251_v48 = vor.u32 %v7250_v8, %v7247_v5  ;;  %v7576_v8 = vsel %vm3341_vm8, %v7574_v27, %v15420_v25 }
 0x514   : > { %v7259_v50 = vrot.slane %v15411_v4, 3  ;;  %v7278_v37 = vor.u32 %v7277_v28, %v7274_v19  ;;  %v15426_v4 = vld [vmem:[#allocation48_spill] sm:$0xff]  ;;  %v15437_v19 = vld [vmem:[#allocation59_spill] sm:$0xff] }
 0x515   : > { %v7252_v29 = vsel %vm2407_vm6, %v7242_v43, %v7251_v48  ;;  %v8027_v43 = vsel %vm4823_vm12, %v14640_v26, 0  ;;  %v15425_v26 = vld [vmem:[#allocation47_spill] sm:$0xff]  ;;  %v15438_v28 = vld [vmem:[#allocation60_spill] sm:$0xff] }
 0x516   : > { %v7260_v56 = vor.u32 %v7259_v50, %v7256_v32  ;;  %v7288_v6 = vsel %vm2407_vm6, %v7278_v37, %v7287_v52  ;;  %v15424_v32 = vld [vmem:[#allocation46_spill] sm:$0xff]  ;;  %v15427_v50 = vld [vmem:[#allocation49_spill] sm:$0xff] }
 0x518   : > { %v7261_v54 = vsel %vm2407_vm6, %v7251_v48, %v7260_v56  ;;  %v8321_v48 = vld [vmem:[%s15035_s3] sm:$0x3] }
 0x519   : > { %10604 = vmatmul.mubr.msk.bf16.gmra.mrb[32].mxu1 %vm4768_vm15, %v7207_v41  ;;  %v7269_v41 = vor.u32 %v7268_v1, %v7265_v17  ;;  %v15430_v17 = vld [vmem:[#allocation52_spill] sm:$0xff]  ;;  %v15432_v1 = vld [vmem:[#allocation54_spill] sm:$0xff]  ;;  %v8513_v58 = vsel %vm586_vm0, %v8321_v48, 0 }
 0x51a   : > { %10607 = vmatprep.mubr.msk.bf16.mxu1 %vm4768_vm15, %v7216_v16 }
 0x51b   : > { %v7270_v16 = vsel %vm2407_vm6, %v7260_v56, %v7269_v41  ;;  %v7279_v11 = vsel %vm2407_vm6, %v7269_v41, %v7278_v37  ;;  %v15433_v56 = vld [vmem:[#allocation55_spill] sm:$0xff]  ;;  %v15434_v41 = vld [vmem:[#allocation56_spill] sm:$0xff] }
 0x51c   : > { %v15445_v37 = vld [vmem:[#allocation67_spill] sm:$0xff] }
 0x521   : > { %10608 = vmatmul.mubr.msk.bf16.gmra.mrb[0].mxu1 %vm4768_vm15, %v7225_v15  ;;  %v7293_v15 = vshll.u32 %v15418_v9, 16  ;;  %v15446_v9 = vld [vmem:[#allocation68_spill] sm:$0xff] }
 0x522   : > { %10611 = vmatprep.mubr.msk.bf16.mxu1 %vm4768_vm15, %v7234_v21 }
 0x523   : > { %v7295_v13 = vrot.slane %v7293_v15, 3  ;;  %v11585_v15 = vld [vmem:[%s11681_s14 + $0x10] sm:$0xfc]  }
 0x525   : > { %v7296_v21 = vor.u32 %v7295_v13, %v7292_v45 }
 0x527   : > { %v7297_v5 = vsel %vm2407_vm6, %v7287_v52, %v7296_v21  ;;  %v11586_v52 = vld [vmem:[%s11681_s14 + $0x18] sm:$0xff]   ;;  %v11588_v21 = vld [vmem:[%s11681_s14 + $0x28] sm:$0xff]  }
 0x528   : > { %v8422_v13 = vrot.slane %v11586_v52, 2  ;;  %v8426_v27 = vrot.slane %v11588_v21, 2 }
 0x529   : > { %10612 = vmatmul.mubr.msk.bf16.gmra.mrb[4].mxu1 %vm4768_vm15, %v7243_v47  ;;  %v15421_v47 = vld [vmem:[#allocation41_spill] sm:$0xff] }
 0x52a   : > { %10615 = vmatprep.mubr.msk.bf16.mxu1 %vm4768_vm15, %v7252_v29  ;;  %v15428_v29 = vld [vmem:[#allocation50_spill] sm:$0xff] }
 0x531   : > { %10616 = vmatmul.mubr.msk.bf16.gmra.mrb[8].mxu1 %vm4768_vm15, %v7261_v54  ;;  %v15435_v54 = vld [vmem:[#allocation57_spill] sm:$0xff] }
 0x532   : > { %10619 = vmatprep.mubr.msk.bf16.mxu1 %vm4768_vm15, %v7270_v16  ;;  %v15439_v16 = vld [vmem:[#allocation61_spill] sm:$0xff] }
 0x539   : > { %10620 = vmatmul.mubr.msk.bf16.gmra.mrb[12].mxu1 %vm4768_vm15, %v7279_v11 }
 0x53a   : > { %10623 = vmatprep.mubr.msk.bf16.mxu1 %vm4768_vm15, %v7288_v6  ;;  %v11587_v6 = vld [vmem:[%s11681_s14 + $0x20] sm:$0xff]  }
 0x541   : > { %10624 = vmatmul.mubr.msk.bf16.gmra.mrb[16].mxu1 %vm4768_vm15, %v7297_v5  ;;  %v11589_v5 = vld [vmem:[%s11681_s14 + $0x30] sm:$0xff]  }
 0x542   : > { %10629 = vmatprep.mubr.msk.bf16.mxu1 %vm4768_vm15, %v7576_v8  ;;  %v11590_v8 = vld [vmem:[%s11681_s14 + $0x38] sm:$0xff]  }
 0x549   : > { %10630 = vmatmul.mubr.msk.bf16.vlgmr.msra.gmra.mrb[20].mxu1 %vm4768_vm15, %v15421_v47  ;;  %v11591_v47 = vld [vmem:[%s11681_s14 + $0x40] sm:$0xff]  }
 0x54a   : > { %10666 = vmatpush3.bf16.msra.mxu1 %v8027_v43  ;;  %10633 = vmatprep.mubr.msk.bf16.mxu1 %vm4768_vm15, %v15422_v34  ;;  %v8430_v43 = vrot.slane %v11590_v8, 2 }
 0x54b   : > { %11446 = vmatprep.subr.msk.bf16.mxu1 %vm586_vm0, %v8321_v48 }
 0x551   : > { %10634 = vmatmul.mubr.msk.bf16.gmra.mrb[24].mxu1 %vm4768_vm15, %v15423_v20  ;;  %v11592_v20 = vld [vmem:[%s11681_s14 + $0x48] sm:$0xff]  }
 0x552   : > { %10637 = vmatprep.mubr.msk.bf16.mxu1 %vm4768_vm15, %v15424_v32  ;;  %v8432_v32 = vrot.slane %v11591_v47, 2 }
 0x559   : > { %10638 = vmatmul.mubr.msk.bf16.gmra.mrb[28].mxu1 %vm4768_vm15, %v15425_v26  ;;  %v8434_v26 = vrot.slane %v11592_v20, 2 }
 0x55a   : > { %10641 = vmatprep.mubr.msk.bf16.mxu1 %vm4768_vm15, %v15426_v4  ;;  %v8433_v4 = vsel %vm2093_vm5, %v8430_v43, %v8432_v32 }
 0x561   : > { %10642 = vmatmul.mubr.msk.bf16.gmra.mrb[32].mxu1 %vm4768_vm15, %v15427_v50  ;;  %v11593_v50 = vld [vmem:[%s11681_s14 + $0x50] sm:$0xff]  }
 0x562   : > { %10645 = vmatprep.mubr.msk.bf16.mxu1 %vm4768_vm15, %v15428_v29  ;;  %v8435_v29 = vsel %vm2093_vm5, %v8432_v32, %v8434_v26 }
 0x569   : > { %10646 = vmatmul.mubr.msk.bf16.gmra.mrb[0].mxu1 %vm4768_vm15, %v15429_v10  ;;  %v11594_v10 = vld [vmem:[%s11681_s14 + $0x58] sm:$0xff]  }
 0x56a   : > { %10649 = vmatprep.mubr.msk.bf16.mxu1 %vm4768_vm15, %v15430_v17  ;;  %v8436_v17 = vrot.slane %v11593_v50, 2 }
 0x571   : > { %10650 = vmatmul.mubr.msk.bf16.gmra.mrb[4].mxu1 %vm4768_vm15, %v15431_v36  ;;  %v8438_v36 = vrot.slane %v11594_v10, 2 }
 0x572   : > { %10653 = vmatprep.mubr.msk.bf16.mxu1 %vm4768_vm15, %v15432_v1  ;;  %v8437_v1 = vsel %vm2093_vm5, %v8434_v26, %v8436_v17 }
 0x579   : > { %10654 = vmatmul.mubr.msk.bf16.gmra.mrb[8].mxu1 %vm4768_vm15, %v15433_v56  ;;  %v11595_v56 = vld [vmem:[%s11681_s14 + $0x60] sm:$0xff]  }
 0x57a   : > { %10657 = vmatprep.mubr.msk.bf16.mxu1 %vm4768_vm15, %v15434_v41  ;;  %v8439_v41 = vsel %vm2093_vm5, %v8436_v17, %v8438_v36 }
 0x581   : > { %10658 = vmatmul.mubr.msk.bf16.gmra.mrb[12].mxu1 %vm4768_vm15, %v15435_v54  ;;  %v11596_v54 = vld [vmem:[%s11681_s14 + $0x68] sm:$0xff]  }
 0x582   : > { %10661 = vmatprep.mubr.msk.bf16.mxu1 %vm4768_vm15, %v15436_v33  ;;  %v8440_v33 = vrot.slane %v11595_v56, 2 }
 0x589   : > { %10662 = vmatmul.mubr.msk.bf16.gmra.mrb[16].mxu1 %vm4768_vm15, %v15437_v19  ;;  %v8442_v19 = vrot.slane %v11596_v54, 2 }
 0x58a   : > { %10667 = vmatprep.mubr.msk.bf16.mxu1 %vm4768_vm15, %v14267_v18  ;;  %v15443_v18 = vld [vmem:[#allocation65_spill] sm:$0xff] }
 0x591   : > { %10668 = vmatmul.mubr.msk.bf16.vlgmr.msra.gmra.mrb[20].mxu1 %vm4768_vm15, %v15438_v28  ;;  %v11597_v28 = vld [vmem:[%s11681_s14 + $0x70] sm:$0xff]  }
 0x592   : > { %10704 = vmatpush3.bf16.msra.mxu1 %v8513_v58  ;;  %10671 = vmatprep.mubr.msk.bf16.mxu1 %vm4768_vm15, %v15439_v16  ;;  %v8441_v58 = vsel %vm2093_vm5, %v8438_v36, %v8440_v33  ;;  %v8443_v16 = vsel %vm2093_vm5, %v8440_v33, %v8442_v19 }
 0x599   : > { %10672 = vmatmul.mubr.msk.bf16.gmra.mrb[24].mxu1 %vm4768_vm15, %v15440_v35  ;;  %v11598_v35 = vld [vmem:[%s11681_s14 + $0x78] sm:$0xff]  }
 0x59a   : > { %10675 = vmatprep.mubr.msk.bf16.mxu1 %vm4768_vm15, %v15441_v40  ;;  %v8444_v40 = vrot.slane %v11597_v28, 2 }
 0x5a1   : > { %10676 = vmatmul.mubr.msk.bf16.gmra.mrb[28].mxu1 %vm4768_vm15, %v15442_v23  ;;  %v8446_v23 = vrot.slane %v11598_v35, 2 }
 0x5a2   : > { %10679 = vmatprep.mubr.msk.bf16.mxu1 %vm4768_vm15, %v14303_v55  ;;  %v11584_v55 = vld [vmem:[#allocation2 + $0xa8] ss:$0 sps:$4 sm:$0xff]  }
 0x5a3   : > { %v7967_v38 = vshll.u32 %v11584_v55, 16 }
 0x5a5   : > { %v7969_v45 = vrot.slane %v7967_v38, 4 }
 0x5a9   : > { %10680 = vmatmul.mubr.msk.bf16.gmra.mrb[32].mxu1 %vm4768_vm15, %v14316_v60  ;;  %v7964_v60 = vshrl.u32 %v11584_v55, 16 }
 0x5aa   : > { %10683 = vmatprep.mubr.msk.bf16.mxu1 %vm4768_vm15, %v15443_v18  ;;  %v8445_v18 = vsel %vm2093_vm5, %v8442_v19, %v8444_v40 }
 0x5ab   : > { %v7966_v11 = vrot.slane %v7964_v60, 3 }
 0x5b1   : > { %10684 = vmatmul.mubr.msk.bf16.gmra.mrb[0].mxu1 %vm4768_vm15, %v15444_v3  ;;  %v11599_v3 = vld [vmem:[%s11681_s14 + $0x80] sm:$0xff]  }
 0x5b2   : > { %10687 = vmatprep.mubr.msk.bf16.mxu1 %vm4768_vm15, %v15445_v37  ;;  %v8447_v37 = vsel %vm2093_vm5, %v8444_v40, %v8446_v23  ;;  %v8448_v55 = vrot.slane %v11599_v3, 2 }
 0x5b4   : > { %v8449_v38 = vsel %vm2093_vm5, %v8446_v23, %v8448_v55 }
 0x5b9   : > { %10688 = vmatmul.mubr.msk.bf16.gmra.mrb[4].mxu1 %vm4768_vm15, %v15446_v9  ;;  %v11600_v9 = vld [vmem:[%s11681_s14 + $0x88] sm:$0xff]  }
 0x5ba   : > { %10691 = vmatprep.mubr.msk.bf16.mxu1 %vm4768_vm15, %v14349_v51  ;;  %v8421_v51 = vrot.slane %v11585_v15, 2  ;;  %v8450_v60 = vrot.slane %v11600_v9, 2  ;;  %v11601_v15 = vld [vmem:[%s11681_s14 + $0x90] sm:$0xff]  }
 0x5bc   : > { %v8451_v52 = vsel %vm2093_vm5, %v8448_v55, %v8450_v60 }
 0x5c1   : > { %10692 = vmatmul.mubr.msk.bf16.gmra.mrb[8].mxu1 %vm4768_vm15, %v14358_v46  ;;  %v7970_v46 = vor.u32 %v7969_v45, %v7966_v11  ;;  %v11602_v11 = vld [vmem:[%s11681_s14 + $0x98] sm:$0xff]   ;;  %v8452_v45 = vrot.slane %v11601_v15, 2 }
 0x5c2   : > { %10695 = vmatprep.mubr.msk.bf16.mxu1 %vm4768_vm15, %v14367_v2  ;;  %v8423_v2 = vsel %vm2093_vm5, %v8421_v51, %v8422_v13  ;;  %v8454_v51 = vrot.slane %v11602_v11, 2 }
 0x5c3   : > { %v7971_v24 = vsel %vm3655_vm9, %v14360_v0, %v7970_v46  ;;  %v8428_v0 = vrot.slane %v11589_v5, 2  ;;  %v11603_v46 = vld [vmem:[%s11681_s14 + $0xa0] ss:$0 sps:$4 sm:$0x33]  }
 0x5c5   : > { %v8429_v48 = vsel %vm2093_vm5, %v8426_v27, %v8428_v0  ;;  %v8431_v34 = vsel %vm2093_vm5, %v8428_v0, %v8430_v43 }
 0x5c9   : > { %10696 = vmatmul.mubr.msk.bf16.gmra.mrb[12].mxu1 %vm4768_vm15, %v14370_v62  ;;  %v8424_v62 = vrot.slane %v11587_v6, 2  ;;  %v8455_v6 = vsel %vm2093_vm5, %v8452_v45, %v8454_v51 }
 0x5ca   : > { %10699 = vmatprep.mubr.msk.bf16.mxu1 %vm4768_vm15, %v14382_v63 }
 0x5cb   : > { %v8425_v63 = vsel %vm2093_vm5, %v8422_v13, %v8424_v62  ;;  %v8427_v25 = vsel %vm2093_vm5, %v8424_v62, %v8426_v27  ;;  %v8453_v13 = vsel %vm2093_vm5, %v8450_v60, %v8452_v45 }
 0x5d1   : > { %10700 = vmatmul.mubr.msk.bf16.gmra.mrb[16].mxu1 %vm4768_vm15, %v7971_v24  ;;  %v14872_v24 = vld [vmem:[%s15038_s6] ss:$0 sm:$0xff] }
 0x5d2   : > { %10705 = vmatprep.mubr.msk.bf16.mxu1 %vm531_vm2, %v8423_v2  ;;  %v8456_v2 = vrot.slane %v11603_v46, 2  ;;  %v10749_v62 = vadd.f32 %v14403_v39, %v14872_v24  ;;  %v10752_v27 = vadd.f32 %v14872_v24, %v14405_v57  ;;  %v10743_v5 = vadd.f32 %v14394_v31, %v14872_v24 }
 0x5d3   : > { %v10761_v50 = vadd.f32 %v14432_v49, %v14872_v24  ;;  %v10764_v17 = vadd.f32 %v14872_v24, %v14434_v61  ;;  %v10767_v40 = vadd.f32 %v14448_v14, %v14872_v24  ;;  %v10773_v60 = vadd.f32 %v14452_v53, %v14872_v24 }
 0x5d4   : > { %v8457_v21 = vsel %vm2093_vm5, %v8454_v51, %v8456_v2 }
 0x5d9   : > { %10706 = vmatmul.mubr.msk.bf16.vlgmr.msra.gmra.mrb[20].mxu1 %vm531_vm2, %v8425_v63  ;;  %v14881_v63 = vld [vmem:[%s15039_s7] ss:$0 sm:$0xff] }
 0x5da   : > { %10709 = vmatprep.mubr.msk.bf16.mxu1 %vm531_vm2, %v8427_v25  ;;  %v10746_v25 = vadd.f32 %v14872_v24, %v14401_v42  ;;  %v10753_v57 = vadd.f32 %v10752_v27, %v14881_v63  ;;  %v10758_v42 = vadd.f32 %v14872_v24, %v14428_v22  ;;  %v10765_v35 = vadd.f32 %v10764_v17, %v14881_v63 }
 0x5db   : > { %v10768_v51 = vadd.f32 %v10767_v40, %v14881_v63  ;;  %v10774_v2 = vadd.f32 %v10773_v60, %v14881_v63  ;;  %v10779_v27 = vadd.f32 %v14468_v44, %v14872_v24 }
 0x5dc   : > { %v10759_v61 = vadd.f32 %v10758_v42, %v14881_v63 }
 0x5e1   : > { %10710 = vmatmul.mubr.msk.bf16.gmra.mrb[24].mxu1 %vm531_vm2, %v8429_v48  ;;  %v10750_v48 = vadd.f32 %v10749_v62, %v14881_v63 }
 0x5e2   : > { %10713 = vmatprep.mubr.msk.bf16.mxu1 %vm531_vm2, %v8431_v34  ;;  %v10755_v34 = vadd.f32 %v14426_v7, %v14872_v24 }
 0x5e4   : > { %v10756_v49 = vadd.f32 %v10755_v34, %v14881_v63 }
 0x5e9   : > { %10714 = vmatmul.mubr.msk.bf16.gmra.mrb[28].mxu1 %vm531_vm2, %v8433_v4 }
 0x5ea   : > { %10717 = vmatprep.mubr.msk.bf16.mxu1 %vm531_vm2, %v8435_v29 }
 0x5f1   : > { %10718 = vmatmul.mubr.msk.bf16.gmra.mrb[32].mxu1 %vm531_vm2, %v8437_v1 }
 0x5f2   : > { %10721 = vmatprep.mubr.msk.bf16.mxu1 %vm531_vm2, %v8439_v41 }
 0x5f9   : > { %10722 = vmatmul.mubr.msk.bf16.gmra.mrb[0].mxu1 %vm531_vm2, %v8441_v58  ;;  %v10762_v58 = vadd.f32 %v10761_v50, %v14881_v63 }
 0x5fa   : > { %10725 = vmatprep.mubr.msk.bf16.mxu1 %vm531_vm2, %v8443_v16 }
 0x601   : > { %10726 = vmatmul.mubr.msk.bf16.gmra.mrb[4].mxu1 %vm531_vm2, %v8445_v18 }
 0x602   : > { %10729 = vmatprep.mubr.msk.bf16.mxu1 %vm531_vm2, %v8447_v37  ;;  %v10770_v37 = vadd.f32 %v14872_v24, %v14450_v12 }
 0x604   : > { %v10771_v46 = vadd.f32 %v10770_v37, %v14881_v63 }
 0x609   : > { %10730 = vmatmul.mubr.msk.bf16.gmra.mrb[8].mxu1 %vm531_vm2, %v8449_v38 }
 0x60a   : > { %10733 = vmatprep.mubr.msk.bf16.mxu1 %vm531_vm2, %v8451_v52  ;;  %v10776_v52 = vadd.f32 %v14872_v24, %v14454_v30 }
 0x60c   : > { %v10777_v62 = vadd.f32 %v10776_v52, %v14881_v63 }
 0x611   : > { %10734 = vmatmul.mubr.msk.bf16.gmra.mrb[12].mxu1 %vm531_vm2, %v8453_v13 }
 0x612   : > { %10737 = vmatprep.mubr.msk.bf16.mxu1 %vm531_vm2, %v8455_v6 }
 0x619   : > { %10738 = vmatmul.mubr.msk.bf16.gmra.mrb[16].mxu1 %vm531_vm2, %v8457_v21 }
 0x6ac   : > { %v10707_v8 = vpop.f32.mrb[20].mxu1 }
 0x6ad   : > { %v10744_v0 = vadd.f32 %v10743_v5, %v10707_v8  ;;  %v8549_v43 = vpop.f32.mrb[21].mxu1 }
 0x6ae   : > { %v10747_v39 = vadd.f32 %v10746_v25, %v8549_v43  ;;  %v10708_v47 = vpop.f32.mrb[22].mxu1 }
 0x6af   : > { %v10745_v20 = vadd.f32 %v10744_v0, %v14881_v63  ;;  %v10751_v32 = vadd.f32 %v10750_v48, %v10708_v47  ;;  %v8552_v31 = vpop.f32.mrb[23].mxu1  ;;  %v15447_v0 = vld [vmem:[#allocation69_spill] sm:$0xff]  ;;  %v10785_v47 = vadd.f32 %v14472_v59, %v14872_v24 }
 0x6b0   : > { %v10748_v26 = vadd.f32 %v10747_v39, %v14881_v63  ;;  %v10754_v4 = vadd.f32 %v10753_v57, %v8552_v31  ;;  %v10782_v43 = vadd.f32 %v14872_v24, %v15447_v0 }
 0x6b1   : > { %v8730_v29 = vmax.f32 %v10745_v20, 0.0  ;;  %v8731_v10 = vmax.f32 %v10751_v32, 0.0  ;;  %v15448_v20 = vld [vmem:[#allocation70_spill] sm:$0xff]  ;;  %v10786_v17 = vadd.f32 %v10785_v47, %v14881_v63 }
 0x6b2   : > { %v8728_v7 = vmax.f32 %v10748_v26, 0.0  ;;  %v8729_v22 = vmax.f32 %v10754_v4, 0.0  ;;  %v10788_v32 = vadd.f32 %v14872_v24, %v15448_v20  ;;  %v10780_v26 = vadd.f32 %v10779_v27, %v14881_v63 }
 0x6b3   : > { %v9624_v36 = vpack.c.bf16 %v8730_v29, %v8730_v29  ;;  %v9625_v1 = vpack.c.bf16 %v8731_v10, %v8731_v10  ;;  %v10783_v29 = vadd.f32 %v10782_v43, %v14881_v63 }
 0x6b4   : > { %v9622_v56 = vpack.c.bf16 %v8728_v7, %v8728_v7  ;;  %v9623_v41 = vpack.c.bf16 %v8729_v22, %v8729_v22  ;;  %v10711_v54 = vpop.f32.mrb[24].mxu1 }
 0x6b5   : > { %8910 = vst.msk [vmem:[%s14903_s13 + $0x8] sm:$0xf] %vm307_vm7, %v9624_v36  ;;  %8911 = vst.msk [vmem:[%s14903_s13 + $0xc] sm:$0xf] %vm307_vm7, %v9625_v1  ;;  %v10757_v33 = vadd.f32 %v10756_v49, %v10711_v54  ;;  %v8565_v19 = vpop.f32.mrb[25].mxu1  ;;  %v10789_v36 = vadd.f32 %v10788_v32, %v14881_v63 }
 0x6b6   : > { %8908 = vst.msk [vmem:[%s14903_s13] sm:$0xf] %vm307_vm7, %v9622_v56  ;;  %8909 = vst.msk [vmem:[%s14903_s13 + $0x4] sm:$0xf] %vm307_vm7, %v9623_v41  ;;  %v10760_v28 = vadd.f32 %v10759_v61, %v8565_v19  ;;  %v10712_v16 = vpop.f32.mrb[26].mxu1  ;;  %v14959_v61 = vadd.f32 %v14881_v63, %v14872_v24 }
 0x6b7   : > { %v8734_v23 = vmax.f32 %v10757_v33, 0.0  ;;  %v10763_v18 = vadd.f32 %v10762_v58, %v10712_v16  ;;  %v8568_v3 = vpop.f32.mrb[27].mxu1 }
 0x6b8   : > { %v8732_v9 = vmax.f32 %v10760_v28, 0.0  ;;  %v10766_v55 = vadd.f32 %v10765_v35, %v8568_v3 }
 0x6b9   : > { %v9628_v38 = vpack.c.bf16 %v8734_v23, %v8734_v23  ;;  %v8735_v15 = vmax.f32 %v10763_v18, 0.0 }
 0x6ba   : > { %v9626_v14 = vpack.c.bf16 %v8732_v9, %v8732_v9  ;;  %v8733_v11 = vmax.f32 %v10766_v55, 0.0 }
 0x6bb   : > { %8914 = vst.msk [vmem:[%s14903_s13 + $0x18] sm:$0xf] %vm307_vm7, %v9628_v38  ;;  %v9629_v45 = vpack.c.bf16 %v8735_v15, %v8735_v15 }
 0x6bc   : > { %8912 = vst.msk [vmem:[%s14903_s13 + $0x10] sm:$0xf] %vm307_vm7, %v9626_v14  ;;  %v9627_v12 = vpack.c.bf16 %v8733_v11, %v8733_v11  ;;  %v10715_v13 = vpop.f32.mrb[28].mxu1 }
 0x6bd   : > { %8915 = vst.msk [vmem:[%s14903_s13 + $0x1c] sm:$0xf] %vm307_vm7, %v9629_v45  ;;  %v10769_v53 = vadd.f32 %v10768_v51, %v10715_v13  ;;  %v8581_v6 = vpop.f32.mrb[29].mxu1 }
 0x6be   : > { %8913 = vst.msk [vmem:[%s14903_s13 + $0x14] sm:$0xf] %vm307_vm7, %v9627_v12  ;;  %v10772_v30 = vadd.f32 %v10771_v46, %v8581_v6  ;;  %v10716_v21 = vpop.f32.mrb[30].mxu1 }
 0x6bf   : > { %v8738_v5 = vmax.f32 %v10769_v53, 0.0  ;;  %v10775_v25 = vadd.f32 %v10774_v2, %v10716_v21  ;;  %v8584_v8 = vpop.f32.mrb[31].mxu1 }
 0x6c0   : > { %v8736_v48 = vmax.f32 %v10772_v30, 0.0  ;;  %v10778_v39 = vadd.f32 %v10777_v62, %v8584_v8 }
 0x6c1   : > { %v9632_v57 = vpack.c.bf16 %v8738_v5, %v8738_v5  ;;  %v8739_v34 = vmax.f32 %v10775_v25, 0.0 }
 0x6c2   : > { %v9630_v44 = vpack.c.bf16 %v8736_v48, %v8736_v48  ;;  %v8737_v31 = vmax.f32 %v10778_v39, 0.0 }
 0x6c3   : > { %8918 = vst.msk [vmem:[%s14903_s13 + $0x28] sm:$0xf] %vm307_vm7, %v9632_v57  ;;  %v9633_v42 = vpack.c.bf16 %v8739_v34, %v8739_v34 }
 0x6c4   : > { %8916 = vst.msk [vmem:[%s14903_s13 + $0x20] sm:$0xf] %vm307_vm7, %v9630_v44  ;;  %v9631_v4 = vpack.c.bf16 %v8737_v31, %v8737_v31  ;;  %v10719_v50 = vpop.f32.mrb[32].mxu1 }
 0x6c5   : > { %8919 = vst.msk [vmem:[%s14903_s13 + $0x2c] sm:$0xf] %vm307_vm7, %v9633_v42  ;;  %v10781_v59 = vadd.f32 %v10780_v26, %v10719_v50  ;;  %v8597_v10 = vpop.f32.mrb[33].mxu1 }
 0x6c6   : > { %8917 = vst.msk [vmem:[%s14903_s13 + $0x24] sm:$0xf] %vm307_vm7, %v9631_v4  ;;  %v10784_v7 = vadd.f32 %v10783_v29, %v8597_v10  ;;  %v10720_v22 = vpop.f32.mrb[34].mxu1 }
 0x6c7   : > { %v8742_v1 = vmax.f32 %v10781_v59, 0.0  ;;  %v10787_v49 = vadd.f32 %v10786_v17, %v10720_v22  ;;  %v8600_v56 = vpop.f32.mrb[35].mxu1 }
 0x6c8   : > { %v8740_v41 = vmax.f32 %v10784_v7, 0.0  ;;  %v10790_v54 = vadd.f32 %v10789_v36, %v8600_v56 }
 0x6c9   : > { %v9636_v33 = vpack.c.bf16 %v8742_v1, %v8742_v1  ;;  %v8743_v19 = vmax.f32 %v10787_v49, 0.0 }
 0x6ca   : > { %v9634_v58 = vpack.c.bf16 %v8740_v41, %v8740_v41  ;;  %v8741_v28 = vmax.f32 %v10790_v54, 0.0 }
 0x6cb   : > { %8922 = vst.msk [vmem:[%s14903_s13 + $0x38] sm:$0xf] %vm307_vm7, %v9636_v33  ;;  %v9637_v16 = vpack.c.bf16 %v8743_v19, %v8743_v19 }
 0x6cc   : > { %8920 = vst.msk [vmem:[%s14903_s13 + $0x30] sm:$0xf] %vm307_vm7, %v9634_v58  ;;  %v9635_v35 = vpack.c.bf16 %v8741_v28, %v8741_v28  ;;  %v10723_v40 = vpop.f32.mrb[0].mxu1 }
 0x6cd   : > { %8923 = vst.msk [vmem:[%s14903_s13 + $0x3c] sm:$0xf] %vm307_vm7, %v9637_v16  ;;  %v10792_v23 = vadd.f32 %v14959_v61, %v10723_v40  ;;  %v8613_v18 = vpop.f32.mrb[1].mxu1 }
 0x6ce   : > { %8921 = vst.msk [vmem:[%s14903_s13 + $0x34] sm:$0xf] %vm307_vm7, %v9635_v35  ;;  %v10794_v24 = vadd.f32 %v14959_v61, %v8613_v18  ;;  %v10724_v63 = vpop.f32.mrb[2].mxu1 }
 0x6cf   : > { %v8746_v3 = vmax.f32 %v10792_v23, 0.0  ;;  %v10796_v37 = vadd.f32 %v14959_v61, %v10724_v63  ;;  %v8616_v9 = vpop.f32.mrb[3].mxu1 }
 0x6d0   : > { %v8744_v55 = vmax.f32 %v10794_v24, 0.0  ;;  %v10798_v60 = vadd.f32 %v14959_v61, %v8616_v9 }
 0x6d1   : > { %v9640_v38 = vpack.c.bf16 %v8746_v3, %v8746_v3  ;;  %v8747_v15 = vmax.f32 %v10796_v37, 0.0 }
 0x6d2   : > { %v9638_v52 = vpack.c.bf16 %v8744_v55, %v8744_v55  ;;  %v8745_v14 = vmax.f32 %v10798_v60, 0.0 }
 0x6d3   : > { %8926 = vst.msk [vmem:[%s14903_s13 + $0x48] sm:$0xf] %vm307_vm7, %v9640_v38  ;;  %v9641_v11 = vpack.c.bf16 %v8747_v15, %v8747_v15 }
 0x6d4   : > { %8924 = vst.msk [vmem:[%s14903_s13 + $0x40] sm:$0xf] %vm307_vm7, %v9638_v52  ;;  %v9639_v45 = vpack.c.bf16 %v8745_v14, %v8745_v14  ;;  %v10727_v51 = vpop.f32.mrb[4].mxu1 }
 0x6d5   : > { %8927 = vst.msk [vmem:[%s14903_s13 + $0x4c] sm:$0xf] %vm307_vm7, %v9641_v11  ;;  %v10800_v12 = vadd.f32 %v14959_v61, %v10727_v51  ;;  %v8629_v13 = vpop.f32.mrb[5].mxu1 }
 0x6d6   : > { %8925 = vst.msk [vmem:[%s14903_s13 + $0x44] sm:$0xf] %vm307_vm7, %v9639_v45  ;;  %v10802_v46 = vadd.f32 %v14959_v61, %v8629_v13  ;;  %v10728_v53 = vpop.f32.mrb[6].mxu1 }
 0x6d7   : > { %v8750_v6 = vmax.f32 %v10800_v12, 0.0  ;;  %v10804_v2 = vadd.f32 %v14959_v61, %v10728_v53  ;;  %v8632_v30 = vpop.f32.mrb[7].mxu1 }
 0x6d8   : > { %v8748_v21 = vmax.f32 %v10802_v46, 0.0  ;;  %v10806_v62 = vadd.f32 %v14959_v61, %v8632_v30 }
 0x6d9   : > { %v9644_v27 = vpack.c.bf16 %v8750_v6, %v8750_v6  ;;  %v8751_v5 = vmax.f32 %v10804_v2, 0.0 }
 0x6da   : > { %v9642_v25 = vpack.c.bf16 %v8748_v21, %v8748_v21  ;;  %v8749_v8 = vmax.f32 %v10806_v62, 0.0 }
 0x6db   : > { %8930 = vst.msk [vmem:[%s14903_s13 + $0x58] sm:$0xf] %vm307_vm7, %v9644_v27  ;;  %v9645_v0 = vpack.c.bf16 %v8751_v5, %v8751_v5 }
 0x6dc   : > { %8928 = vst.msk [vmem:[%s14903_s13 + $0x50] sm:$0xf] %vm307_vm7, %v9642_v25  ;;  %v9643_v43 = vpack.c.bf16 %v8749_v8, %v8749_v8  ;;  %v10731_v48 = vpop.f32.mrb[8].mxu1 }
 0x6dd   : > { %8931 = vst.msk [vmem:[%s14903_s13 + $0x5c] sm:$0xf] %vm307_vm7, %v9645_v0  ;;  %v10808_v39 = vadd.f32 %v14959_v61, %v10731_v48  ;;  %v8645_v47 = vpop.f32.mrb[9].mxu1 }
 0x6de   : > { %8929 = vst.msk [vmem:[%s14903_s13 + $0x54] sm:$0xf] %vm307_vm7, %v9643_v43  ;;  %v10810_v57 = vadd.f32 %v14959_v61, %v8645_v47  ;;  %v10732_v34 = vpop.f32.mrb[10].mxu1 }
 0x6df   : > { %v8754_v20 = vmax.f32 %v10808_v39, 0.0  ;;  %v10812_v32 = vadd.f32 %v14959_v61, %v10732_v34  ;;  %v8648_v44 = vpop.f32.mrb[11].mxu1 }
 0x6e0   : > { %v8752_v31 = vmax.f32 %v10810_v57, 0.0  ;;  %v10814_v42 = vadd.f32 %v14959_v61, %v8648_v44 }
 0x6e1   : > { %v9648_v26 = vpack.c.bf16 %v8754_v20, %v8754_v20  ;;  %v8755_v4 = vmax.f32 %v10812_v32, 0.0 }
 0x6e2   : > { %v9646_v50 = vpack.c.bf16 %v8752_v31, %v8752_v31  ;;  %v8753_v29 = vmax.f32 %v10814_v42, 0.0 }
 0x6e3   : > { %8934 = vst.msk [vmem:[%s14903_s13 + $0x68] sm:$0xf] %vm307_vm7, %v9648_v26  ;;  %v9649_v59 = vpack.c.bf16 %v8755_v4, %v8755_v4 }
 0x6e4   : > { %8932 = vst.msk [vmem:[%s14903_s13 + $0x60] sm:$0xf] %vm307_vm7, %v9646_v50  ;;  %v9647_v10 = vpack.c.bf16 %v8753_v29, %v8753_v29  ;;  %v10735_v17 = vpop.f32.mrb[12].mxu1 }
 0x6e5   : > { %8935 = vst.msk [vmem:[%s14903_s13 + $0x6c] sm:$0xf] %vm307_vm7, %v9649_v59  ;;  %v10816_v7 = vadd.f32 %v14959_v61, %v10735_v17  ;;  %v8661_v22 = vpop.f32.mrb[13].mxu1 }
 0x6e6   : > { %8933 = vst.msk [vmem:[%s14903_s13 + $0x64] sm:$0xf] %vm307_vm7, %v9647_v10  ;;  %v10818_v36 = vadd.f32 %v14959_v61, %v8661_v22  ;;  %v10736_v1 = vpop.f32.mrb[14].mxu1 }
 0x6e7   : > { %v8758_v49 = vmax.f32 %v10816_v7, 0.0  ;;  %v10820_v56 = vadd.f32 %v14959_v61, %v10736_v1  ;;  %v8664_v41 = vpop.f32.mrb[15].mxu1 }
 0x6e8   : > { %v8756_v54 = vmax.f32 %v10818_v36, 0.0  ;;  %v10822_v33 = vadd.f32 %v14959_v61, %v8664_v41 }
 0x6e9   : > { %v9652_v19 = vpack.c.bf16 %v8758_v49, %v8758_v49  ;;  %v8759_v58 = vmax.f32 %v10820_v56, 0.0 }
 0x6ea   : > { %v9650_v28 = vpack.c.bf16 %v8756_v54, %v8756_v54  ;;  %v8757_v16 = vmax.f32 %v10822_v33, 0.0 }
 0x6eb   : > { %8938 = vst.msk [vmem:[%s14903_s13 + $0x78] sm:$0xf] %vm307_vm7, %v9652_v19  ;;  %v9653_v35 = vpack.c.bf16 %v8759_v58, %v8759_v58 }
 0x6ec   : > { %8936 = vst.msk [vmem:[%s14903_s13 + $0x70] sm:$0xf] %vm307_vm7, %v9650_v28  ;;  %v9651_v40 = vpack.c.bf16 %v8757_v16, %v8757_v16  ;;  %v10739_v23 = vpop.f32.mrb[16].mxu1 }
 0x6ed   : > { %8939 = vst.msk [vmem:[%s14903_s13 + $0x7c] sm:$0xf] %vm307_vm7, %v9653_v35  ;;  %v10824_v18 = vadd.f32 %v14959_v61, %v10739_v23  ;;  %v8677_v24 = vpop.f32.mrb[17].mxu1 }
 0x6ee   : > { %8937 = vst.msk [vmem:[%s14903_s13 + $0x74] sm:$0xf] %vm307_vm7, %v9651_v40  ;;  %v10826_v63 = vadd.f32 %v14959_v61, %v8677_v24  ;;  %v10740_v3 = vpop.f32.mrb[18].mxu1 }
 0x6ef   : > { %v8762_v37 = vmax.f32 %v10824_v18, 0.0  ;;  %v10828_v9 = vadd.f32 %v14959_v61, %v10740_v3  ;;  %v8680_v55 = vpop.f32.mrb[19].mxu1 }
 0x6f0   : > { %v8760_v60 = vmax.f32 %v10826_v63, 0.0  ;;  %v10830_v38 = vadd.f32 %v14959_v61, %v8680_v55 }
 0x6f1   : > { %v9656_v15 = vpack.c.bf16 %v8762_v37, %v8762_v37  ;;  %v8763_v52 = vmax.f32 %v10828_v9, 0.0 }
 0x6f2   : > { %v9654_v14 = vpack.c.bf16 %v8760_v60, %v8760_v60  ;;  %v8761_v11 = vmax.f32 %v10830_v38, 0.0 }
 0x6f3   : > { %8942 = vst.msk [vmem:[%s14903_s13 + $0x88] sm:$0xf] %vm307_vm7, %v9656_v15  ;;  %v9657_v45 = vpack.c.bf16 %v8763_v52, %v8763_v52 }
 0x6f4   : > { %8940 = vst.msk [vmem:[%s14903_s13 + $0x80] sm:$0xf] %vm307_vm7, %v9654_v14  ;;  %v9655_v51 = vpack.c.bf16 %v8761_v11, %v8761_v11 }
 0x6f5   : > { %8943 = vst.msk [vmem:[%s14903_s13 + $0x8c] sm:$0xf] %vm307_vm7, %v9657_v45 }
 0x6f6   : > { %8941 = vst.msk [vmem:[%s14903_s13 + $0x84] sm:$0xf] %vm307_vm7, %v9655_v51 }
 0x6f7 PF: > { %s18_s27 = sadd.s32 1, %s11610_s27  }
 0x6f8   : > { %p15_p4 = scmp.ge.s32.totalorder %s18_s27, 4  }
 0x6fa   :  { %17 = sbr.rel (!%p15_p4) target bundleno = 1 (0x1), region = 98 }

</bundles_post_ra>
